<compile_context>
chip_gen: v5e
topology: v5e:2x2
jax: 0.10.0
libtpu: 0.0.40
codegen_flags: <defaults>
</compile_context>

<pallas_src>
import functools

import jax
import jax.numpy as jnp
from jax.experimental import pallas as pl
from jax.experimental.pallas import tpu as pltpu


# ----------------------------------------------------------------------------
# Small helpers: per-generation VMEM budgeting, row-tile choice, row padding.
# ----------------------------------------------------------------------------
def _lane_pad(n):
    return ((n + 127) // 128) * 128


def _vmem_capacity_bytes():
    try:
        cap = int(getattr(pltpu.get_tpu_info(), "vmem_capacity_bytes"))
        if cap > 0:
            return cap
    except Exception:
        pass
    return 64 * 1024 * 1024  # conservative default (v7x per-core VMEM)


def _choose_tm(m_rows, streamed_bytes_per_row, *, tm_max=1024, tm_min=128,
               vmem_frac=0.25):
    """Pick the row tile: as large as the (double-buffered) VMEM budget allows,
    capped at tm_max, but keeping >= 2 grid steps when there is enough work so
    v7x megacore can split the 'parallel' M axis across both TensorCores."""
    budget = int(_vmem_capacity_bytes() * vmem_frac)
    tm = budget // max(1, 2 * streamed_bytes_per_row)
    tm = max(tm_min, min(tm_max, (tm // tm_min) * tm_min))
    while tm > tm_min and m_rows <= tm:
        tm //= 2
    return tm


def _vmem_limit(streamed_block_bytes, resident_bytes):
    cap = _vmem_capacity_bytes()
    need = 2 * streamed_block_bytes + resident_bytes + (4 << 20)
    return int(min(cap, max(32 << 20, 2 * need)))


def _pad_rows(x, m_pad):
    m = x.shape[0]
    if m == m_pad:
        return x
    return jnp.pad(x, ((0, m_pad - m),) + ((0, 0),) * (x.ndim - 1))


# ----------------------------------------------------------------------------
# Pallas kernel 1: all five offset/height heads (5x5, pad 2, stride 1 convs)
# as a single im2col matmul + bias.  bf16 operands, f32 accumulate/output,
# lane-dense (128-wide) output columns.
# ----------------------------------------------------------------------------
def _offset_head_kernel(p_ref, w_ref, b_ref, o_ref):
    acc = jnp.dot(p_ref[...], w_ref[...], preferred_element_type=jnp.float32)
    o_ref[...] = (acc + b_ref[...]).astype(o_ref.dtype)


def offset_heads(patches, w_all, b_all):
    m, k = patches.shape
    kout = w_all.shape[1]

    row_bytes = (_lane_pad(k) * patches.dtype.itemsize +
                 _lane_pad(kout) * 4)                       # streamed per row
    tm = _choose_tm(m, row_bytes)
    m_pad = pl.cdiv(m, tm) * tm
    patches_p = _pad_rows(patches, m_pad)

    resident = _lane_pad(kout) * (k * w_all.dtype.itemsize + 4)
    limit = _vmem_limit(tm * row_bytes, resident)

    return pl.pallas_call(
        _offset_head_kernel,
        out_shape=jax.ShapeDtypeStruct((m_pad, kout), jnp.float32),
        grid_spec=pltpu.PrefetchScalarGridSpec(
            num_scalar_prefetch=0,
            grid=(m_pad // tm,),
            in_specs=[
                pl.BlockSpec((tm, k), lambda i: (i, 0)),
                pl.BlockSpec((k, kout), lambda i: (0, 0)),
                pl.BlockSpec((1, kout), lambda i: (0, 0)),
            ],
            out_specs=pl.BlockSpec((tm, kout), lambda i: (i, 0)),
        ),
        compiler_params=pltpu.CompilerParams(
            dimension_semantics=("parallel",),
            vmem_limit_bytes=limit),
    )(patches_p, w_all, b_all)


# ----------------------------------------------------------------------------
# Pallas kernel 2: h_z post-processing, inverse-distance blend of the 4 frames
# and the final conv (as a matmul) fused.  Features arrive bf16, tap-outer
# layout [tm, N*inc]; h_z arrives as a small [tm, N] f32 tile and is expanded
# across channels in-kernel with a constant selection matmul.
# ----------------------------------------------------------------------------
def _blend_conv_kernel(hz_ref, f1_ref, f2_ref, f4_ref, f5_ref, w_ref, o_ref):
    n_taps = hz_ref.shape[-1]
    ck = f1_ref.shape[-1]
    inc = ck // n_taps

    # Constant tap -> (tap, channel) expansion matrix (no lane reshapes needed).
    rows = jax.lax.broadcasted_iota(jnp.int32, (n_taps, ck), 0)
    cols = jax.lax.broadcasted_iota(jnp.int32, (n_taps, ck), 1)
    expand = jnp.logical_and(cols >= rows * inc,
                             cols < (rows + 1) * inc).astype(jnp.float32)

    # h_z = clamp(h_conv(src) + 1.5, 0, 3) / 3
    hz = jnp.clip(hz_ref[...] + 1.5, 0.0, 3.0) * (1.0 / 3.0)          # (tm, N)
    hz_e = jnp.dot(hz, expand, preferred_element_type=jnp.float32)    # (tm, CK)

    eps = 1e-15
    d1 = (hz_e - 0.0) ** 2 + eps
    d2 = (hz_e - 1.0 / 3.0) ** 2 + eps
    d4 = (hz_e - 2.0 / 3.0) ** 2 + eps
    d5 = (hz_e - 1.0) ** 2 + eps

    # Inverse-distance blend, re-associated so only ONE reciprocal is needed:
    #   (sum_k f_k / d_k) / (sum_k 1 / d_k)
    #     == (sum_k f_k * prod_{j!=k} d_j) / (sum_k prod_{j!=k} d_j)
    d12 = d1 * d2
    d45 = d4 * d5
    c1 = d2 * d45
    c2 = d1 * d45
    c4 = d12 * d5
    c5 = d12 * d4

    num = (f1_ref[...].astype(jnp.float32) * c1 +
           f2_ref[...].astype(jnp.float32) * c2 +
           f4_ref[...].astype(jnp.float32) * c4 +
           f5_ref[...].astype(jnp.float32) * c5)
    den = c1 + c2 + c4 + c5

    if hasattr(pl, "reciprocal"):
        inv = pl.reciprocal(den, approx=True)    # EUP slot, nearly free
    else:
        inv = 1.0 / den
    central = num * inv

    o_ref[...] = jnp.dot(central, w_ref[...],
                         preferred_element_type=jnp.float32).astype(o_ref.dtype)


def blend_and_conv(hz, f1, f2, f4, f5, w_mat):
    m, ck = f1.shape
    n_taps = hz.shape[1]
    outc_p = w_mat.shape[1]

    row_bytes = (4 * _lane_pad(ck) * f1.dtype.itemsize +
                 _lane_pad(n_taps) * 4 +
                 _lane_pad(outc_p) * 4)
    tm = _choose_tm(m, row_bytes)
    m_pad = pl.cdiv(m, tm) * tm

    hz_p = _pad_rows(hz, m_pad)
    f1_p = _pad_rows(f1, m_pad)
    f2_p = _pad_rows(f2, m_pad)
    f4_p = _pad_rows(f4, m_pad)
    f5_p = _pad_rows(f5, m_pad)

    resident = _lane_pad(outc_p) * ck * 4
    limit = _vmem_limit(tm * row_bytes, resident)

    feat_spec = pl.BlockSpec((tm, ck), lambda i: (i, 0))
    return pl.pallas_call(
        _blend_conv_kernel,
        out_shape=jax.ShapeDtypeStruct((m_pad, outc_p), jnp.float32),
        grid_spec=pltpu.PrefetchScalarGridSpec(
            num_scalar_prefetch=0,
            grid=(m_pad // tm,),
            in_specs=[
                pl.BlockSpec((tm, n_taps), lambda i: (i, 0)),
                feat_spec, feat_spec, feat_spec, feat_spec,
                pl.BlockSpec((ck, outc_p), lambda i: (0, 0)),
            ],
            out_specs=pl.BlockSpec((tm, outc_p), lambda i: (i, 0)),
        ),
        compiler_params=pltpu.CompilerParams(
            dimension_semantics=("parallel",),
            vmem_limit_bytes=limit),
    )(hz_p, f1_p, f2_p, f4_p, f5_p, w_mat)


# ----------------------------------------------------------------------------
# JAX glue: deformable bilinear sampling (get_2D_output equivalent), done on a
# channel-last source so the gathered result is already (B, H, W, N, C) and no
# post-gather transposes are needed.
# TODO(synk): the per-pixel gather (torch.gather) is data-dependent and stays
# in XLA (jnp.take_along_axis) rather than inside a Pallas kernel.
# ----------------------------------------------------------------------------
def get_2d_output(x, offset, ks, padding, stride):
    """x: (B, C, H, W) NCHW; offset: (B, h, w, 2N) channel-last.
    Returns bilinearly sampled features of shape (B, h, w, N, C)."""
    b, c, H, W = x.shape
    h, w = offset.shape[1], offset.shape[2]
    N = offset.shape[-1] // 2

    x_pad = jnp.pad(x, ((0, 0), (0, 0), (padding, padding), (padding, padding)))
    Hp, Wp = x_pad.shape[2], x_pad.shape[3]

    # p_n : kernel-tap offsets, flattened (x's first, then y's)   [2N]
    rng = jnp.arange(-(ks - 1) // 2, (ks - 1) // 2 + 1)
    pnx, pny = jnp.meshgrid(rng, rng, indexing="ij")
    p_n = jnp.concatenate([pnx.reshape(-1), pny.reshape(-1)]).astype(offset.dtype)

    # p_0 : sampling-grid centers                                  [h, w, 2N]
    p0x = jnp.arange(padding, h * stride + padding, stride, dtype=offset.dtype)
    p0y = jnp.arange(padding, w * stride + padding, stride, dtype=offset.dtype)
    P0x, P0y = jnp.meshgrid(p0x, p0y, indexing="ij")
    p0 = jnp.concatenate(
        [jnp.broadcast_to(P0x[..., None], (h, w, N)),
         jnp.broadcast_to(P0y[..., None], (h, w, N))], axis=-1)

    p = offset + p_n[None, None, None, :] + p0[None]               # [b, h, w, 2N]

    def clamp_xy(q):
        return jnp.concatenate([jnp.clip(q[..., :N], 0, Hp - 1),
                                jnp.clip(q[..., N:], 0, Wp - 1)], axis=-1)

    q_floor = jnp.floor(p)
    q_lt = clamp_xy(q_floor).astype(jnp.int32)
    q_rb = clamp_xy(q_floor + 1).astype(jnp.int32)
    q_rt = jnp.concatenate([q_lt[..., :N], q_rb[..., N:]], axis=-1)
    q_lb = jnp.concatenate([q_rb[..., :N], q_lt[..., N:]], axis=-1)
    p = clamp_xy(p)

    def g(q, sx, sy):
        return ((1.0 + sx * (q[..., :N].astype(p.dtype) - p[..., :N])) *
                (1.0 + sy * (q[..., N:].astype(p.dtype) - p[..., N:])))

    g_lt = g(q_lt, 1.0, 1.0)
    g_rb = g(q_rb, -1.0, -1.0)
    g_lb = g(q_lb, -1.0, 1.0)
    g_rt = g(q_rt, 1.0, -1.0)

    # channel-last source so the gather lands directly in (b, h, w, N, c)
    x_cl = jnp.transpose(x_pad, (0, 2, 3, 1)).reshape(b, Hp * Wp, c)

    def gather(q):
        idx = (q[..., :N] * Wp + q[..., N:]).reshape(b, h * w * N)
        idx = jnp.broadcast_to(idx[:, :, None], (b, h * w * N, c))
        return jnp.take_along_axis(x_cl, idx, axis=1).reshape(b, h, w, N, c)

    x_q_lt = gather(q_lt)
    x_q_rb = gather(q_rb)
    x_q_lb = gather(q_lb)
    x_q_rt = gather(q_rt)

    return (g_lt[..., None] * x_q_lt + g_rb[..., None] * x_q_rb +
            g_lb[..., None] * x_q_lb + g_rt[..., None] * x_q_rt)


# ----------------------------------------------------------------------------
# Full forward pass (modulation=False, bias-free output conv, stride=1).
# ----------------------------------------------------------------------------
def deform_conv3d_forward(img1, img2, img4, img5, offset_source, params,
                          ks=3, padding=1, stride=1):
    B, Cs, H, W = offset_source.shape
    inc = img1.shape[1]
    outc = params["w_conv"].shape[0]
    N = ks * ks
    M = B * H * W

    # --- im2col for the 5x5 / pad-2 / stride-1 offset-head convolutions ----
    # TODO(synk): a halo-tiled (manual-DMA) conv would avoid this 25x HBM
    # read/write blow-up; kept in XLA (in bf16 to halve the traffic) for now.
    pads = jnp.pad(offset_source, ((0, 0), (0, 0), (2, 2), (2, 2)))
    cols = [pads[:, :, kh:kh + H, kw:kw + W] for kh in range(5) for kw in range(5)]
    patches = jnp.stack(cols, axis=2)                               # [B, Cs, 25, H, W]
    patches = jnp.transpose(patches, (0, 3, 4, 1, 2)).reshape(M, Cs * 25)
    patches = patches.astype(jnp.bfloat16)

    def flat_w(wt):  # torch layout [out, Cs, 5, 5] -> [Cs*25, out]
        return wt.reshape(wt.shape[0], -1).T

    w_all = jnp.concatenate(
        [flat_w(params["w_p1"]), flat_w(params["w_p2"]),
         flat_w(params["w_p4"]), flat_w(params["w_p5"]),
         flat_w(params["w_h"])], axis=1)                            # [Cs*25, 9N]
    b_all = jnp.concatenate(
        [params["b_p1"], params["b_p2"], params["b_p4"],
         params["b_p5"], params["b_h"]])[None, :]                   # [1, 9N]

    kout = 9 * N
    kout_p = _lane_pad(kout)                                        # 81 -> 128
    w_all = jnp.pad(w_all, ((0, 0), (0, kout_p - kout))).astype(jnp.bfloat16)
    b_all = jnp.pad(b_all, ((0, 0), (0, kout_p - kout))).astype(jnp.float32)

    heads = offset_heads(patches, w_all, b_all)[:M]                 # Pallas matmul
    heads_hw = heads.reshape(B, H, W, kout_p)
    # (diagnostic offset-mean print of the torch module is omitted — no output effect)

    offsets = [heads_hw[..., k * 2 * N:(k + 1) * 2 * N] for k in range(4)]  # [B,H,W,2N]
    hz = heads_hw[..., 8 * N:9 * N].reshape(M, N)                            # [M, N] f32

    feats = [get_2d_output(im, off, ks, padding, stride)
             for im, off in zip((img1, img2, img4, img5), offsets)]          # [B,H,W,N,inc]
    feats = [f.reshape(M, N * inc).astype(jnp.bfloat16) for f in feats]      # tap-outer

    # final conv weight, reordered to the tap-outer feature layout and
    # zero-padded to a lane-dense (multiple-of-128) output width.
    wc = params["w_conv"].reshape(outc, inc, N)
    w_mat = jnp.transpose(wc, (2, 1, 0)).reshape(N * inc, outc)              # [N*inc, outc]
    outc_p = _lane_pad(outc)
    w_mat = jnp.pad(w_mat, ((0, 0), (0, outc_p - outc))).astype(jnp.float32)

    out = blend_and_conv(hz, feats[0], feats[1], feats[2], feats[3], w_mat)  # Pallas fused
    out = out[:M, :outc].reshape(B, H, W, outc)
    return jnp.transpose(out, (0, 3, 1, 2))                                  # NCHW


# ----------------------------------------------------------------------------
# Deterministic parameter construction + example run.
# ----------------------------------------------------------------------------
def make_params(key, inc, outc, cs, ks):
    N = ks * ks
    keys = jax.random.split(key, 16)
    # NOTE: the torch module zero-inits the offset/height heads; we use small
    # deterministic non-zero values so the deformable sampling path is
    # actually exercised (shapes match the torch parameters exactly).
    p = {}
    p["w_p1"] = 0.05 * jax.random.normal(keys[0], (2 * N, cs, 5, 5), jnp.float32)
    p["w_p2"] = 0.05 * jax.random.normal(keys[1], (2 * N, cs, 5, 5), jnp.float32)
    p["w_p4"] = 0.05 * jax.random.normal(keys[2], (2 * N, cs, 5, 5), jnp.float32)
    p["w_p5"] = 0.05 * jax.random.normal(keys[3], (2 * N, cs, 5, 5), jnp.float32)
    p["b_p1"] = 0.01 * jax.random.normal(keys[4], (2 * N,), jnp.float32)
    p["b_p2"] = 0.01 * jax.random.normal(keys[5], (2 * N,), jnp.float32)
    p["b_p4"] = 0.01 * jax.random.normal(keys[6], (2 * N,), jnp.float32)
    p["b_p5"] = 0.01 * jax.random.normal(keys[7], (2 * N,), jnp.float32)
    p["w_h"] = 0.05 * jax.random.normal(keys[8], (N, cs, 5, 5), jnp.float32)
    p["b_h"] = 0.01 * jax.random.normal(keys[9], (N,), jnp.float32)
    p["w_conv"] = 0.1 * jax.random.normal(keys[10], (outc, inc, ks, ks), jnp.float32)
    return p


if __name__ == "__main__":
    B, inc, outc, Cs, H, W = 2, 4, 8, 6, 16, 16
    ks, padding, stride = 3, 1, 1

    key = jax.random.PRNGKey(0)
    k_in = jax.random.split(key, 6)
    img1 = jax.random.normal(k_in[0], (B, inc, H, W), jnp.float32)
    img2 = jax.random.normal(k_in[1], (B, inc, H, W), jnp.float32)
    img4 = jax.random.normal(k_in[2], (B, inc, H, W), jnp.float32)
    img5 = jax.random.normal(k_in[3], (B, inc, H, W), jnp.float32)
    offset_source = jax.random.normal(k_in[4], (B, Cs, H, W), jnp.float32)

    params = make_params(k_in[5], inc, outc, Cs, ks)

    fwd = jax.jit(functools.partial(deform_conv3d_forward,
                                    ks=ks, padding=padding, stride=stride))
    out = fwd(img1, img2, img4, img5, offset_source, params)
    jax.block_until_ready(out)
    assert out.shape == (B, outc, H, W)
    print("KERNEL_OK")
</pallas_src>

<mosaic_0001>
module attributes {stable_mosaic.version = 11 : i64} {
  func.func @_offset_head_kernel(%arg0: i32, %arg1: memref<256x150xbf16, #tpu.memory_space<vmem>>, %arg2: memref<150x128xbf16, #tpu.memory_space<vmem>>, %arg3: memref<1x128xf32, #tpu.memory_space<vmem>>, %arg4: memref<256x128xf32, #tpu.memory_space<vmem>>) attributes {dimension_semantics = [#tpu.dimension_semantics<parallel>], iteration_bounds = array<i64: 2>, scalar_prefetch = 0 : i64, scratch_operands = 0 : i64, tpu.core_type = #tpu.core_type<tc>, window_params = [{transform_indices = @transform_0, window_bounds = array<i64: 256, 150>}, {pipeline_mode = #tpu.pipeline_mode<synchronous>, transform_indices = @transform_1, window_bounds = array<i64: 150, 128>}, {pipeline_mode = #tpu.pipeline_mode<synchronous>, transform_indices = @transform_2, window_bounds = array<i64: 1, 128>}, {transform_indices = @transform_3, window_bounds = array<i64: 256, 128>}]} {
    %c0 = arith.constant 0 : index
    %c0_0 = arith.constant 0 : index
    %0 = vector.load %arg1[%c0, %c0_0] : memref<256x150xbf16, #tpu.memory_space<vmem>>, vector<256x150xbf16>
    %c0_1 = arith.constant 0 : index
    %c0_2 = arith.constant 0 : index
    %1 = vector.load %arg2[%c0_1, %c0_2] : memref<150x128xbf16, #tpu.memory_space<vmem>>, vector<150x128xbf16>
    %cst = arith.constant dense<0.000000e+00> : vector<256x128xf32>
    %2 = tpu.matmul %0, %1, %cst {dimension_numbers = #tpu.dot_dimension_numbers<[1], [0], [0], [1], [0, 0, 1, 1], [], []>} : vector<256x150xbf16>, vector<150x128xbf16>, vector<256x128xf32> -> vector<256x128xf32>
    %c0_3 = arith.constant 0 : index
    %c0_4 = arith.constant 0 : index
    %3 = vector.load %arg3[%c0_3, %c0_4] : memref<1x128xf32, #tpu.memory_space<vmem>>, vector<1x128xf32>
    %4 = vector.broadcast %3 : vector<1x128xf32> to vector<256x128xf32>
    %5 = arith.addf %2, %4 : vector<256x128xf32>
    %c0_5 = arith.constant 0 : index
    %c0_6 = arith.constant 0 : index
    %6 = vector.load %arg4[%c0_5, %c0_6] : memref<256x128xf32, #tpu.memory_space<vmem>>, vector<256x128xf32>
    tpu.vector_store %arg4[%c0_5, %c0_6], %5 {strides = array<i32>} : memref<256x128xf32, #tpu.memory_space<vmem>>, vector<256x128xf32>,
    return
  }
  func.func @transform_0(%arg0: i32) -> (i32, i32) {
    %c0_i32 = arith.constant 0 : i32
    %c0_i32_0 = arith.constant 0 : i32
    return %arg0, %c0_i32 : i32, i32
  }
  func.func @transform_1(%arg0: i32) -> (i32, i32) {
    %c0_i32 = arith.constant 0 : i32
    %c0_i32_0 = arith.constant 0 : i32
    %c0_i32_1 = arith.constant 0 : i32
    return %c0_i32, %c0_i32_0 : i32, i32
  }
  func.func @transform_2(%arg0: i32) -> (i32, i32) {
    %c0_i32 = arith.constant 0 : i32
    %c0_i32_0 = arith.constant 0 : i32
    %c0_i32_1 = arith.constant 0 : i32
    return %c0_i32, %c0_i32_0 : i32, i32
  }
  func.func @transform_3(%arg0: i32) -> (i32, i32) {
    %c0_i32 = arith.constant 0 : i32
    %c0_i32_0 = arith.constant 0 : i32
    return %arg0, %c0_i32 : i32, i32
  }
}

module attributes {stable_mosaic.version = 11 : i64} {
  func.func @_blend_conv_kernel(%arg0: i32, %arg1: memref<256x9xf32, #tpu.memory_space<vmem>>, %arg2: memref<256x36xbf16, #tpu.memory_space<vmem>>, %arg3: memref<256x36xbf16, #tpu.memory_space<vmem>>, %arg4: memref<256x36xbf16, #tpu.memory_space<vmem>>, %arg5: memref<256x36xbf16, #tpu.memory_space<vmem>>, %arg6: memref<36x128xf32, #tpu.memory_space<vmem>>, %arg7: memref<256x128xf32, #tpu.memory_space<vmem>>) attributes {dimension_semantics = [#tpu.dimension_semantics<parallel>], iteration_bounds = array<i64: 2>, scalar_prefetch = 0 : i64, scratch_operands = 0 : i64, tpu.core_type = #tpu.core_type<tc>, window_params = [{transform_indices = @transform_0, window_bounds = array<i64: 256, 9>}, {transform_indices = @transform_1, window_bounds = array<i64: 256, 36>}, {transform_indices = @transform_2, window_bounds = array<i64: 256, 36>}, {transform_indices = @transform_3, window_bounds = array<i64: 256, 36>}, {transform_indices = @transform_4, window_bounds = array<i64: 256, 36>}, {pipeline_mode = #tpu.pipeline_mode<synchronous>, transform_indices = @transform_5, window_bounds = array<i64: 36, 128>}, {transform_indices = @transform_6, window_bounds = array<i64: 256, 128>}]} {
    %0 = tpu.iota {dimensions = array<i32: 0>} : vector<9x36xi32>
    %1 = tpu.iota {dimensions = array<i32: 1>} : vector<9x36xi32>
    %c4_i32 = arith.constant 4 : i32
    %2 = vector.broadcast %c4_i32 : i32 to vector<9x36xi32>
    %3 = arith.muli %0, %2 : vector<9x36xi32>
    %4 = arith.cmpi sge, %1, %3 : vector<9x36xi32>
    %c1_i32 = arith.constant 1 : i32
    %5 = vector.broadcast %c1_i32 : i32 to vector<9x36xi32>
    %6 = arith.addi %0, %5 : vector<9x36xi32>
    %c4_i32_0 = arith.constant 4 : i32
    %7 = vector.broadcast %c4_i32_0 : i32 to vector<9x36xi32>
    %8 = arith.muli %6, %7 : vector<9x36xi32>
    %9 = arith.cmpi slt, %1, %8 : vector<9x36xi32>
    %10 = arith.andi %4, %9 : vector<9x36xi1>
    %11 = arith.extui %10 : vector<9x36xi1> to vector<9x36xi32>
    %12 = arith.sitofp %11 : vector<9x36xi32> to vector<9x36xf32>
    %c0 = arith.constant 0 : index
    %c0_1 = arith.constant 0 : index
    %13 = vector.load %arg1[%c0, %c0_1] : memref<256x9xf32, #tpu.memory_space<vmem>>, vector<256x9xf32>
    %cst = arith.constant 1.500000e+00 : f32
    %14 = vector.broadcast %cst : f32 to vector<256x9xf32>
    %15 = arith.addf %13, %14 : vector<256x9xf32>
    %cst_2 = arith.constant 0.000000e+00 : f32
    %cst_3 = arith.constant 3.000000e+00 : f32
    %16 = vector.broadcast %cst_2 : f32 to vector<256x9xf32>
    %17 = arith.maximumf %16, %15 : vector<256x9xf32>
    %18 = vector.broadcast %cst_3 : f32 to vector<256x9xf32>
    %19 = arith.minimumf %18, %17 : vector<256x9xf32>
    %cst_4 = arith.constant 0.333333343 : f32
    %20 = vector.broadcast %cst_4 : f32 to vector<256x9xf32>
    %21 = arith.mulf %19, %20 : vector<256x9xf32>
    %cst_5 = arith.constant dense<0.000000e+00> : vector<256x36xf32>
    %22 = tpu.matmul %21, %12, %cst_5 {dimension_numbers = #tpu.dot_dimension_numbers<[1], [0], [0], [1], [0, 0, 1, 1], [], []>} : vector<256x9xf32>, vector<9x36xf32>, vector<256x36xf32> -> vector<256x36xf32>
    %cst_6 = arith.constant 0.000000e+00 : f32
    %23 = vector.broadcast %cst_6 : f32 to vector<256x36xf32>
    %24 = arith.subf %22, %23 : vector<256x36xf32>
    %25 = arith.mulf %24, %24 : vector<256x36xf32>
    %cst_7 = arith.constant 1.000000e-15 : f32
    %26 = vector.broadcast %cst_7 : f32 to vector<256x36xf32>
    %27 = arith.addf %25, %26 : vector<256x36xf32>
    %cst_8 = arith.constant 0.333333343 : f32
    %28 = vector.broadcast %cst_8 : f32 to vector<256x36xf32>
    %29 = arith.subf %22, %28 : vector<256x36xf32>
    %30 = arith.mulf %29, %29 : vector<256x36xf32>
    %cst_9 = arith.constant 1.000000e-15 : f32
    %31 = vector.broadcast %cst_9 : f32 to vector<256x36xf32>
    %32 = arith.addf %30, %31 : vector<256x36xf32>
    %cst_10 = arith.constant 0.666666686 : f32
    %33 = vector.broadcast %cst_10 : f32 to vector<256x36xf32>
    %34 = arith.subf %22, %33 : vector<256x36xf32>
    %35 = arith.mulf %34, %34 : vector<256x36xf32>
    %cst_11 = arith.constant 1.000000e-15 : f32
    %36 = vector.broadcast %cst_11 : f32 to vector<256x36xf32>
    %37 = arith.addf %35, %36 : vector<256x36xf32>
    %cst_12 = arith.constant 1.000000e+00 : f32
    %38 = vector.broadcast %cst_12 : f32 to vector<256x36xf32>
    %39 = arith.subf %22, %38 : vector<256x36xf32>
    %40 = arith.mulf %39, %39 : vector<256x36xf32>
    %cst_13 = arith.constant 1.000000e-15 : f32
    %41 = vector.broadcast %cst_13 : f32 to vector<256x36xf32>
    %42 = arith.addf %40, %41 : vector<256x36xf32>
    %43 = arith.mulf %27, %32 : vector<256x36xf32>
    %44 = arith.mulf %37, %42 : vector<256x36xf32>
    %45 = arith.mulf %32, %44 : vector<256x36xf32>
    %46 = arith.mulf %27, %44 : vector<256x36xf32>
    %47 = arith.mulf %43, %42 : vector<256x36xf32>
    %48 = arith.mulf %43, %37 : vector<256x36xf32>
    %c0_14 = arith.constant 0 : index
    %c0_15 = arith.constant 0 : index
    %49 = vector.load %arg2[%c0_14, %c0_15] : memref<256x36xbf16, #tpu.memory_space<vmem>>, vector<256x36xbf16>
    %50 = arith.extf %49 : vector<256x36xbf16> to vector<256x36xf32>
    %51 = arith.mulf %50, %45 : vector<256x36xf32>
    %c0_16 = arith.constant 0 : index
    %c0_17 = arith.constant 0 : index
    %52 = vector.load %arg3[%c0_16, %c0_17] : memref<256x36xbf16, #tpu.memory_space<vmem>>, vector<256x36xbf16>
    %53 = arith.extf %52 : vector<256x36xbf16> to vector<256x36xf32>
    %54 = arith.mulf %53, %46 : vector<256x36xf32>
    %55 = arith.addf %51, %54 : vector<256x36xf32>
    %c0_18 = arith.constant 0 : index
    %c0_19 = arith.constant 0 : index
    %56 = vector.load %arg4[%c0_18, %c0_19] : memref<256x36xbf16, #tpu.memory_space<vmem>>, vector<256x36xbf16>
    %57 = arith.extf %56 : vector<256x36xbf16> to vector<256x36xf32>
    %58 = arith.mulf %57, %47 : vector<256x36xf32>
    %59 = arith.addf %55, %58 : vector<256x36xf32>
    %c0_20 = arith.constant 0 : index
    %c0_21 = arith.constant 0 : index
    %60 = vector.load %arg5[%c0_20, %c0_21] : memref<256x36xbf16, #tpu.memory_space<vmem>>, vector<256x36xbf16>
    %61 = arith.extf %60 : vector<256x36xbf16> to vector<256x36xf32>
    %62 = arith.mulf %61, %48 : vector<256x36xf32>
    %63 = arith.addf %59, %62 : vector<256x36xf32>
    %64 = arith.addf %45, %46 : vector<256x36xf32>
    %65 = arith.addf %64, %47 : vector<256x36xf32>
    %66 = arith.addf %65, %48 : vector<256x36xf32>
    %67 = tpu.reciprocal %66 {approx = true} : vector<256x36xf32> -> vector<256x36xf32>
    %68 = arith.mulf %63, %67 : vector<256x36xf32>
    %c0_22 = arith.constant 0 : index
    %c0_23 = arith.constant 0 : index
    %69 = vector.load %arg6[%c0_22, %c0_23] : memref<36x128xf32, #tpu.memory_space<vmem>>, vector<36x128xf32>
    %cst_24 = arith.constant dense<0.000000e+00> : vector<256x128xf32>
    %70 = tpu.matmul %68, %69, %cst_24 {dimension_numbers = #tpu.dot_dimension_numbers<[1], [0], [0], [1], [0, 0, 1, 1], [], []>} : vector<256x36xf32>, vector<36x128xf32>, vector<256x128xf32> -> vector<256x128xf32>
    %c0_25 = arith.constant 0 : index
    %c0_26 = arith.constant 0 : index
    %71 = vector.load %arg7[%c0_25, %c0_26] : memref<256x128xf32, #tpu.memory_space<vmem>>, vector<256x128xf32>
    tpu.vector_store %arg7[%c0_25, %c0_26], %70 {strides = array<i32>} : memref<256x128xf32, #tpu.memory_space<vmem>>, vector<256x128xf32>,
    return
  }
  func.func @transform_0(%arg0: i32) -> (i32, i32) {
    %c0_i32 = arith.constant 0 : i32
    %c0_i32_0 = arith.constant 0 : i32
    return %arg0, %c0_i32 : i32, i32
  }
  func.func @transform_1(%arg0: i32) -> (i32, i32) {
    %c0_i32 = arith.constant 0 : i32
    %c0_i32_0 = arith.constant 0 : i32
    return %arg0, %c0_i32 : i32, i32
  }
  func.func @transform_2(%arg0: i32) -> (i32, i32) {
    %c0_i32 = arith.constant 0 : i32
    %c0_i32_0 = arith.constant 0 : i32
    return %arg0, %c0_i32 : i32, i32
  }
  func.func @transform_3(%arg0: i32) -> (i32, i32) {
    %c0_i32 = arith.constant 0 : i32
    %c0_i32_0 = arith.constant 0 : i32
    return %arg0, %c0_i32 : i32, i32
  }
  func.func @transform_4(%arg0: i32) -> (i32, i32) {
    %c0_i32 = arith.constant 0 : i32
    %c0_i32_0 = arith.constant 0 : i32
    return %arg0, %c0_i32 : i32, i32
  }
  func.func @transform_5(%arg0: i32) -> (i32, i32) {
    %c0_i32 = arith.constant 0 : i32
    %c0_i32_0 = arith.constant 0 : i32
    %c0_i32_1 = arith.constant 0 : i32
    return %c0_i32, %c0_i32_0 : i32, i32
  }
  func.func @transform_6(%arg0: i32) -> (i32, i32) {
    %c0_i32 = arith.constant 0 : i32
    %c0_i32_0 = arith.constant 0 : i32
    return %arg0, %c0_i32 : i32, i32
  }
}

</mosaic_0001>

<bundles_post_ra>
// kernel: deform_conv3d_forward.2
= control target key start
LH: loop header
LB: loop body
LE: loop exit
PB: predicated region body
PF: predicated region fallthrough
CT: control target
= control target key end

     0   :  { %s1034_s12 = smov 0   ;;  %s1247_s0 = inlined_call_operand.vmem [shape: bf16[512,150], index: 0, kind: input, shape index: {}]   ;;  %s1248_s1 = inlined_call_operand.vmem [shape: bf16[150,128], index: 1, kind: input, shape index: {}]   ;;  %s1249_s2 = inlined_call_operand.vmem [shape: f32[1,128], index: 2, kind: input, shape index: {}]   ;;  %s1250_s3 = inlined_call_operand.vmem [shape: f32[512,128], index: 3, kind: output, shape index: {}]  }
   0x1 LB: > { %s753_s13 = sadd.s32 4294967295, %s1012_s12   ;;  %p757_p0 = scmp.ge.s32.totalorder %s1012_s12, 1  ;;  %s1012_s12 = sphi %s1034_s12, %s13_s12  }
   0x2   : > { %p139_p1 = scmp.lt.s32.totalorder %s1012_s12, 3 }
   0x4   : > { %p140_p2 = pnand %p757_p0, %p139_p1 }
   0x5   : > { %s758_s18 = sshll.u32 (!%p140_p2), %s753_s13, 5 }
   0x6   : > { %143 = sbr.rel (%p140_p2) target bundleno = 301 (0x12d), region = 32  ;;  %p165_p3 = scmp.lt.s32.totalorder (!%p140_p2), %s758_s18, 63 }
   0xb   : > { %v985_v0 = vld [vmem:[%s1248_s1 + $0x38] sm:$0xff]  ;;  %v228_v1 = vld [vmem:[%s1248_s1 + $0x48] sm:$0x7]  ;;  %vm483_vm0 = vcmask 1042432   ;;  %v984_v3 = vld [vmem:[%s1248_s1 + $0x30] sm:$0xff]  ;;  %s1252_s18 = smov (!%p165_p3, %s758_s18), 63 }
   0xc   : > { %v414_v2 = vunpack.c.l.b16 %v228_v1  ;;  %487 = vmatpush.bf16.msra.mxu0 %v985_v0  ;;  %987 = vmatpush.bf16.msra.mxu2 %v985_v0  ;;  %s945_s21 = sshll.u32 %s1252_s18, 3  ;;  %v986_v6 = vld [vmem:[%s1248_s1 + $0x40] sm:$0xff]  ;;  %v983_v7 = vld [vmem:[%s1248_s1 + $0x28] sm:$0xff]  ;;  %vm434_vm1 = vcmask 179200   ;;  %v981_v15 = vld [vmem:[%s1248_s1 + $0x18] sm:$0xff] }
   0xd   : > { %s1065_s28 = scalar_lea.vmem %s1247_s0, %s945_s21  ;;  %v982_v12 = vld [vmem:[%s1248_s1 + $0x20] sm:$0xff]  ;;  %v980_v16 = vld [vmem:[%s1248_s1 + $0x10] sm:$0xff]  ;;  %v979_v17 = vld [vmem:[%s1248_s1 + $0x8] sm:$0xff]  ;;  %s1173_s17 = scalar_lea.vmem %s1250_s3, %s945_s21 }
   0xe   : > { %v424_v4 = vpack.c.b16 %v414_v2, %v414_v2  ;;  %v946_v8 = vld [vmem:[%s1065_s28 + $0x4] sm:$0xf]  ;;  %v767_v9 = vld [vmem:[%s1065_s28 + $0x8] sm:$0xf0]  ;;  %v964_v11 = vld [vmem:[%s1065_s28 + $0x94] sm:$0xf] }
   0xf   : > { %v770_v10 = vor.u32 %v946_v8, %v767_v9  ;;  %v839_v13 = vld [vmem:[%s1065_s28 + $0x98] sm:$0xf0]  ;;  %v948_v18 = vld [vmem:[%s1065_s28 + $0x14] sm:$0xf]  ;;  %v966_v20 = vld [vmem:[%s1065_s28 + $0xa4] sm:$0xf] }
  0x10   : > { %v485_v5 = vsel %vm483_vm0, %v424_v4, 0  ;;  %488 = vmatpush.bf16.msra.mxu0 %v984_v3  ;;  %988 = vmatpush.bf16.msra.mxu2 %v984_v3  ;;  %v842_v14 = vor.u32 %v964_v11, %v839_v13  ;;  %v775_v19 = vld [vmem:[%s1065_s28 + $0x18] sm:$0xf0]  ;;  %v847_v21 = vld [vmem:[%s1065_s28 + $0xa8] sm:$0xf0]  ;;  %v978_v23 = vld [vmem:[%s1248_s1] sm:$0xff] }
  0x11   : > { %582 = vmatpush.bf16.msra.mxu1 %v485_v5  ;;  %995 = vmatpush.bf16.msra.mxu3 %v485_v5  ;;  %v778_v22 = vor.u32 %v948_v18, %v775_v19  ;;  %v765_v24 = vld [vmem:[%s1065_s28] sm:$0xf]  ;;  %v947_v25 = vld [vmem:[%s1065_s28 + $0x4] sm:$0xf0]  ;;  %v850_v26 = vor.u32 %v966_v20, %v847_v21  ;;  %v950_v31 = vld [vmem:[%s1065_s28 + $0x24] sm:$0xf] }
  0x12   : > { %v829_v27 = vld [vmem:[%s1065_s28 + $0x80] sm:$0xf]  ;;  %v963_v28 = vld [vmem:[%s1065_s28 + $0x84] sm:$0xf0]  ;;  %v766_v29 = vor.u32 %v947_v25, %v765_v24  ;;  %v783_v32 = vld [vmem:[%s1065_s28 + $0x28] sm:$0xf0] }
  0x13   : > { %v830_v30 = vor.u32 %v963_v28, %v829_v27  ;;  %v968_v33 = vld [vmem:[%s1065_s28 + $0xb4] sm:$0xf]  ;;  %v855_v34 = vld [vmem:[%s1065_s28 + $0xb8] sm:$0xf0]  ;;  %v786_v35 = vor.u32 %v950_v31, %v783_v32  ;;  %v773_v36 = vld [vmem:[%s1065_s28 + $0x10] sm:$0xf] }
  0x14   : > { %489 = vmatpush.bf16.msra.mxu0 %v983_v7  ;;  %989 = vmatpush.bf16.msra.mxu2 %v983_v7  ;;  %v949_v37 = vld [vmem:[%s1065_s28 + $0x14] sm:$0xf0]  ;;  %v858_v38 = vor.u32 %v968_v33, %v855_v34  ;;  %v837_v39 = vld [vmem:[%s1065_s28 + $0x90] sm:$0xf]  ;;  %v952_v43 = vld [vmem:[%s1065_s28 + $0x34] sm:$0xf] }
  0x15   : > { %583 = vmatpush.bf16.msra.mxu1 %v986_v6  ;;  %996 = vmatpush.bf16.msra.mxu3 %v986_v6  ;;  %v965_v40 = vld [vmem:[%s1065_s28 + $0x94] sm:$0xf0]  ;;  %v774_v41 = vor.u32 %v949_v37, %v773_v36  ;;  %v791_v44 = vld [vmem:[%s1065_s28 + $0x38] sm:$0xf0]  ;;  %v970_v45 = vld [vmem:[%s1065_s28 + $0xc4] sm:$0xf] }
  0x16   : > { %v838_v42 = vor.u32 %v965_v40, %v837_v39  ;;  %v863_v46 = vld [vmem:[%s1065_s28 + $0xc8] sm:$0xf0]  ;;  %v794_v47 = vor.u32 %v952_v43, %v791_v44  ;;  %v781_v48 = vld [vmem:[%s1065_s28 + $0x20] sm:$0xf]  ;;  %v951_v49 = vld [vmem:[%s1065_s28 + $0x24] sm:$0xf0] }
  0x17   : > { %v866_v50 = vor.u32 %v970_v45, %v863_v46  ;;  %v845_v51 = vld [vmem:[%s1065_s28 + $0xa0] sm:$0xf]  ;;  %v967_v52 = vld [vmem:[%s1065_s28 + $0xa4] sm:$0xf0]  ;;  %v782_v53 = vor.u32 %v951_v49, %v781_v48  ;;  %v954_v55 = vld [vmem:[%s1065_s28 + $0x44] sm:$0xf] }
  0x18   : > { %927 = vmatmul.msk.bf16.vlgmr.msra.gmra.mxu1 %vm434_vm1, %v770_v10  ;;  %490 = vmatpush.bf16.msra.mxu0 %v982_v12  ;;  %v846_v54 = vor.u32 %v967_v52, %v845_v51  ;;  %v799_v56 = vld [vmem:[%s1065_s28 + $0x48] sm:$0xf0]  ;;  %v972_v57 = vld [vmem:[%s1065_s28 + $0xd4] sm:$0xf]  ;;  %v871_v58 = vld [vmem:[%s1065_s28 + $0xd8] sm:$0xf0] }
  0x19   : > { %936 = vmatmul.msk.bf16.vlgmr.msra.gmra.mxu3 %vm434_vm1, %v842_v14  ;;  %990 = vmatpush.bf16.msra.mxu2 %v982_v12  ;;  %v802_v59 = vor.u32 %v954_v55, %v799_v56  ;;  %v789_v60 = vld [vmem:[%s1065_s28 + $0x30] sm:$0xf]  ;;  %v953_v61 = vld [vmem:[%s1065_s28 + $0x34] sm:$0xf0]  ;;  %v874_v62 = vor.u32 %v972_v57, %v871_v58  ;;  %v956_v3 = vld [vmem:[%s1065_s28 + $0x54] sm:$0xf] }
  0x1a   : > { %v853_v63 = vld [vmem:[%s1065_s28 + $0xb0] sm:$0xf]  ;;  %v969_v0 = vld [vmem:[%s1065_s28 + $0xb4] sm:$0xf0]  ;;  %v790_v1 = vor.u32 %v953_v61, %v789_v60  ;;  %v807_v4 = vld [vmem:[%s1065_s28 + $0x58] sm:$0xf0] }
  0x1b   : > { %v854_v2 = vor.u32 %v969_v0, %v853_v63  ;;  %v974_v5 = vld [vmem:[%s1065_s28 + $0xe4] sm:$0xf]  ;;  %v879_v6 = vld [vmem:[%s1065_s28 + $0xe8] sm:$0xf0]  ;;  %v810_v7 = vor.u32 %v956_v3, %v807_v4  ;;  %v797_v8 = vld [vmem:[%s1065_s28 + $0x40] sm:$0xf] }
  0x1c   : > { %491 = vmatpush.bf16.msra.mxu0 %v981_v15  ;;  %v955_v9 = vld [vmem:[%s1065_s28 + $0x44] sm:$0xf0]  ;;  %v882_v10 = vor.u32 %v974_v5, %v879_v6  ;;  %v861_v11 = vld [vmem:[%s1065_s28 + $0xc0] sm:$0xf]  ;;  %v976_v18 = vld [vmem:[%s1065_s28 + $0xf4] sm:$0xf] }
  0x1d   : > { %991 = vmatpush.bf16.msra.mxu2 %v981_v15  ;;  %v971_v12 = vld [vmem:[%s1065_s28 + $0xc4] sm:$0xf0]  ;;  %v798_v13 = vor.u32 %v955_v9, %v797_v8  ;;  %v958_v15 = vld [vmem:[%s1065_s28 + $0x64] sm:$0xf]  ;;  %v887_v19 = vld [vmem:[%s1065_s28 + $0xf8] sm:$0xf0] }
  0x1e   : > { %v862_v14 = vor.u32 %v971_v12, %v861_v11  ;;  %v805_v20 = vld [vmem:[%s1065_s28 + $0x50] sm:$0xf]  ;;  %v957_v21 = vld [vmem:[%s1065_s28 + $0x54] sm:$0xf0]  ;;  %v960_v27 = vld [vmem:[%s1065_s28 + $0x74] sm:$0xf] }
  0x1f   : > { %v973_v24 = vld [vmem:[%s1065_s28 + $0xd4] sm:$0xf0]  ;;  %v806_v25 = vor.u32 %v957_v21, %v805_v20  ;;  %v823_v28 = vld [vmem:[%s1065_s28 + $0x78] sm:$0xf0]  ;;  %v959_v31 = vld [vmem:[%s1065_s28 + $0x64] sm:$0xf0] }
  0x20   : > { %492 = vmatpush.bf16.msra.mxu0 %v980_v16  ;;  %v877_v32 = vld [vmem:[%s1065_s28 + $0xe0] sm:$0xf]  ;;  %v975_v33 = vld [vmem:[%s1065_s28 + $0xe4] sm:$0xf0]  ;;  %v962_v36 = vld [vmem:[%s1065_s28 + $0x84] sm:$0xf] }
  0x21   : > { %992 = vmatpush.bf16.msra.mxu2 %v980_v16  ;;  %v815_v16 = vld [vmem:[%s1065_s28 + $0x68] sm:$0xf0]  ;;  %v821_v40 = vld [vmem:[%s1065_s28 + $0x70] sm:$0xf]  ;;  %v977_v43 = vld [vmem:[%s1065_s28 + $0xf4] sm:$0xf0] }
  0x22   : > { %v831_v37 = vld [vmem:[%s1065_s28 + $0x88] sm:$0xf0]  ;;  %v1165_v48 = vld [vmem:[%s1249_s2] ss:$0 sm:$0xff] }
  0x24   : > { %493 = vmatpush.bf16.msra.mxu0 %v979_v17 }
  0x25   : > { %993 = vmatpush.bf16.msra.mxu2 %v979_v17  ;;  %v818_v17 = vor.u32 %v958_v15, %v815_v16 }
  0x28   : > { %928 = vmatmul.msk.bf16.gmra.mxu1 %vm434_vm1, %v778_v22  ;;  %494 = vmatpush.bf16.msra.mxu0 %v978_v23  ;;  %v890_v22 = vor.u32 %v976_v18, %v887_v19 }
  0x29   : > { %937 = vmatmul.msk.bf16.gmra.mxu3 %vm434_vm1, %v850_v26  ;;  %994 = vmatpush.bf16.msra.mxu2 %v978_v23  ;;  %v869_v23 = vld [vmem:[%s1065_s28 + $0xd0] sm:$0xf] }
  0x2a   : > { %v870_v26 = vor.u32 %v973_v24, %v869_v23 }
  0x2b   : > { %495 = vmatmul.bf16.vlgmr.msra.gmra.mxu0 %v766_v29  ;;  %v826_v29 = vor.u32 %v960_v27, %v823_v28 }
  0x2c   : > { %535 = vmatmul.bf16.vlgmr.msra.gmra.mxu2 %v830_v30  ;;  %v813_v30 = vld [vmem:[%s1065_s28 + $0x60] sm:$0xf] }
  0x2d   : > { %v814_v34 = vor.u32 %v959_v31, %v813_v30 }
  0x38   : > { %929 = vmatmul.msk.bf16.gmra.mxu1 %vm434_vm1, %v786_v35  ;;  %v878_v35 = vor.u32 %v975_v33, %v877_v32 }
  0x39   : > { %938 = vmatmul.msk.bf16.gmra.mxu3 %vm434_vm1, %v858_v38  ;;  %v834_v38 = vor.u32 %v962_v36, %v831_v37 }
  0x3b   : > { %500 = vmatmul.bf16.gmra.mxu0 %v774_v41  ;;  %v961_v41 = vld [vmem:[%s1065_s28 + $0x74] sm:$0xf0] }
  0x3c   : > { %540 = vmatmul.bf16.gmra.mxu2 %v838_v42  ;;  %v885_v42 = vld [vmem:[%s1065_s28 + $0xf0] sm:$0xf]  ;;  %v822_v44 = vor.u32 %v961_v41, %v821_v40 }
  0x3d   : > { %v886_v45 = vor.u32 %v977_v43, %v885_v42 }
  0x48   : > { %930 = vmatmul.msk.bf16.gmra.mxu1 %vm434_vm1, %v794_v47 }
  0x49   : > { %939 = vmatmul.msk.bf16.gmra.mxu3 %vm434_vm1, %v866_v50 }
  0x4b   : > { %505 = vmatmul.bf16.gmra.mxu0 %v782_v53 }
  0x4c   : > { %545 = vmatmul.bf16.gmra.mxu2 %v846_v54 }
  0x58   : > { %931 = vmatmul.msk.bf16.gmra.mxu1 %vm434_vm1, %v802_v59 }
  0x59   : > { %940 = vmatmul.msk.bf16.gmra.mxu3 %vm434_vm1, %v874_v62 }
  0x5b   : > { %510 = vmatmul.bf16.gmra.mxu0 %v790_v1 }
  0x5c   : > { %550 = vmatmul.bf16.gmra.mxu2 %v854_v2 }
  0x68   : > { %932 = vmatmul.msk.bf16.gmra.mxu1 %vm434_vm1, %v810_v7 }
  0x69   : > { %941 = vmatmul.msk.bf16.gmra.mxu3 %vm434_vm1, %v882_v10 }
  0x6b   : > { %515 = vmatmul.bf16.gmra.mxu0 %v798_v13 }
  0x6c   : > { %555 = vmatmul.bf16.gmra.mxu2 %v862_v14 }
  0x78   : > { %933 = vmatmul.msk.bf16.gmra.mxu1 %vm434_vm1, %v818_v17 }
  0x79   : > { %942 = vmatmul.msk.bf16.gmra.mxu3 %vm434_vm1, %v890_v22 }
  0x7b   : > { %520 = vmatmul.bf16.gmra.mxu0 %v806_v25 }
  0x7c   : > { %560 = vmatmul.bf16.gmra.mxu2 %v870_v26 }
  0x88   : > { %934 = vmatmul.msk.bf16.gmra.mxu1 %vm434_vm1, %v826_v29 }
  0x8b   : > { %525 = vmatmul.bf16.gmra.mxu0 %v814_v34 }
  0x8c   : > { %565 = vmatmul.bf16.gmra.mxu2 %v878_v35 }
  0x95   : > { %v585_v39 = vpop.f32.mrf.mxu1 }
  0x98   : > { %935 = vmatmul.msk.bf16.gmra.mxu1 %vm434_vm1, %v834_v38 }
  0x9b   : > { %530 = vmatmul.bf16.gmra.mxu0 %v822_v44 }
  0x9c   : > { %570 = vmatmul.bf16.gmra.mxu2 %v886_v45  ;;  %v630_v49 = vpop.f32.mrf.mxu3 }
  0x9d   : > { %v587_v46 = vpop.f32.mrf.mxu1 }
  0xa4   : > { %v632_v57 = vpop.f32.mrf.mxu3 }
  0xa5   : > { %v590_v47 = vpop.f32.mrf.mxu1 }
  0xa8   : > { %v496_v50 = vpop.f32.mrf.mxu0 }
  0xa9   : > { %v497_v51 = vadd.f32 %v1165_v48, %v496_v50 }
  0xab   : > { %v586_v52 = vadd.f32 %v585_v39, %v497_v51 }
  0xac   : > { %v635_v0 = vpop.f32.mrf.mxu3 }
  0xad   : > { %v592_v53 = vpop.f32.mrf.mxu1  ;;  %665 = vst [vmem:[%s1173_s17] sm:$0xff] %v586_v52 }
  0xaf   : > { %v1176_v54 = vpop.f32.mrf.mxu2 }
  0xb0   : > { %v498_v55 = vpop.f32.mrf.mxu0 }
  0xb1   : > { %v499_v56 = vadd.f32 %v1165_v48, %v498_v55 }
  0xb3   : > { %v588_v58 = vadd.f32 %v587_v46, %v499_v56 }
  0xb4   : > { %v637_v9 = vpop.f32.mrf.mxu3 }
  0xb5   : > { %v595_v59 = vpop.f32.mrf.mxu1  ;;  %666 = vst [vmem:[%s1173_s17 + $0x8] sm:$0xff] %v588_v58 }
  0xb7   : > { %v1180_v60 = vpop.f32.mrf.mxu2 }
  0xb8   : > { %v501_v61 = vpop.f32.mrf.mxu0 }
  0xb9   : > { %v502_v62 = vadd.f32 %v1165_v48, %v501_v61 }
  0xbb   : > { %v591_v63 = vadd.f32 %v590_v47, %v502_v62 }
  0xbc   : > { %v640_v18 = vpop.f32.mrf.mxu3 }
  0xbd   : > { %v597_v1 = vpop.f32.mrf.mxu1  ;;  %667 = vst [vmem:[%s1173_s17 + $0x10] sm:$0xff] %v591_v63 }
  0xbf   : > { %v541_v2 = vpop.f32.mrf.mxu2 }
  0xc0   : > { %v542_v3 = vadd.f32 %v1165_v48, %v541_v2  ;;  %v503_v4 = vpop.f32.mrf.mxu0 }
  0xc1   : > { %v504_v5 = vadd.f32 %v1165_v48, %v503_v4 }
  0xc2   : > { %v631_v6 = vadd.f32 %v630_v49, %v542_v3 }
  0xc3   : > { %v593_v7 = vadd.f32 %v592_v53, %v504_v5 }
  0xc4   : > { %683 = vst [vmem:[%s1173_s17 + $0x90] sm:$0xff] %v631_v6  ;;  %v642_v29 = vpop.f32.mrf.mxu3 }
  0xc5   : > { %v600_v8 = vpop.f32.mrf.mxu1  ;;  %668 = vst [vmem:[%s1173_s17 + $0x18] sm:$0xff] %v593_v7 }
  0xc7   : > { %v543_v10 = vpop.f32.mrf.mxu2 }
  0xc8   : > { %v544_v11 = vadd.f32 %v1165_v48, %v543_v10  ;;  %v506_v12 = vpop.f32.mrf.mxu0 }
  0xc9   : > { %v507_v13 = vadd.f32 %v1165_v48, %v506_v12 }
  0xca   : > { %v633_v14 = vadd.f32 %v632_v57, %v544_v11 }
  0xcb   : > { %v596_v15 = vadd.f32 %v595_v59, %v507_v13 }
  0xcc   : > { %684 = vst [vmem:[%s1173_s17 + $0x98] sm:$0xff] %v633_v14  ;;  %v645_v39 = vpop.f32.mrf.mxu3 }
  0xcd   : > { %v602_v16 = vpop.f32.mrf.mxu1  ;;  %669 = vst [vmem:[%s1173_s17 + $0x20] sm:$0xff] %v596_v15 }
  0xcf   : > { %v546_v17 = vpop.f32.mrf.mxu2 }
  0xd0   : > { %v547_v19 = vadd.f32 %v1165_v48, %v546_v17  ;;  %v508_v20 = vpop.f32.mrf.mxu0 }
  0xd1   : > { %v509_v21 = vadd.f32 %v1165_v48, %v508_v20 }
  0xd2   : > { %v636_v22 = vadd.f32 %v635_v0, %v547_v19 }
  0xd3   : > { %v598_v23 = vadd.f32 %v597_v1, %v509_v21 }
  0xd4   : > { %685 = vst [vmem:[%s1173_s17 + $0xa0] sm:$0xff] %v636_v22  ;;  %v647_v49 = vpop.f32.mrf.mxu3 }
  0xd5   : > { %v605_v24 = vpop.f32.mrf.mxu1  ;;  %670 = vst [vmem:[%s1173_s17 + $0x28] sm:$0xff] %v598_v23 }
  0xd7   : > { %v548_v25 = vpop.f32.mrf.mxu2 }
  0xd8   : > { %v549_v26 = vadd.f32 %v1165_v48, %v548_v25  ;;  %v511_v27 = vpop.f32.mrf.mxu0 }
  0xd9   : > { %v512_v28 = vadd.f32 %v1165_v48, %v511_v27 }
  0xda   : > { %v638_v30 = vadd.f32 %v637_v9, %v549_v26 }
  0xdb   : > { %v601_v31 = vadd.f32 %v600_v8, %v512_v28 }
  0xdc   : > { %686 = vst [vmem:[%s1173_s17 + $0xa8] sm:$0xff] %v638_v30  ;;  %v650_v59 = vpop.f32.mrf.mxu3 }
  0xdd   : > { %v607_v32 = vpop.f32.mrf.mxu1  ;;  %671 = vst [vmem:[%s1173_s17 + $0x30] sm:$0xff] %v601_v31 }
  0xdf   : > { %v551_v33 = vpop.f32.mrf.mxu2 }
  0xe0   : > { %v552_v34 = vadd.f32 %v1165_v48, %v551_v33  ;;  %v513_v35 = vpop.f32.mrf.mxu0 }
  0xe1   : > { %v514_v36 = vadd.f32 %v1165_v48, %v513_v35 }
  0xe2   : > { %v641_v37 = vadd.f32 %v640_v18, %v552_v34 }
  0xe3   : > { %v603_v38 = vadd.f32 %v602_v16, %v514_v36 }
  0xe4   : > { %687 = vst [vmem:[%s1173_s17 + $0xb0] sm:$0xff] %v641_v37  ;;  %v652_v7 = vpop.f32.mrf.mxu3 }
  0xe5   : > { %v610_v40 = vpop.f32.mrf.mxu1  ;;  %672 = vst [vmem:[%s1173_s17 + $0x38] sm:$0xff] %v603_v38 }
  0xe7   : > { %v553_v41 = vpop.f32.mrf.mxu2 }
  0xe8   : > { %v554_v42 = vadd.f32 %v1165_v48, %v553_v41  ;;  %v516_v43 = vpop.f32.mrf.mxu0 }
  0xe9   : > { %v517_v44 = vadd.f32 %v1165_v48, %v516_v43 }
  0xea   : > { %v643_v45 = vadd.f32 %v642_v29, %v554_v42 }
  0xeb   : > { %v606_v46 = vadd.f32 %v605_v24, %v517_v44  ;;  %v537_v24 = vadd.f32 %v1165_v48, %v1176_v54  ;;  %v539_v54 = vadd.f32 %v1165_v48, %v1180_v60 }
  0xec   : > { %688 = vst [vmem:[%s1173_s17 + $0xb8] sm:$0xff] %v643_v45  ;;  %v655_v17 = vpop.f32.mrf.mxu3 }
  0xed   : > { %v612_v47 = vpop.f32.mrf.mxu1  ;;  %673 = vst [vmem:[%s1173_s17 + $0x40] sm:$0xff] %v606_v46 }
  0xef   : > { %v556_v50 = vpop.f32.mrf.mxu2 }
  0xf0   : > { %v557_v51 = vadd.f32 %v1165_v48, %v556_v50  ;;  %v518_v52 = vpop.f32.mrf.mxu0 }
  0xf1   : > { %v519_v53 = vadd.f32 %v1165_v48, %v518_v52 }
  0xf2   : > { %v646_v55 = vadd.f32 %v645_v39, %v557_v51 }
  0xf3   : > { %v608_v56 = vadd.f32 %v607_v32, %v519_v53 }
  0xf4   : > { %689 = vst [vmem:[%s1173_s17 + $0xc0] sm:$0xff] %v646_v55  ;;  %v657_v27 = vpop.f32.mrf.mxu3 }
  0xf5   : > { %v615_v57 = vpop.f32.mrf.mxu1  ;;  %674 = vst [vmem:[%s1173_s17 + $0x48] sm:$0xff] %v608_v56 }
  0xf7   : > { %v558_v58 = vpop.f32.mrf.mxu2 }
  0xf8   : > { %v559_v61 = vadd.f32 %v1165_v48, %v558_v58  ;;  %v521_v62 = vpop.f32.mrf.mxu0 }
  0xf9   : > { %v522_v63 = vadd.f32 %v1165_v48, %v521_v62 }
  0xfa   : > { %v648_v0 = vadd.f32 %v647_v49, %v559_v61 }
  0xfb   : > { %v611_v1 = vadd.f32 %v610_v40, %v522_v63 }
  0xfc   : > { %690 = vst [vmem:[%s1173_s17 + $0xc8] sm:$0xff] %v648_v0  ;;  %v660_v37 = vpop.f32.mrf.mxu3 }
  0xfd   : > { %v617_v2 = vpop.f32.mrf.mxu1  ;;  %675 = vst [vmem:[%s1173_s17 + $0x50] sm:$0xff] %v611_v1 }
  0xff   : > { %v561_v3 = vpop.f32.mrf.mxu2 }
 0x100   : > { %v562_v4 = vadd.f32 %v1165_v48, %v561_v3  ;;  %v523_v5 = vpop.f32.mrf.mxu0 }
 0x101   : > { %v524_v6 = vadd.f32 %v1165_v48, %v523_v5 }
 0x102   : > { %v651_v8 = vadd.f32 %v650_v59, %v562_v4 }
 0x103   : > { %v613_v9 = vadd.f32 %v612_v47, %v524_v6 }
 0x104   : > { %691 = vst [vmem:[%s1173_s17 + $0xd0] sm:$0xff] %v651_v8  ;;  %v662_v45 = vpop.f32.mrf.mxu3 }
 0x105   : > { %v620_v10 = vpop.f32.mrf.mxu1  ;;  %676 = vst [vmem:[%s1173_s17 + $0x58] sm:$0xff] %v613_v9 }
 0x107   : > { %v563_v11 = vpop.f32.mrf.mxu2 }
 0x108   : > { %v564_v12 = vadd.f32 %v1165_v48, %v563_v11  ;;  %v526_v13 = vpop.f32.mrf.mxu0 }
 0x109   : > { %v527_v14 = vadd.f32 %v1165_v48, %v526_v13 }
 0x10a   : > { %v653_v15 = vadd.f32 %v652_v7, %v564_v12 }
 0x10b   : > { %v616_v16 = vadd.f32 %v615_v57, %v527_v14 }
 0x10c   : > { %692 = vst [vmem:[%s1173_s17 + $0xd8] sm:$0xff] %v653_v15 }
 0x10d   : > { %v622_v18 = vpop.f32.mrf.mxu1  ;;  %677 = vst [vmem:[%s1173_s17 + $0x60] sm:$0xff] %v616_v16 }
 0x10f   : > { %v566_v19 = vpop.f32.mrf.mxu2 }
 0x110   : > { %v567_v20 = vadd.f32 %v1165_v48, %v566_v19  ;;  %v528_v21 = vpop.f32.mrf.mxu0 }
 0x111   : > { %v529_v22 = vadd.f32 %v1165_v48, %v528_v21 }
 0x112   : > { %v656_v23 = vadd.f32 %v655_v17, %v567_v20 }
 0x113   : > { %v618_v25 = vadd.f32 %v617_v2, %v529_v22 }
 0x114   : > { %693 = vst [vmem:[%s1173_s17 + $0xe0] sm:$0xff] %v656_v23 }
 0x115   : > { %v625_v26 = vpop.f32.mrf.mxu1  ;;  %678 = vst [vmem:[%s1173_s17 + $0x68] sm:$0xff] %v618_v25 }
 0x116   : > { %v626_v28 = vadd.f32 %v625_v26, %v537_v24 }
 0x117   : > { %v568_v29 = vpop.f32.mrf.mxu2 }
 0x118   : > { %681 = vst [vmem:[%s1173_s17 + $0x80] sm:$0xff] %v626_v28  ;;  %v569_v30 = vadd.f32 %v1165_v48, %v568_v29  ;;  %v531_v31 = vpop.f32.mrf.mxu0 }
 0x119   : > { %v532_v32 = vadd.f32 %v1165_v48, %v531_v31 }
 0x11a   : > { %v658_v33 = vadd.f32 %v657_v27, %v569_v30 }
 0x11b   : > { %v621_v34 = vadd.f32 %v620_v10, %v532_v32 }
 0x11c   : > { %694 = vst [vmem:[%s1173_s17 + $0xe8] sm:$0xff] %v658_v33 }
 0x11d   : > { %v627_v35 = vpop.f32.mrf.mxu1  ;;  %679 = vst [vmem:[%s1173_s17 + $0x70] sm:$0xff] %v621_v34 }
 0x11e   : > { %v628_v36 = vadd.f32 %v627_v35, %v539_v54 }
 0x11f   : > { %v571_v38 = vpop.f32.mrf.mxu2 }
 0x120   : > { %682 = vst [vmem:[%s1173_s17 + $0x88] sm:$0xff] %v628_v36  ;;  %v572_v39 = vadd.f32 %v1165_v48, %v571_v38  ;;  %v533_v40 = vpop.f32.mrf.mxu0 }
 0x121   : > { %v534_v41 = vadd.f32 %v1165_v48, %v533_v40 }
 0x122   : > { %v661_v42 = vadd.f32 %v660_v37, %v572_v39 }
 0x123   : > { %v623_v43 = vadd.f32 %v622_v18, %v534_v41 }
 0x124   : > { %695 = vst [vmem:[%s1173_s17 + $0xf0] sm:$0xff] %v661_v42 }
 0x125   : > { %680 = vst [vmem:[%s1173_s17 + $0x78] sm:$0xff] %v623_v43 }
 0x127   : > { %v573_v44 = vpop.f32.mrf.mxu2 }
 0x128   : > { %v574_v60 = vadd.f32 %v1165_v48, %v573_v44 }
 0x12a   : > { %v663_v46 = vadd.f32 %v662_v45, %v574_v60 }
 0x12c   : > { %696 = vst [vmem:[%s1173_s17 + $0xf8] sm:$0xff] %v663_v46 }
 0x12d PF: > { %s13_s12 = sadd.s32 1, %s1012_s12  }
 0x12e   : > { %p10_p4 = scmp.ge.s32.totalorder %s13_s12, 4  }
 0x130   :  { %12 = sbr.rel (!%p10_p4) target bundleno = 1 (0x1), region = 62 }

// kernel: deform_conv3d_forward.3
= control target key start
LH: loop header
LB: loop body
LE: loop exit
PB: predicated region body
PF: predicated region fallthrough
CT: control target
= control target key end

     0   :  { %s2903_s21 = smov 0   ;;  %s3666_s0 = inlined_call_operand.vmem [shape: f32[512,9], index: 0, kind: input, shape index: {}]   ;;  %s3667_s1 = inlined_call_operand.vmem [shape: bf16[512,36], index: 1, kind: input, shape index: {}]   ;;  %s3668_s2 = inlined_call_operand.vmem [shape: bf16[512,36], index: 2, kind: input, shape index: {}]   ;;  %s3669_s3 = inlined_call_operand.vmem [shape: bf16[512,36], index: 3, kind: input, shape index: {}]   ;;  %s3670_s4 = inlined_call_operand.vmem [shape: bf16[512,36], index: 4, kind: input, shape index: {}]   ;;  %s3671_s5 = inlined_call_operand.vmem [shape: f32[36,128], index: 5, kind: input, shape index: {}]   ;;  %s3672_s6 = inlined_call_operand.vmem [shape: f32[512,128], index: 6, kind: output, shape index: {}]  }
   0x1 LB: > { %s2277_s22 = sadd.s32 4294967295, %s2864_s21   ;;  %p2281_p0 = scmp.ge.s32.totalorder %s2864_s21, 1  ;;  %s2864_s21 = sphi %s2903_s21, %s16_s21  }
   0x2   : > { %p257_p1 = scmp.lt.s32.totalorder %s2864_s21, 3 }
   0x4   : > { %p258_p2 = pnand %p2281_p0, %p257_p1 }
   0x5   : > { %s2282_s23 = sshll.u32 (!%p258_p2), %s2277_s22, 5 }
   0x6   : > { %261 = sbr.rel (%p258_p2) target bundleno = 581 (0x245), region = 44  ;;  %p308_p3 = scmp.lt.s32.totalorder (!%p258_p2), %s2282_s23, 63 }
   0xb   : > { %v343_v0 = vlaneseq  ;;  %s3678_s23 = smov (!%p308_p3, %s2282_s23), 63  ;;  %vm621_vm4 = vcmask 1040384   ;;  %v2866_v17 = vmov 0.0   ;;  %vm524_vm7 = vcmask 72704  }
   0xc   : > { %s2283_s24 = sshll.u32 %s3678_s23, 3  ;;  %v2867_v23 = vmov 1.0   ;;  %vm2024_vm8 = vcmask 1043456   ;;  %s2285_s14 = sshll.u32 %s3678_s23, 2  ;;  %vm1927_vm9 = vcmask 293888  }
   0xd   : > { %v344_v1 = vshrl.u32 %v343_v0, 7  ;;  %v347_v3 = vand.u32 127, %v343_v0  ;;  %s2919_s27 = scalar_lea.vmem %s3666_s0, %s2283_s24  ;;  %s2996_s17 = scalar_lea.vmem %s3667_s1, %s2285_s14 }
   0xe   : > { %v364_v9 = vld [vmem:[%s2919_s27] sm:$0xff]  ;;  %v365_v10 = vld [vmem:[%s2919_s27 + $0x8] sm:$0xff]  ;;  %v366_v21 = vld [vmem:[%s2919_s27 + $0x10] sm:$0xff]  ;;  %s3001_s20 = scalar_lea.vmem %s3668_s2, %s2285_s14  ;;  %s3006_s26 = scalar_lea.vmem %s3669_s3, %s2285_s14 }
   0xf   : > { %v345_v2 = vadd.s32 8, %v344_v1  ;;  %v352_v4 = vadd.s32 1, %v344_v1  ;;  %v348_v5 = vmul.u32 4, %v344_v1  ;;  %v396_v12 = vadd.f32 1.5, %v364_v9  ;;  %v367_v28 = vld [vmem:[%s2919_s27 + $0x18] sm:$0xff]  ;;  %v368_v33 = vld [vmem:[%s2919_s27 + $0x20] sm:$0xff]  ;;  %s3011_s30 = scalar_lea.vmem %s3670_s4, %s2285_s14  ;;  %s3293_s8 = scalar_lea.vmem %s3672_s6, %s2283_s24 }
  0x10   : > { %v397_v15 = vadd.f32 1.5, %v365_v10  ;;  %v398_v25 = vadd.f32 1.5, %v366_v21  ;;  %v399_v30 = vadd.f32 1.5, %v367_v28  ;;  %v400_v35 = vadd.f32 1.5, %v368_v33  ;;  %v369_v38 = vld [vmem:[%s2919_s27 + $0x28] sm:$0xff]  ;;  %v370_v43 = vld [vmem:[%s2919_s27 + $0x30] sm:$0xff] }
  0x11   : > { %v349_v6 = vmul.u32 4, %v345_v2  ;;  %v353_v7 = vadd.s32 1, %v345_v2  ;;  %v354_v8 = vmul.u32 4, %v352_v4  ;;  %vm2923_vm1 = vcmp.ge.s32.totalorder %v347_v3, %v348_v5  ;;  %v371_v48 = vld [vmem:[%s2919_s27 + $0x38] sm:$0xff]  ;;  %v372_v53 = vld [vmem:[%s2919_s27 + $0x40] sm:$0xff]  ;;  %v373_v58 = vld [vmem:[%s2919_s27 + $0x48] sm:$0xff] }
  0x12   : > { %v428_v16 = vmax.f32 %v396_v12, 0.0  ;;  %v429_v20 = vmax.f32 %v397_v15, 0.0  ;;  %v430_v27 = vmax.f32 %v398_v25, 0.0  ;;  %v431_v32 = vmax.f32 %v399_v30, 0.0  ;;  %v374_v63 = vld [vmem:[%s2919_s27 + $0x50] sm:$0xff]  ;;  %v375_v4 = vld [vmem:[%s2919_s27 + $0x58] sm:$0xff] }
  0x13   : > { %vm351_vm0 = vcmp.ge.s32.totalorder %v347_v3, %v349_v6  ;;  %v355_v11 = vmul.u32 4, %v353_v7  ;;  %vm2927_vm2 = vcmp.lt.s32.totalorder %v347_v3, %v354_v8  ;;  %v432_v37 = vmax.f32 %v400_v35, 0.0  ;;  %v376_v9 = vld [vmem:[%s2919_s27 + $0x60] sm:$0xff]  ;;  %v381_v10 = vld [vmem:[%s2919_s27 + $0x88] sm:$0xff]  ;;  %v378_v28 = vld [vmem:[%s2919_s27 + $0x70] sm:$0xff] }
  0x14   : > { %vm358_vm6 = vmand %vm2923_vm1, %vm2927_vm2  ;;  %v460_v19 = vmin.f32 %v428_v16, 3.0  ;;  %v461_v24 = vmin.f32 %v429_v20, 3.0  ;;  %v462_v29 = vmin.f32 %v430_v27, 3.0  ;;  %v463_v34 = vmin.f32 %v431_v32, 3.0  ;;  %v382_v20 = vld [vmem:[%s2919_s27 + $0x90] sm:$0xff]  ;;  %v383_v30 = vld [vmem:[%s2919_s27 + $0x98] sm:$0xff] }
  0x15   : > { %vm357_vm3 = vcmp.lt.s32.totalorder %v347_v3, %v355_v11  ;;  %v464_v39 = vmin.f32 %v432_v37, 3.0  ;;  %v401_v40 = vadd.f32 1.5, %v369_v38  ;;  %v402_v45 = vadd.f32 1.5, %v370_v43  ;;  %v379_v38 = vld [vmem:[%s2919_s27 + $0x78] sm:$0xff] }
  0x16   : > { %vm359_vm5 = vmand %vm351_vm0, %vm357_vm3  ;;  %v492_v22 = vmul.f32 0.33333334, %v460_v19  ;;  %v493_v26 = vmul.f32 0.33333334, %v461_v24  ;;  %v494_v31 = vmul.f32 0.33333334, %v462_v29 }
  0x17   : > { %v2295_v18 = vsel %vm359_vm5, 1.0, %v2866_v17  ;;  %v495_v36 = vmul.f32 0.33333334, %v463_v34  ;;  %v496_v41 = vmul.f32 0.33333334, %v464_v39  ;;  %v433_v42 = vmax.f32 %v401_v40, 0.0 }
  0x18   : > { %2296 = vmatpush.msk.msra.mxu0 %vm621_vm4, %v2295_v18  ;;  %2777 = vmatpush.msk.msra.mxu3 %vm621_vm4, %v2295_v18  ;;  %v434_v47 = vmax.f32 %v402_v45, 0.0  ;;  %v403_v50 = vadd.f32 1.5, %v371_v48  ;;  %v404_v55 = vadd.f32 1.5, %v372_v53  ;;  %v405_v60 = vadd.f32 1.5, %v373_v58  ;;  %v377_v18 = vld [vmem:[%s2919_s27 + $0x68] sm:$0xff]  ;;  %v384_v40 = vld [vmem:[%s2919_s27 + $0xa0] sm:$0xff] }
  0x19   : > { %v465_v44 = vmin.f32 %v433_v42, 3.0  ;;  %v406_v1 = vadd.f32 1.5, %v374_v63  ;;  %v407_v6 = vadd.f32 1.5, %v375_v4  ;;  %v413_v11 = vadd.f32 1.5, %v381_v10  ;;  %v380_v48 = vld [vmem:[%s2919_s27 + $0x80] sm:$0xff] }
  0x1a   : > { %2297 = vmatpush.msk.msra.mxu0 %vm358_vm6, %v2867_v23  ;;  %2778 = vmatpush.msk.msra.mxu3 %vm358_vm6, %v2867_v23  ;;  %v466_v49 = vmin.f32 %v434_v47, 3.0  ;;  %v435_v52 = vmax.f32 %v403_v50, 0.0  ;;  %v436_v57 = vmax.f32 %v404_v55, 0.0  ;;  %v437_v62 = vmax.f32 %v405_v60, 0.0  ;;  %v1923_v60 = vld [vmem:[%s3671_s5 + $0x8] sm:$0xff] }
  0x1b   : > { %2298 = vmatmul.msk.f32.vlgmr.msra.gmra.mxu0 %vm524_vm7, %v492_v22  ;;  %v497_v46 = vmul.f32 0.33333334, %v465_v44  ;;  %v438_v3 = vmax.f32 %v406_v1, 0.0  ;;  %v439_v8 = vmax.f32 %v407_v6, 0.0  ;;  %v408_v13 = vadd.f32 1.5, %v376_v9  ;;  %v386_v1 = vld [vmem:[%s2919_s27 + $0xb0] sm:$0xff] }
  0x1c   : > { %v498_v51 = vmul.f32 0.33333334, %v466_v49  ;;  %v467_v54 = vmin.f32 %v435_v52, 3.0  ;;  %v468_v59 = vmin.f32 %v436_v57, 3.0  ;;  %v469_v0 = vmin.f32 %v437_v62, 3.0  ;;  %v1922_v62 = vld [vmem:[%s3671_s5] sm:$0xff] }
  0x1d   : > { %v470_v5 = vmin.f32 %v438_v3, 3.0  ;;  %v471_v12 = vmin.f32 %v439_v8, 3.0  ;;  %v445_v14 = vmax.f32 %v413_v11, 0.0  ;;  %v440_v17 = vmax.f32 %v408_v13, 0.0  ;;  %v1926_v49 = vld [vmem:[%s3671_s5 + $0x20] sm:$0xf] }
  0x1e   : > { %v499_v56 = vmul.f32 0.33333334, %v467_v54  ;;  %v500_v61 = vmul.f32 0.33333334, %v468_v59  ;;  %v501_v2 = vmul.f32 0.33333334, %v469_v0  ;;  %2426 = vmatpush.msk.msra.mxu1 %vm2024_vm8, %v1926_v49  ;;  %2779 = vmatpush.msk.msra.mxu2 %vm2024_vm8, %v1926_v49 }
  0x1f   : > { %v502_v7 = vmul.f32 0.33333334, %v470_v5  ;;  %v477_v15 = vmin.f32 %v445_v14, 3.0  ;;  %v503_v16 = vmul.f32 0.33333334, %v471_v12  ;;  %v414_v21 = vadd.f32 1.5, %v382_v20 }
  0x20   : > { %v472_v22 = vmin.f32 %v440_v17, 3.0  ;;  %v409_v23 = vadd.f32 1.5, %v377_v18  ;;  %v410_v32 = vadd.f32 1.5, %v378_v28  ;;  %v415_v33 = vadd.f32 1.5, %v383_v30  ;;  %v1925_v54 = vld [vmem:[%s3671_s5 + $0x18] sm:$0xff]  ;;  %v3014_v13 = vld [vmem:[%s2996_s17] sm:$0xff]  }
  0x21   : > { %v509_v19 = vmul.f32 0.33333334, %v477_v15  ;;  %v446_v24 = vmax.f32 %v414_v21, 0.0  ;;  %v411_v42 = vadd.f32 1.5, %v379_v38  ;;  %v416_v43 = vadd.f32 1.5, %v384_v40  ;;  %2040 = vmatpush.msra.mxu1 %v1925_v54  ;;  %2780 = vmatpush.msra.mxu2 %v1925_v54  ;;  %v3018_v15 = vld [vmem:[%s3001_s20] sm:$0xff]  }
  0x22   : > { %v441_v27 = vmax.f32 %v409_v23, 0.0  ;;  %v447_v34 = vmax.f32 %v415_v33, 0.0  ;;  %v412_v53 = vadd.f32 1.5, %v380_v48  ;;  %v418_v3 = vadd.f32 1.5, %v386_v1  ;;  %v3024_v17 = vld [vmem:[%s3011_s30] sm:$0xff]   ;;  %v3039_v48 = vld [vmem:[%s3001_s20 + $0x8] sm:$0xff]  }
  0x23   : > { %2299 = vmatmul.msk.f32.gmra.mxu0 %vm524_vm7, %v493_v26  ;;  %2315 = vmatmul.msk.f32.vlgmr.msra.gmra.mxu3 %vm524_vm7, %v509_v19  ;;  %v478_v25 = vmin.f32 %v446_v24, 3.0  ;;  %v504_v26 = vmul.f32 0.33333334, %v472_v22  ;;  %v448_v44 = vmax.f32 %v416_v43, 0.0  ;;  %v2464_v28 = vunpack.c.h.bf16 %v3014_v13 }
  0x24   : > { %v479_v37 = vmin.f32 %v447_v34, 3.0  ;;  %v444_v59 = vmax.f32 %v412_v53, 0.0  ;;  %v450_v9 = vmax.f32 %v418_v3, 0.0  ;;  %v2655_v30 = vunpack.c.l.bf16 %v3024_v17 }
  0x25   : > { %v510_v29 = vmul.f32 0.33333334, %v478_v25  ;;  %v480_v47 = vmin.f32 %v448_v44, 3.0  ;;  %v2463_v25 = vunpack.c.l.bf16 %v3014_v13  ;;  %v2528_v34 = vunpack.c.h.bf16 %v3018_v15 }
  0x26   : > { %v511_v39 = vmul.f32 0.33333334, %v479_v37  ;;  %v476_v0 = vmin.f32 %v444_v59, 3.0  ;;  %v482_v18 = vmin.f32 %v450_v9, 3.0 }
  0x27   : > { %v512_v50 = vmul.f32 0.33333334, %v480_v47  ;;  %v3036_v47 = vld [vmem:[%s2996_s17 + $0x8] sm:$0xff]  }
  0x28   : > { %v514_v22 = vmul.f32 0.33333334, %v482_v18  ;;  %v2467_v59 = vunpack.c.l.bf16 %v3036_v47 }
  0x2b   : > { %2300 = vmatmul.msk.f32.gmra.mxu0 %vm524_vm7, %v494_v31  ;;  %2316 = vmatmul.msk.f32.gmra.mxu3 %vm524_vm7, %v510_v29  ;;  %v473_v31 = vmin.f32 %v441_v27, 3.0 }
  0x2d   : > { %v505_v35 = vmul.f32 0.33333334, %v473_v31 }
  0x33   : > { %2301 = vmatmul.msk.f32.gmra.mxu0 %vm524_vm7, %v495_v36  ;;  %v442_v36 = vmax.f32 %v410_v32, 0.0  ;;  %2317 = vmatmul.msk.f32.gmra.mxu3 %vm524_vm7, %v511_v39 }
  0x3b   : > { %2302 = vmatmul.msk.f32.gmra.mxu0 %vm524_vm7, %v496_v41  ;;  %v474_v41 = vmin.f32 %v442_v36, 3.0  ;;  %2318 = vmatmul.msk.f32.gmra.mxu3 %vm524_vm7, %v512_v50 }
  0x3d   : > { %v506_v45 = vmul.f32 0.33333334, %v474_v41 }
  0x43   : > { %2303 = vmatmul.msk.f32.gmra.mxu0 %vm524_vm7, %v497_v46  ;;  %v443_v46 = vmax.f32 %v411_v42, 0.0 }
  0x45   : > { %v475_v52 = vmin.f32 %v443_v46, 3.0 }
  0x47   : > { %v507_v58 = vmul.f32 0.33333334, %v475_v52 }
  0x4b   : > { %2304 = vmatmul.msk.f32.gmra.mxu0 %vm524_vm7, %v498_v51  ;;  %v385_v51 = vld [vmem:[%s2919_s27 + $0xa8] sm:$0xff] }
  0x4c   : > { %v417_v55 = vadd.f32 1.5, %v385_v51 }
  0x4e   : > { %v449_v57 = vmax.f32 %v417_v55, 0.0 }
  0x53   : > { %2305 = vmatmul.msk.f32.gmra.mxu0 %vm524_vm7, %v499_v56  ;;  %v1924_v56 = vld [vmem:[%s3671_s5 + $0x10] sm:$0xff] }
  0x54   : > { %2041 = vmatpush.msra.mxu1 %v1924_v56  ;;  %2781 = vmatpush.msra.mxu2 %v1924_v56 }
  0x56   : > { %2042 = vmatpush.msra.mxu1 %v1923_v60  ;;  %2782 = vmatpush.msra.mxu2 %v1923_v60  ;;  %v2531_v60 = vunpack.c.l.bf16 %v3039_v48 }
  0x58   : > { %2043 = vmatpush.msra.mxu1 %v1922_v62  ;;  %2783 = vmatpush.msra.mxu2 %v1922_v62  ;;  %v388_v62 = vld [vmem:[%s2919_s27 + $0xc0] sm:$0xff] }
  0x5b   : > { %2306 = vmatmul.msk.f32.gmra.mxu0 %vm524_vm7, %v500_v61  ;;  %v481_v61 = vmin.f32 %v449_v57, 3.0 }
  0x5d   : > { %v513_v63 = vmul.f32 0.33333334, %v481_v61  ;;  %v2656_v61 = vunpack.c.h.bf16 %v3024_v17 }
  0x5f   : > { %2319 = vmatmul.msk.f32.gmra.mxu3 %vm524_vm7, %v513_v63 }
  0x63   : > { %2307 = vmatmul.msk.f32.gmra.mxu0 %vm524_vm7, %v501_v2  ;;  %v508_v2 = vmul.f32 0.33333334, %v476_v0 }
  0x67   : > { %2320 = vmatmul.msk.f32.gmra.mxu3 %vm524_vm7, %v514_v22 }
  0x6b   : > { %2308 = vmatmul.msk.f32.gmra.mxu0 %vm524_vm7, %v502_v7 }
  0x73   : > { %2309 = vmatmul.msk.f32.gmra.mxu0 %vm524_vm7, %v503_v16  ;;  %v3021_v16 = vld [vmem:[%s3006_s26] sm:$0xff]  }
  0x74   : > { %v2591_v29 = vunpack.c.l.bf16 %v3021_v16  ;;  %v2592_v43 = vunpack.c.h.bf16 %v3021_v16 }
  0x7b   : > { %2310 = vmatmul.msk.f32.gmra.mxu0 %vm524_vm7, %v504_v26  ;;  %v2527_v26 = vunpack.c.l.bf16 %v3018_v15 }
  0x83   : > { %2311 = vmatmul.msk.f32.gmra.mxu0 %vm524_vm7, %v505_v35  ;;  %v387_v35 = vld [vmem:[%s2919_s27 + $0xb8] sm:$0xff] }
  0x84   : > { %v419_v49 = vadd.f32 1.5, %v387_v35 }
  0x86   : > { %v451_v3 = vmax.f32 %v419_v49, 0.0 }
  0x8b   : > { %2312 = vmatmul.msk.f32.gmra.mxu0 %vm524_vm7, %v506_v45 }
  0x93   : > { %2313 = vmatmul.msk.f32.gmra.mxu0 %vm524_vm7, %v507_v58 }
  0x98   : > { %v642_v4 = vpop.f32.mrf.mxu0 }
  0x99   : > { %v738_v5 = vmul.f32 %v642_v4, %v642_v4  ;;  %v2330_v6 = vadd.f32 -0.33333334, %v642_v4  ;;  %v2362_v7 = vadd.f32 -0.6666667, %v642_v4  ;;  %v2394_v8 = vadd.f32 -1.0, %v642_v4 }
  0x9b   : > { %v834_v10 = vmul.f32 %v2330_v6, %v2330_v6  ;;  %v930_v11 = vmul.f32 %v2362_v7, %v2362_v7  ;;  %v1026_v12 = vmul.f32 %v2394_v8, %v2394_v8  ;;  %2314 = vmatmul.msk.f32.gmra.mxu0 %vm524_vm7, %v508_v2  ;;  %v770_v14 = vadd.f32 1e-15, %v738_v5 }
  0x9d   : > { %v866_v19 = vadd.f32 1e-15, %v834_v10  ;;  %v962_v20 = vadd.f32 1e-15, %v930_v11  ;;  %v1058_v21 = vadd.f32 1e-15, %v1026_v12 }
  0x9e   : > { %v3045_v11 = vadd.f32 1.5, %v388_v62 }
  0x9f   : > { %v1090_v23 = vmul.f32 %v866_v19, %v770_v14  ;;  %v1122_v24 = vmul.f32 %v1058_v21, %v962_v20 }
  0xa0   : > { %v645_v27 = vpop.f32.mrf.mxu0 }
  0xa1   : > { %v1154_v31 = vmul.f32 %v1122_v24, %v866_v19  ;;  %v1186_v32 = vmul.f32 %v1122_v24, %v770_v14  ;;  %v1218_v33 = vmul.f32 %v1090_v23, %v1058_v21  ;;  %v739_v36 = vmul.f32 %v645_v27, %v645_v27 }
  0xa2   : > { %v2331_v37 = vadd.f32 -0.33333334, %v645_v27  ;;  %v2363_v38 = vadd.f32 -0.6666667, %v645_v27  ;;  %v2395_v39 = vadd.f32 -1.0, %v645_v27  ;;  %v1250_v50 = vmul.f32 %v1090_v23, %v962_v20  ;;  %v3048_v20 = vld [vmem:[%s3006_s26 + $0x8] sm:$0xff]  }
  0xa3   : > { %v1346_v40 = vmul.f32 %v2463_v25, %v1154_v31  ;;  %v1442_v41 = vmul.f32 %v2527_v26, %v1186_v32  ;;  %v1762_v42 = vadd.f32 %v1186_v32, %v1154_v31  ;;  %v771_v52 = vadd.f32 1e-15, %v739_v36 }
  0xa4   : > { %v835_v44 = vmul.f32 %v2331_v37, %v2331_v37  ;;  %v931_v45 = vmul.f32 %v2363_v38, %v2363_v38  ;;  %v1027_v46 = vmul.f32 %v2395_v39, %v2395_v39  ;;  %v1570_v57 = vmul.f32 %v2591_v29, %v1218_v33 }
  0xa5   : > { %v1794_v51 = vadd.f32 %v1762_v42, %v1218_v33  ;;  %v1474_v53 = vadd.f32 %v1442_v41, %v1346_v40  ;;  %v1698_v25 = vmul.f32 %v2655_v30, %v1250_v50  ;;  %v2595_v32 = vunpack.c.l.bf16 %v3048_v20 }
  0xa6   : > { %v867_v54 = vadd.f32 1e-15, %v835_v44  ;;  %v963_v55 = vadd.f32 1e-15, %v931_v45  ;;  %v1059_v56 = vadd.f32 1e-15, %v1027_v46 }
  0xa7   : > { %v1826_v58 = vadd.f32 %v1794_v51, %v1250_v50  ;;  %v1602_v2 = vadd.f32 %v1570_v57, %v1474_v53  ;;  %v483_v39 = vmin.f32 %v451_v3, 3.0  ;;  %v452_v40 = vmax.f32 %v3045_v11, 0.0 }
  0xa8   : > { %v1091_v63 = vmul.f32 %v867_v54, %v771_v52  ;;  %v1123_v0 = vmul.f32 %v1059_v56, %v963_v55  ;;  %v648_v1 = vpop.f32.mrf.mxu0 }
  0xa9   : > { %v740_v4 = vmul.f32 %v648_v1, %v648_v1  ;;  %v2332_v5 = vadd.f32 -0.33333334, %v648_v1  ;;  %v2364_v6 = vadd.f32 -0.6666667, %v648_v1  ;;  %v2396_v7 = vadd.f32 -1.0, %v648_v1 }
  0xaa   : > { %v1155_v8 = vmul.f32 %v1123_v0, %v867_v54  ;;  %v1187_v9 = vmul.f32 %v1123_v0, %v771_v52  ;;  %v1219_v10 = vmul.f32 %v1091_v63, %v1059_v56  ;;  %v1251_v12 = vmul.f32 %v1091_v63, %v963_v55  ;;  %v3053_v55 = vld [vmem:[%s3011_s30 + $0x8] sm:$0xff]  }
  0xab   : > { %v836_v13 = vmul.f32 %v2332_v5, %v2332_v5  ;;  %v932_v14 = vmul.f32 %v2364_v6, %v2364_v6  ;;  %v1028_v15 = vmul.f32 %v2396_v7, %v2396_v7  ;;  %v772_v19 = vadd.f32 1e-15, %v740_v4 }
  0xac   : > { %v1347_v16 = vmul.f32 %v2464_v28, %v1155_v8  ;;  %v1443_v17 = vmul.f32 %v2528_v34, %v1187_v9  ;;  %v1763_v18 = vadd.f32 %v1187_v9, %v1155_v8  ;;  %2794 = vrcp.f32 %v1826_v58 }
  0xad   : > { %v868_v21 = vadd.f32 1e-15, %v836_v13  ;;  %v964_v22 = vadd.f32 1e-15, %v932_v14  ;;  %v1060_v23 = vadd.f32 1e-15, %v1028_v15  ;;  %v1571_v27 = vmul.f32 %v2592_v43, %v1219_v10 }
  0xae   : > { %v1795_v24 = vadd.f32 %v1763_v18, %v1219_v10  ;;  %v1475_v26 = vadd.f32 %v1443_v17, %v1347_v16  ;;  %v1730_v34 = vadd.f32 %v1698_v25, %v1602_v2  ;;  %v1699_v36 = vmul.f32 %v2656_v61, %v1251_v12 }
  0xaf   : > { %v1092_v29 = vmul.f32 %v868_v21, %v772_v19  ;;  %v1124_v31 = vmul.f32 %v1060_v23, %v964_v22  ;;  %v515_v58 = vmul.f32 0.33333334, %v483_v39  ;;  %v2468_v1 = vunpack.c.h.bf16 %v3036_v47 }
  0xb0   : > { %v1827_v33 = vadd.f32 %v1795_v24, %v1251_v12  ;;  %v651_v28 = vpop.f32.mrf.mxu0  ;;  %v1603_v35 = vadd.f32 %v1571_v27, %v1475_v26  ;;  %v2659_v2 = vunpack.c.l.bf16 %v3053_v55  ;;  %v484_v13 = vmin.f32 %v452_v40, 3.0  ;;  %v3064_v24 = vld [vmem:[%s3001_s20 + $0x10] sm:$0xff]  }
  0xb1   : > { %v1156_v37 = vmul.f32 %v1124_v31, %v868_v21  ;;  %v1188_v38 = vmul.f32 %v1124_v31, %v772_v19  ;;  %v741_v41 = vmul.f32 %v651_v28, %v651_v28  ;;  %v2333_v30 = vadd.f32 -0.33333334, %v651_v28  ;;  %2321 = vmatmul.msk.f32.gmra.mxu3 %vm524_vm7, %v515_v58 }
  0xb2   : > { %v2365_v42 = vadd.f32 -0.6666667, %v651_v28  ;;  %v2397_v43 = vadd.f32 -1.0, %v651_v28  ;;  %v2795_v44 = vpop.eup %2794  ;;  %v1220_v45 = vmul.f32 %v1092_v29, %v1060_v23  ;;  %2796 = vrcp.f32 %v1827_v33  ;;  %v3061_v23 = vld [vmem:[%s2996_s17 + $0x10] sm:$0xff]  }
  0xb3   : > { %v1348_v46 = vmul.f32 %v2467_v59, %v1156_v37  ;;  %v1444_v49 = vmul.f32 %v2531_v60, %v1188_v38  ;;  %v1764_v50 = vadd.f32 %v1188_v38, %v1156_v37  ;;  %v773_v51 = vadd.f32 1e-15, %v741_v41 }
  0xb4   : > { %v837_v52 = vmul.f32 %v2333_v30, %v2333_v30  ;;  %v933_v53 = vmul.f32 %v2365_v42, %v2365_v42  ;;  %v1029_v54 = vmul.f32 %v2397_v43, %v2397_v43  ;;  %v1890_v57 = vmul.f32 %v2795_v44, %v1730_v34 }
  0xb5   : > { %v1796_v56 = vadd.f32 %v1764_v50, %v1220_v45  ;;  %v1252_v61 = vmul.f32 %v1092_v29, %v964_v22  ;;  %v2532_v59 = vunpack.c.h.bf16 %v3039_v48  ;;  %v1731_v60 = vadd.f32 %v1699_v36, %v1603_v35 }
  0xb6   : > { %v869_v62 = vadd.f32 1e-15, %v837_v52  ;;  %v965_v63 = vadd.f32 1e-15, %v933_v53  ;;  %v1061_v0 = vadd.f32 1e-15, %v1029_v54  ;;  %2427 = vmatmul.msk.f32.vlgmr.msra.gmra.mxu1 %vm1927_vm9, %v1890_v57  ;;  %v1476_v7 = vadd.f32 %v1444_v49, %v1348_v46 }
  0xb7   : > { %v1828_v3 = vadd.f32 %v1796_v56, %v1252_v61  ;;  %v1572_v31 = vmul.f32 %v2595_v32, %v1220_v45  ;;  %v516_v28 = vmul.f32 0.33333334, %v484_v13  ;;  %v2596_v34 = vunpack.c.h.bf16 %v3048_v20 }
  0xb8   : > { %v1093_v4 = vmul.f32 %v869_v62, %v773_v51  ;;  %v1125_v5 = vmul.f32 %v1061_v0, %v965_v63  ;;  %v654_v6 = vpop.f32.mrf.mxu0  ;;  %v2797_v14 = vpop.eup %2796  ;;  %v2471_v39 = vunpack.c.l.bf16 %v3061_v23  ;;  %v2535_v40 = vunpack.c.l.bf16 %v3064_v24 }
  0xb9   : > { %v742_v8 = vmul.f32 %v654_v6, %v654_v6  ;;  %v2334_v9 = vadd.f32 -0.33333334, %v654_v6  ;;  %v2366_v10 = vadd.f32 -0.6666667, %v654_v6  ;;  %v2398_v47 = vadd.f32 -1.0, %v654_v6  ;;  %2322 = vmatmul.msk.f32.gmra.mxu3 %vm524_vm7, %v516_v28 }
  0xba   : > { %v1157_v11 = vmul.f32 %v1125_v5, %v869_v62  ;;  %v1189_v48 = vmul.f32 %v1125_v5, %v773_v51  ;;  %v1221_v12 = vmul.f32 %v1093_v4, %v1061_v0  ;;  %v1891_v25 = vmul.f32 %v2797_v14, %v1731_v60  ;;  %v3075_v51 = vld [vmem:[%s3006_s26 + $0x10] sm:$0xff]  }
  0xbb   : > { %v774_v15 = vadd.f32 1e-15, %v742_v8  ;;  %v838_v16 = vmul.f32 %v2334_v9, %v2334_v9  ;;  %v934_v17 = vmul.f32 %v2366_v10, %v2366_v10  ;;  %v1030_v18 = vmul.f32 %v2398_v47, %v2398_v47  ;;  %v389_v8 = vld [vmem:[%s2919_s27 + $0xc8] sm:$0xff] }
  0xbc   : > { %v1349_v19 = vmul.f32 %v2468_v1, %v1157_v11  ;;  %v1445_v21 = vmul.f32 %v2532_v59, %v1189_v48  ;;  %v1765_v22 = vadd.f32 %v1189_v48, %v1157_v11  ;;  %2798 = vrcp.f32 %v1828_v3 }
  0xbd   : > { %v870_v26 = vadd.f32 1e-15, %v838_v16  ;;  %v966_v27 = vadd.f32 1e-15, %v934_v17  ;;  %v1062_v29 = vadd.f32 1e-15, %v1030_v18  ;;  %v1253_v35 = vmul.f32 %v1093_v4, %v965_v63 }
  0xbe   : > { %v1797_v33 = vadd.f32 %v1765_v22, %v1221_v12  ;;  %2428 = vmatmul.msk.f32.gmra.mxu1 %vm1927_vm9, %v1891_v25  ;;  %v1604_v38 = vadd.f32 %v1572_v31, %v1476_v7  ;;  %v1477_v32 = vadd.f32 %v1445_v21, %v1349_v19  ;;  %v2660_v30 = vunpack.c.h.bf16 %v3053_v55  ;;  %v3083_v21 = vld [vmem:[%s3011_s30 + $0x10] sm:$0xff]  }
  0xbf   : > { %v1094_v36 = vmul.f32 %v870_v26, %v774_v15  ;;  %v1126_v37 = vmul.f32 %v1062_v29, %v966_v27  ;;  %v1700_v44 = vmul.f32 %v2659_v2, %v1252_v61  ;;  %v1573_v50 = vmul.f32 %v2596_v34, %v1221_v12 }
  0xc0   : > { %v657_v41 = vpop.f32.mrf.mxu0  ;;  %v1829_v42 = vadd.f32 %v1797_v33, %v1253_v35  ;;  %v1701_v1 = vmul.f32 %v2660_v30, %v1253_v35  ;;  %v2599_v61 = vunpack.c.l.bf16 %v3075_v51  ;;  %v2472_v7 = vunpack.c.h.bf16 %v3061_v23 }
  0xc1   : > { %v1158_v43 = vmul.f32 %v1126_v37, %v870_v26  ;;  %v1190_v20 = vmul.f32 %v1126_v37, %v774_v15  ;;  %v2335_v45 = vadd.f32 -0.33333334, %v657_v41  ;;  %v2367_v46 = vadd.f32 -0.6666667, %v657_v41 }
  0xc2   : > { %v2399_v49 = vadd.f32 -1.0, %v657_v41  ;;  %v1222_v52 = vmul.f32 %v1094_v36, %v1062_v29  ;;  %v743_v54 = vmul.f32 %v657_v41, %v657_v41  ;;  %v1732_v56 = vadd.f32 %v1700_v44, %v1604_v38  ;;  %v2799_v57 = vpop.eup %2798  ;;  %v390_v38 = vld [vmem:[%s2919_s27 + $0xd0] sm:$0xff] }
  0xc3   : > { %v1766_v53 = vadd.f32 %v1190_v20, %v1158_v43  ;;  %v839_v58 = vmul.f32 %v2335_v45, %v2335_v45  ;;  %v935_v62 = vmul.f32 %v2367_v46, %v2367_v46  ;;  %v1605_v55 = vadd.f32 %v1573_v50, %v1477_v32 }
  0xc4   : > { %v1031_v63 = vmul.f32 %v2399_v49, %v2399_v49  ;;  %v1892_v0 = vmul.f32 %v2799_v57, %v1732_v56  ;;  %2800 = vrcp.f32 %v1829_v42  ;;  %v1350_v4 = vmul.f32 %v2471_v39, %v1158_v43 }
  0xc5   : > { %v1798_v59 = vadd.f32 %v1766_v53, %v1222_v52  ;;  %v871_v60 = vadd.f32 1e-15, %v839_v58  ;;  %v967_v2 = vadd.f32 1e-15, %v935_v62  ;;  %v1446_v5 = vmul.f32 %v2535_v40, %v1190_v20 }
  0xc6   : > { %v1063_v3 = vadd.f32 1e-15, %v1031_v63  ;;  %v775_v6 = vadd.f32 1e-15, %v743_v54  ;;  %2429 = vmatmul.msk.f32.gmra.mxu1 %vm1927_vm9, %v1892_v0  ;;  %v1254_v9 = vmul.f32 %v1094_v36, %v966_v27  ;;  %v2536_v47 = vunpack.c.h.bf16 %v3064_v24 }
  0xc7   : > { %v1733_v48 = vadd.f32 %v1701_v1, %v1605_v55  ;;  %v421_v19 = vadd.f32 1.5, %v389_v8  ;;  %v1478_v27 = vadd.f32 %v1446_v5, %v1350_v4  ;;  %v1574_v33 = vmul.f32 %v2599_v61, %v1222_v52 }
  0xc8   : > { %v1127_v10 = vmul.f32 %v1063_v3, %v967_v2  ;;  %v660_v11 = vpop.f32.mrf.mxu0  ;;  %v1095_v12 = vmul.f32 %v871_v60, %v775_v6  ;;  %v1830_v16 = vadd.f32 %v1798_v59, %v1254_v9  ;;  %v2663_v36 = vunpack.c.l.bf16 %v3083_v21 }
  0xc9   : > { %v2336_v13 = vadd.f32 -0.33333334, %v660_v11  ;;  %v2368_v14 = vadd.f32 -0.6666667, %v660_v11  ;;  %v2400_v15 = vadd.f32 -1.0, %v660_v11  ;;  %v744_v24 = vmul.f32 %v660_v11, %v660_v11 }
  0xca   : > { %v1159_v17 = vmul.f32 %v1127_v10, %v871_v60  ;;  %v1191_v18 = vmul.f32 %v1127_v10, %v775_v6  ;;  %v2801_v22 = vpop.eup %2800  ;;  %v1223_v28 = vmul.f32 %v1095_v12, %v1063_v3  ;;  %v453_v37 = vmax.f32 %v421_v19, 0.0  ;;  %v2719_v10 = vld [vmem:[%s2996_s17 + $0x18] sm:$0xff]  }
  0xcb   : > { %v840_v23 = vmul.f32 %v2336_v13, %v2336_v13  ;;  %v936_v25 = vmul.f32 %v2368_v14, %v2368_v14  ;;  %v1032_v26 = vmul.f32 %v2400_v15, %v2400_v15  ;;  %v1893_v31 = vmul.f32 %v2801_v22, %v1733_v48 }
  0xcc   : > { %v1767_v29 = vadd.f32 %v1191_v18, %v1159_v17  ;;  %2802 = vrcp.f32 %v1830_v16  ;;  %v1606_v32 = vadd.f32 %v1574_v33, %v1478_v27  ;;  %v1255_v30 = vmul.f32 %v1095_v12, %v967_v2 }
  0xcd   : > { %v968_v34 = vadd.f32 1e-15, %v936_v25  ;;  %v1064_v35 = vadd.f32 1e-15, %v1032_v26  ;;  %v872_v40 = vadd.f32 1e-15, %v840_v23  ;;  %v1351_v42 = vmul.f32 %v2472_v7, %v1159_v17 }
  0xce   : > { %v1799_v39 = vadd.f32 %v1767_v29, %v1223_v28  ;;  %2430 = vmatmul.msk.f32.gmra.mxu1 %vm1927_vm9, %v1893_v31  ;;  %v776_v43 = vadd.f32 1e-15, %v744_v24  ;;  %v485_v44 = vmin.f32 %v453_v37, 3.0  ;;  %v1447_v45 = vmul.f32 %v2536_v47, %v1191_v18  ;;  %v2734_v47 = vld [vmem:[%s3001_s20 + $0x18] sm:$0xff]  }
  0xcf   : > { %v1128_v41 = vmul.f32 %v1064_v35, %v968_v34  ;;  %v1702_v49 = vmul.f32 %v2663_v36, %v1254_v9  ;;  %v422_v50 = vadd.f32 1.5, %v390_v38  ;;  %v2600_v63 = vunpack.c.h.bf16 %v3075_v51 }
  0xd0   : > { %v663_v20 = vpop.f32.mrf.mxu0  ;;  %v1831_v57 = vadd.f32 %v1799_v39, %v1255_v30  ;;  %v517_v58 = vmul.f32 0.33333334, %v485_v44  ;;  %v1096_v0 = vmul.f32 %v872_v40, %v776_v43  ;;  %v1479_v3 = vadd.f32 %v1447_v45, %v1351_v42 }
  0xd1   : > { %v1160_v46 = vmul.f32 %v1128_v41, %v872_v40  ;;  %v1192_v52 = vmul.f32 %v1128_v41, %v776_v43  ;;  %v2337_v53 = vadd.f32 -0.33333334, %v663_v20  ;;  %v2369_v54 = vadd.f32 -0.6666667, %v663_v20  ;;  %v3097_v40 = vld [vmem:[%s3006_s26 + $0x18] sm:$0xff]  }
  0xd2   : > { %v2401_v56 = vadd.f32 -1.0, %v663_v20  ;;  %v1734_v62 = vadd.f32 %v1702_v49, %v1606_v32  ;;  %v2803_v55 = vpop.eup %2802  ;;  %2323 = vmatmul.msk.f32.gmra.mxu3 %vm524_vm7, %v517_v58  ;;  %v454_v2 = vmax.f32 %v422_v50, 0.0  ;;  %v745_v7 = vmul.f32 %v663_v20, %v663_v20  ;;  %v3102_v49 = vld [vmem:[%s3011_s30 + $0x18] sm:$0xff]  }
  0xd3   : > { %v841_v1 = vmul.f32 %v2337_v53, %v2337_v53  ;;  %v937_v61 = vmul.f32 %v2369_v54, %v2369_v54  ;;  %v1768_v4 = vadd.f32 %v1192_v52, %v1160_v46  ;;  %v1575_v8 = vmul.f32 %v2600_v63, %v1223_v28 }
  0xd4   : > { %v1033_v59 = vmul.f32 %v2401_v56, %v2401_v56  ;;  %v1894_v60 = vmul.f32 %v2803_v55, %v1734_v62  ;;  %v2664_v51 = vunpack.c.h.bf16 %v3083_v21  ;;  %2804 = vrcp.f32 %v1831_v57  ;;  %v391_v21 = vld [vmem:[%s2919_s27 + $0xd8] sm:$0xff] }
  0xd5   : > { %v969_v5 = vadd.f32 1e-15, %v937_v61  ;;  %v1224_v9 = vmul.f32 %v1096_v0, %v1064_v35  ;;  %v873_v11 = vadd.f32 1e-15, %v841_v1  ;;  %v486_v12 = vmin.f32 %v454_v2, 3.0 }
  0xd6   : > { %v1065_v6 = vadd.f32 1e-15, %v1033_v59  ;;  %2431 = vmatmul.msk.f32.gmra.mxu1 %vm1927_vm9, %v1894_v60  ;;  %v1607_v16 = vadd.f32 %v1575_v8, %v1479_v3  ;;  %v2475_v19 = vunpack.c.l.bf16 %v2719_v10  ;;  %v2539_v22 = vunpack.c.l.bf16 %v2734_v47 }
  0xd7   : > { %v1800_v17 = vadd.f32 %v1768_v4, %v1224_v9  ;;  %v777_v23 = vadd.f32 1e-15, %v745_v7  ;;  %v1703_v25 = vmul.f32 %v2664_v51, %v1255_v30  ;;  %v1256_v26 = vmul.f32 %v1096_v0, %v968_v34 }
  0xd8   : > { %v666_v48 = vpop.f32.mrf.mxu0  ;;  %v1129_v13 = vmul.f32 %v1065_v6, %v969_v5  ;;  %v518_v24 = vmul.f32 0.33333334, %v486_v12  ;;  %v423_v39 = vadd.f32 1.5, %v391_v21  ;;  %v1352_v41 = vmul.f32 %v2475_v19, %v1160_v46 }
  0xd9   : > { %v2370_v14 = vadd.f32 -0.6666667, %v666_v48  ;;  %v2402_v15 = vadd.f32 -1.0, %v666_v48  ;;  %v2338_v18 = vadd.f32 -0.33333334, %v666_v48  ;;  %v1097_v33 = vmul.f32 %v873_v11, %v777_v23 }
  0xda   : > { %v2805_v31 = vpop.eup %2804  ;;  %v1161_v28 = vmul.f32 %v1129_v13, %v873_v11  ;;  %v1193_v35 = vmul.f32 %v1129_v13, %v777_v23  ;;  %v1735_v36 = vadd.f32 %v1703_v25, %v1607_v16  ;;  %v1832_v37 = vadd.f32 %v1800_v17, %v1256_v26  ;;  %2324 = vmatmul.msk.f32.gmra.mxu3 %vm524_vm7, %v518_v24  ;;  %v3112_v11 = vld [vmem:[%s2996_s17 + $0x20] sm:$0xff]  }
  0xdb   : > { %v938_v27 = vmul.f32 %v2370_v14, %v2370_v14  ;;  %v1034_v29 = vmul.f32 %v2402_v15, %v2402_v15  ;;  %v842_v38 = vmul.f32 %v2338_v18, %v2338_v18  ;;  %v1448_v32 = vmul.f32 %v2539_v22, %v1192_v52 }
  0xdc   : > { %v2476_v30 = vunpack.c.h.bf16 %v2719_v10  ;;  %v1895_v34 = vmul.f32 %v2805_v31, %v1735_v36  ;;  %v2540_v42 = vunpack.c.h.bf16 %v2734_v47  ;;  %v455_v45 = vmax.f32 %v423_v39, 0.0  ;;  %v3121_v36 = vld [vmem:[%s3001_s20 + $0x20] sm:$0xff]  }
  0xdd   : > { %v3099_v43 = vadd.f32 1e-15, %v938_v27  ;;  %v1066_v20 = vadd.f32 1e-15, %v1034_v29  ;;  %v1225_v50 = vmul.f32 %v1097_v33, %v1065_v6  ;;  %v1769_v53 = vadd.f32 %v1193_v35, %v1161_v28  ;;  %v392_v6 = vld [vmem:[%s2919_s27 + $0xe0] sm:$0xff] }
  0xde   : > { %v746_v54 = vmul.f32 %v666_v48, %v666_v48  ;;  %2432 = vmatmul.msk.f32.gmra.mxu1 %vm1927_vm9, %v1895_v34  ;;  %v2603_v56 = vunpack.c.l.bf16 %v3097_v40  ;;  %v874_v57 = vadd.f32 1e-15, %v842_v38  ;;  %2806 = vrcp.f32 %v1832_v37 }
  0xdf   : > { %v487_v62 = vmin.f32 %v455_v45, 3.0  ;;  %v1480_v63 = vadd.f32 %v1448_v32, %v1352_v41  ;;  %v2667_v55 = vunpack.c.l.bf16 %v3102_v49  ;;  %v1257_v0 = vmul.f32 %v1097_v33, %v969_v5 }
  0xe0   : > { %v669_v44 = vpop.f32.mrf.mxu0  ;;  %v1130_v1 = vmul.f32 %v1066_v20, %v3099_v43  ;;  %v1353_v60 = vmul.f32 %v2476_v30, %v1161_v28  ;;  %v778_v2 = vadd.f32 1e-15, %v746_v54  ;;  %v1576_v4 = vmul.f32 %v2603_v56, %v1224_v9 }
  0xe1   : > { %v2371_v46 = vadd.f32 -0.6666667, %v669_v44  ;;  %v2403_v52 = vadd.f32 -1.0, %v669_v44  ;;  %v2339_v58 = vadd.f32 -0.33333334, %v669_v44  ;;  %v1449_v7 = vmul.f32 %v2540_v42, %v1193_v35 }
  0xe2   : > { %v519_v3 = vmul.f32 0.33333334, %v487_v62  ;;  %v1801_v8 = vadd.f32 %v1769_v53, %v1225_v50  ;;  %v1098_v47 = vmul.f32 %v874_v57, %v778_v2  ;;  %v1608_v5 = vadd.f32 %v1576_v4, %v1480_v63 }
  0xe3   : > { %v939_v61 = vmul.f32 %v2371_v46, %v2371_v46  ;;  %v1035_v59 = vmul.f32 %v2403_v52, %v2403_v52  ;;  %v843_v48 = vmul.f32 %v2339_v58, %v2339_v58  ;;  %v1704_v12 = vmul.f32 %v2667_v55, %v1256_v26 }
  0xe4   : > { %2325 = vmatmul.msk.f32.gmra.mxu3 %vm524_vm7, %v519_v3  ;;  %v2807_v13 = vpop.eup %2806  ;;  %v1162_v14 = vmul.f32 %v1130_v1, %v874_v57  ;;  %v1194_v15 = vmul.f32 %v1130_v1, %v778_v2  ;;  %v747_v16 = vmul.f32 %v669_v44, %v669_v44  ;;  %v424_v9 = vadd.f32 1.5, %v392_v6  ;;  %v393_v57 = vld [vmem:[%s2919_s27 + $0xe8] sm:$0xff] }
  0xe5   : > { %v3109_v51 = vadd.f32 1e-15, %v939_v61  ;;  %v1067_v10 = vadd.f32 1e-15, %v1035_v59  ;;  %v1736_v19 = vadd.f32 %v1704_v12, %v1608_v5  ;;  %v2604_v23 = vunpack.c.h.bf16 %v3097_v40  ;;  %v3138_v5 = vld [vmem:[%s3011_s30 + $0x20] sm:$0xff]  }
  0xe6   : > { %v1833_v25 = vadd.f32 %v1801_v8, %v1257_v0  ;;  %v2479_v21 = vunpack.c.l.bf16 %v3112_v11  ;;  %v875_v27 = vadd.f32 1e-15, %v843_v48  ;;  %v1481_v26 = vadd.f32 %v1449_v7, %v1353_v60  ;;  %v2750_v8 = vld [vmem:[%s3006_s26 + $0x20] sm:$0xff]  }
  0xe7   : > { %v1131_v18 = vmul.f32 %v1067_v10, %v3109_v51  ;;  %v1896_v29 = vmul.f32 %v2807_v13, %v1736_v19  ;;  %v3118_v31 = vmul.f32 %v1098_v47, %v1066_v20  ;;  %v1770_v33 = vadd.f32 %v1194_v15, %v1162_v14 }
  0xe8   : > { %v672_v17 = vpop.f32.mrf.mxu0  ;;  %v779_v28 = vadd.f32 1e-15, %v747_v16  ;;  %v456_v39 = vmax.f32 %v424_v9, 0.0  ;;  %v1577_v40 = vmul.f32 %v2604_v23, %v1225_v50  ;;  %v2668_v30 = vunpack.c.h.bf16 %v3102_v49 }
  0xe9   : > { %v2372_v22 = vadd.f32 -0.6666667, %v672_v17  ;;  %v2340_v24 = vadd.f32 -0.33333334, %v672_v17  ;;  %v2404_v35 = vadd.f32 -1.0, %v672_v17  ;;  %v3123_v37 = vmul.f32 %v1131_v18, %v875_v27  ;;  %2433 = vmatmul.msk.f32.gmra.mxu1 %vm1927_vm9, %v1896_v29 }
  0xea   : > { %v1195_v41 = vmul.f32 %v1131_v18, %v779_v28  ;;  %2808 = vrcp.f32 %v1833_v25  ;;  %v488_v42 = vmin.f32 %v456_v39, 3.0  ;;  %v1609_v20 = vadd.f32 %v1577_v40, %v1481_v26 }
  0xeb   : > { %v940_v38 = vmul.f32 %v2372_v22, %v2372_v22  ;;  %v1036_v32 = vmul.f32 %v2404_v35, %v2404_v35  ;;  %v844_v34 = vmul.f32 %v2340_v24, %v2340_v24  ;;  %v2543_v44 = vunpack.c.l.bf16 %v3121_v36 }
  0xec   : > { %v1802_v45 = vadd.f32 %v1770_v33, %v3118_v31  ;;  %v1099_v53 = vmul.f32 %v875_v27, %v779_v28  ;;  %v748_v54 = vmul.f32 %v672_v17, %v672_v17  ;;  %v520_v50 = vmul.f32 0.33333334, %v488_v42  ;;  %v3154_v42 = vld [vmem:[%s2996_s17 + $0x28] sm:$0xff]  }
  0xed   : > { %v3130_v46 = vadd.f32 1e-15, %v940_v38  ;;  %v1068_v52 = vadd.f32 1e-15, %v1036_v32  ;;  %v1705_v58 = vmul.f32 %v2668_v30, %v1257_v0  ;;  %v1258_v49 = vmul.f32 %v1098_v47, %v3099_v43  ;;  %v394_v38 = vld [vmem:[%s2919_s27 + $0xf0] sm:$0xff] }
  0xee   : > { %v1354_v62 = vmul.f32 %v2479_v21, %v1162_v14  ;;  %v1771_v63 = vadd.f32 %v1195_v41, %v3123_v37  ;;  %v876_v1 = vadd.f32 1e-15, %v844_v34  ;;  %2326 = vmatmul.msk.f32.gmra.mxu3 %vm524_vm7, %v520_v50  ;;  %v425_v60 = vadd.f32 1.5, %v393_v57 }
  0xef   : > { %v1737_v61 = vadd.f32 %v1705_v58, %v1609_v20  ;;  %v1450_v3 = vmul.f32 %v2543_v44, %v1194_v15  ;;  %v1834_v4 = vadd.f32 %v1802_v45, %v1258_v49  ;;  %v1227_v6 = vmul.f32 %v1099_v53, %v1067_v10 }
  0xf0   : > { %v675_v56 = vpop.f32.mrf.mxu0  ;;  %v2809_v2 = vpop.eup %2808  ;;  %v780_v7 = vadd.f32 1e-15, %v748_v54  ;;  %v1132_v0 = vmul.f32 %v1068_v52, %v3130_v46  ;;  %v457_v48 = vmax.f32 %v425_v60, 0.0  ;;  %v2480_v12 = vunpack.c.h.bf16 %v3112_v11 }
  0xf1   : > { %v2373_v55 = vadd.f32 -0.6666667, %v675_v56  ;;  %v2405_v59 = vadd.f32 -1.0, %v675_v56  ;;  %v1897_v43 = vmul.f32 %v2809_v2, %v1737_v61  ;;  %v2341_v47 = vadd.f32 -0.33333334, %v675_v56 }
  0xf2   : > { %v2544_v13 = vunpack.c.h.bf16 %v3121_v36  ;;  %v1803_v17 = vadd.f32 %v1771_v63, %v1227_v6  ;;  %v1100_v9 = vmul.f32 %v876_v1, %v780_v7  ;;  %v489_v10 = vmin.f32 %v457_v48, 3.0 }
  0xf3   : > { %v941_v14 = vmul.f32 %v2373_v55, %v2373_v55  ;;  %v1037_v16 = vmul.f32 %v2405_v59, %v2405_v59  ;;  %2434 = vmatmul.msk.f32.gmra.mxu1 %vm1927_vm9, %v1897_v43  ;;  %v2607_v15 = vunpack.c.l.bf16 %v2750_v8  ;;  %v749_v18 = vmul.f32 %v675_v56, %v675_v56 }
  0xf4   : > { %v1482_v19 = vadd.f32 %v1450_v3, %v1354_v62  ;;  %v2671_v22 = vunpack.c.l.bf16 %v3138_v5  ;;  %2810 = vrcp.f32 %v1834_v4  ;;  %v1164_v25 = vmul.f32 %v1132_v0, %v876_v1 }
  0xf5   : > { %v1196_v21 = vmul.f32 %v1132_v0, %v780_v7  ;;  %v845_v11 = vmul.f32 %v2341_v47, %v2341_v47  ;;  %v521_v27 = vmul.f32 0.33333334, %v489_v10  ;;  %v1259_v29 = vmul.f32 %v1099_v53, %v3109_v51  ;;  %v3157_v51 = vld [vmem:[%s3001_s20 + $0x28] sm:$0xff]  }
  0xf6   : > { %v3145_v24 = vadd.f32 1e-15, %v941_v14  ;;  %v1069_v26 = vadd.f32 1e-15, %v1037_v16  ;;  %v1578_v33 = vmul.f32 %v2607_v15, %v3118_v31  ;;  %v1355_v28 = vmul.f32 %v2480_v12, %v3123_v37  ;;  %v3174_v10 = vld [vmem:[%s3006_s26 + $0x28] sm:$0xff]  }
  0xf7   : > { %v1451_v35 = vmul.f32 %v2544_v13, %v1195_v41  ;;  %2327 = vmatmul.msk.f32.gmra.mxu3 %vm524_vm7, %v521_v27  ;;  %v1835_v39 = vadd.f32 %v1803_v17, %v1259_v29  ;;  %v1706_v32 = vmul.f32 %v2671_v22, %v1258_v49  ;;  %v3151_v34 = vmul.f32 %v1100_v9, %v1068_v52  ;;  %v395_v17 = vld [vmem:[%s2919_s27 + $0xf8] sm:$0xff] }
  0xf8   : > { %v678_v23 = vpop.f32.mrf.mxu0  ;;  %v1610_v40 = vadd.f32 %v1578_v33, %v1482_v19  ;;  %v1772_v20 = vadd.f32 %v1196_v21, %v1164_v25  ;;  %v781_v44 = vadd.f32 1e-15, %v749_v18  ;;  %v877_v31 = vadd.f32 1e-15, %v845_v11 }
  0xf9   : > { %v2374_v36 = vadd.f32 -0.6666667, %v678_v23  ;;  %v2406_v30 = vadd.f32 -1.0, %v678_v23  ;;  %v1133_v37 = vmul.f32 %v1069_v26, %v3145_v24  ;;  %v2342_v53 = vadd.f32 -0.33333334, %v678_v23 }
  0xfa   : > { %v2811_v45 = vpop.eup %2810  ;;  %v1738_v41 = vadd.f32 %v1706_v32, %v1610_v40  ;;  %v426_v54 = vadd.f32 1.5, %v394_v38  ;;  %v1483_v50 = vadd.f32 %v1451_v35, %v1355_v28  ;;  %v2608_v58 = vunpack.c.h.bf16 %v2750_v8 }
  0xfb   : > { %v942_v56 = vmul.f32 %v2374_v36, %v2374_v36  ;;  %v1038_v57 = vmul.f32 %v2406_v30, %v2406_v30  ;;  %v2483_v52 = vunpack.c.l.bf16 %v3154_v42  ;;  %v2547_v49 = vunpack.c.l.bf16 %v3157_v51 }
  0xfc   : > { %v1898_v62 = vmul.f32 %v2811_v45, %v1738_v41  ;;  %v458_v63 = vmax.f32 %v426_v54, 0.0  ;;  %v1804_v55 = vadd.f32 %v1772_v20, %v3151_v34  ;;  %v1101_v1 = vmul.f32 %v877_v31, %v781_v44  ;;  %v3191_v45 = vld [vmem:[%s3001_s20 + $0x30] sm:$0xff]  }
  0xfd   : > { %v1579_v61 = vmul.f32 %v2608_v58, %v1227_v6  ;;  %v2672_v59 = vunpack.c.h.bf16 %v3138_v5  ;;  %v1165_v2 = vmul.f32 %v1133_v37, %v877_v31  ;;  %v1197_v3 = vmul.f32 %v1133_v37, %v781_v44  ;;  %v3188_v31 = vld [vmem:[%s2996_s17 + $0x30] sm:$0xff]  }
  0xfe   : > { %2435 = vmatmul.msk.f32.gmra.mxu1 %vm1927_vm9, %v1898_v62  ;;  %v490_v4 = vmin.f32 %v458_v63, 3.0  ;;  %2812 = vrcp.f32 %v1835_v39  ;;  %v846_v7 = vmul.f32 %v2342_v53, %v2342_v53  ;;  %v3167_v8 = vadd.f32 1e-15, %v942_v56 }
  0xff   : > { %v1070_v0 = vadd.f32 1e-15, %v1038_v57  ;;  %v1611_v43 = vadd.f32 %v1579_v61, %v1483_v50  ;;  %v1260_v47 = vmul.f32 %v1100_v9, %v3130_v46  ;;  %v1356_v6 = vmul.f32 %v2483_v52, %v1164_v25 }
 0x100   : > { %v3164_v60 = vpop.f32.mrf.mxu0  ;;  %v1452_v48 = vmul.f32 %v2547_v49, %v1196_v21  ;;  %v522_v5 = vmul.f32 0.33333334, %v490_v4  ;;  %v750_v12 = vmul.f32 %v678_v23, %v678_v23  ;;  %v1707_v13 = vmul.f32 %v2672_v59, %v1259_v29  ;;  %v3180_v21 = vld [vmem:[%s3011_s30 + $0x28] sm:$0xff]  }
 0x101   : > { %v2375_v14 = vadd.f32 -0.6666667, %v3164_v60  ;;  %v2407_v16 = vadd.f32 -1.0, %v3164_v60  ;;  %v1836_v15 = vadd.f32 %v1804_v55, %v1260_v47  ;;  %v1229_v18 = vmul.f32 %v1101_v1, %v1069_v26 }
 0x102   : > { %v2484_v19 = vunpack.c.h.bf16 %v3154_v42  ;;  %v1773_v22 = vadd.f32 %v1197_v3, %v1165_v2  ;;  %2328 = vmatmul.msk.f32.gmra.mxu3 %vm524_vm7, %v522_v5  ;;  %v878_v46 = vadd.f32 1e-15, %v846_v7  ;;  %v1134_v9 = vmul.f32 %v1070_v0, %v3167_v8 }
 0x103   : > { %v1739_v25 = vadd.f32 %v1707_v13, %v1611_v43  ;;  %v943_v23 = vmul.f32 %v2375_v14, %v2375_v14  ;;  %v1039_v27 = vmul.f32 %v2407_v16, %v2407_v16  ;;  %v427_v29 = vadd.f32 1.5, %v395_v17 }
 0x104   : > { %v2813_v11 = vpop.eup %2812  ;;  %v1484_v33 = vadd.f32 %v1452_v48, %v1356_v6  ;;  %v2611_v26 = vunpack.c.l.bf16 %v3174_v10  ;;  %v2548_v28 = vunpack.c.h.bf16 %v3157_v51  ;;  %v782_v35 = vadd.f32 1e-15, %v750_v12 }
 0x105   : > { %v1899_v36 = vmul.f32 %v2813_v11, %v1739_v25  ;;  %v2343_v38 = vadd.f32 -0.33333334, %v3164_v60  ;;  %v1805_v39 = vadd.f32 %v1773_v22, %v1229_v18  ;;  %v459_v40 = vmax.f32 %v427_v29, 0.0 }
 0x106   : > { %v1580_v32 = vmul.f32 %v2611_v26, %v3151_v34  ;;  %v2675_v30 = vunpack.c.l.bf16 %v3180_v21  ;;  %v1102_v42 = vmul.f32 %v878_v46, %v782_v35  ;;  %v1166_v20 = vmul.f32 %v1134_v9, %v878_v46  ;;  %v3198_v34 = vpop.f32.mrf.mxu3 }
 0x107   : > { %v1198_v44 = vmul.f32 %v1134_v9, %v782_v35  ;;  %2436 = vmatmul.msk.f32.gmra.mxu1 %vm1927_vm9, %v1899_v36  ;;  %2814 = vrcp.f32 %v1836_v15  ;;  %v3194_v37 = vadd.f32 1e-15, %v943_v23  ;;  %v3196_v41 = vadd.f32 1e-15, %v1039_v27  ;;  %v3213_v27 = vld [vmem:[%s3006_s26 + $0x30] sm:$0xff]  }
 0x108   : > { %v684_v51 = vpop.f32.mrf.mxu0  ;;  %v491_v53 = vmin.f32 %v459_v40, 3.0  ;;  %v1612_v54 = vadd.f32 %v1580_v32, %v1484_v33  ;;  %v1261_v56 = vmul.f32 %v1101_v1, %v3145_v24  ;;  %v1357_v57 = vmul.f32 %v2484_v19, %v1165_v2  ;;  %v3218_v36 = vld [vmem:[%s3011_s30 + $0x30] sm:$0xff]  }
 0x109   : > { %v1453_v50 = vmul.f32 %v2548_v28, %v1197_v3  ;;  %v847_v58 = vmul.f32 %v2343_v38, %v2343_v38  ;;  %v2487_v52 = vunpack.c.l.bf16 %v3188_v31  ;;  %v2551_v49 = vunpack.c.l.bf16 %v3191_v45 }
 0x10a   : > { %v523_v62 = vmul.f32 0.33333334, %v491_v53  ;;  %v1708_v63 = vmul.f32 %v2675_v30, %v1260_v47  ;;  %v1837_v55 = vadd.f32 %v1805_v39, %v1261_v56  ;;  %v1230_v61 = vmul.f32 %v1102_v42, %v1070_v0 }
 0x10b   : > { %v751_v59 = vmul.f32 %v3164_v60, %v3164_v60  ;;  %v2376_v4 = vadd.f32 -0.6666667, %v684_v51  ;;  %v1774_v7 = vadd.f32 %v1198_v44, %v1166_v20  ;;  %v1135_v43 = vmul.f32 %v3196_v41, %v3194_v37 }
 0x10c   : > { %2329 = vmatmul.msk.f32.gmra.mxu3 %vm524_vm7, %v523_v62  ;;  %v1740_v24 = vadd.f32 %v1708_v63, %v1612_v54  ;;  %v2408_v1 = vadd.f32 -1.0, %v684_v51  ;;  %v879_v3 = vadd.f32 1e-15, %v847_v58  ;;  %v1485_v48 = vadd.f32 %v1453_v50, %v1357_v57  ;;  %v3230_v63 = vld [vmem:[%s2996_s17 + $0x38] sm:$0xff]  }
 0x10d   : > { %v2815_v2 = vpop.eup %2814  ;;  %v944_v6 = vmul.f32 %v2376_v4, %v2376_v4  ;;  %v2612_v47 = vunpack.c.h.bf16 %v3174_v10  ;;  %v2344_v0 = vadd.f32 -0.33333334, %v684_v51  ;;  %v2676_v60 = vunpack.c.h.bf16 %v3180_v21 }
 0x10e   : > { %v1900_v5 = vmul.f32 %v2815_v2, %v1740_v24  ;;  %v1040_v12 = vmul.f32 %v2408_v1, %v2408_v1  ;;  %v783_v13 = vadd.f32 1e-15, %v751_v59  ;;  %2816 = vrcp.f32 %v1837_v55  ;;  %v3233_v55 = vld [vmem:[%s3001_s20 + $0x38] sm:$0xff]  }
 0x10f   : > { %v1581_v14 = vmul.f32 %v2612_v47, %v1229_v18  ;;  %v1262_v16 = vmul.f32 %v1102_v42, %v3167_v8  ;;  %v1806_v17 = vadd.f32 %v1774_v7, %v1230_v61  ;;  %v1167_v15 = vmul.f32 %v1135_v43, %v879_v3  ;;  %v3215_v18 = vpop.f32.mrf.mxu3 }
 0x110   : > { %2437 = vmatmul.msk.f32.gmra.mxu1 %vm1927_vm9, %v1900_v5  ;;  %v1199_v19 = vmul.f32 %v1135_v43, %v783_v13  ;;  %v976_v22 = vadd.f32 1e-15, %v944_v6  ;;  %v1072_v46 = vadd.f32 1e-15, %v1040_v12  ;;  %v687_v9 = vpop.f32.mrf.mxu0  ;;  %v1358_v25 = vmul.f32 %v2487_v52, %v1166_v20 }
 0x111   : > { %v1613_v10 = vadd.f32 %v1581_v14, %v1485_v48  ;;  %v1454_v23 = vmul.f32 %v2551_v49, %v1198_v44  ;;  %v848_v11 = vmul.f32 %v2344_v0, %v2344_v0  ;;  %v1709_v21 = vmul.f32 %v2676_v60, %v1261_v56 }
 0x112   : > { %v1103_v29 = vmul.f32 %v879_v3, %v783_v13  ;;  %v752_v8 = vmul.f32 %v684_v51, %v684_v51  ;;  %v1838_v33 = vadd.f32 %v1806_v17, %v1262_v16  ;;  %v2377_v28 = vadd.f32 -0.6666667, %v687_v9 }
 0x113   : > { %v1741_v26 = vadd.f32 %v1709_v21, %v1613_v10  ;;  %v2409_v35 = vadd.f32 -1.0, %v687_v9  ;;  %v1775_v39 = vadd.f32 %v1199_v19, %v1167_v15  ;;  %v1136_v40 = vmul.f32 %v1072_v46, %v976_v22 }
 0x114   : > { %v2817_v38 = vpop.eup %2816  ;;  %v2345_v32 = vadd.f32 -0.33333334, %v687_v9  ;;  %v2615_v30 = vunpack.c.l.bf16 %v3213_v27  ;;  %v2488_v42 = vunpack.c.h.bf16 %v3188_v31  ;;  %v880_v20 = vadd.f32 1e-15, %v848_v11 }
 0x115   : > { %v1901_v44 = vmul.f32 %v2817_v38, %v1741_v26  ;;  %v1486_v53 = vadd.f32 %v1454_v23, %v1358_v25  ;;  %v3223_v51 = vmul.f32 %v1103_v29, %v3196_v41  ;;  %v2552_v54 = vunpack.c.h.bf16 %v3191_v45 }
 0x116   : > { %v784_v56 = vadd.f32 1e-15, %v752_v8  ;;  %v2679_v57 = vunpack.c.l.bf16 %v3218_v36  ;;  %v945_v50 = vmul.f32 %v2377_v28, %v2377_v28  ;;  %v1041_v58 = vmul.f32 %v2409_v35, %v2409_v35 }
 0x117   : > { %v1582_v52 = vmul.f32 %v2615_v30, %v1230_v61  ;;  %2818 = vrcp.f32 %v1838_v33  ;;  %v1807_v31 = vadd.f32 %v1775_v39, %v3223_v51  ;;  %v1168_v49 = vmul.f32 %v1136_v40, %v880_v20  ;;  %v3238_v47 = vpop.f32.mrf.mxu3 }
 0x118   : > { %2438 = vmatmul.msk.f32.gmra.mxu1 %vm1927_vm9, %v1901_v44  ;;  %v1200_v62 = vmul.f32 %v1136_v40, %v784_v56  ;;  %v849_v41 = vmul.f32 %v2345_v32, %v2345_v32  ;;  %v1263_v45 = vmul.f32 %v1103_v29, %v3194_v37  ;;  %v1104_v59 = vmul.f32 %v880_v20, %v784_v56  ;;  %v690_v2 = vpop.f32.mrf.mxu0 }
 0x119   : > { %v1614_v4 = vadd.f32 %v1582_v52, %v1486_v53  ;;  %v1359_v7 = vmul.f32 %v2488_v42, %v1167_v15  ;;  %v1455_v43 = vmul.f32 %v2552_v54, %v1199_v19  ;;  %v753_v24 = vmul.f32 %v687_v9, %v687_v9 }
 0x11a   : > { %v1710_v1 = vmul.f32 %v2679_v57, %v1262_v16  ;;  %v2491_v61 = vunpack.c.l.bf16 %v3230_v63  ;;  %v2555_v3 = vunpack.c.l.bf16 %v3233_v55  ;;  %v977_v6 = vadd.f32 1e-15, %v945_v50 }
 0x11b   : > { %v1073_v48 = vadd.f32 1e-15, %v1041_v58  ;;  %v1839_v5 = vadd.f32 %v1807_v31, %v1263_v45  ;;  %v1776_v0 = vadd.f32 %v1200_v62, %v1168_v49  ;;  %v881_v12 = vadd.f32 1e-15, %v849_v41 }
 0x11c   : > { %v1742_v60 = vadd.f32 %v1710_v1, %v1614_v4  ;;  %v3240_v13 = vmul.f32 %v1104_v59, %v1072_v46  ;;  %v3242_v14 = vmul.f32 %v1104_v59, %v976_v22  ;;  %v2379_v16 = vadd.f32 -0.6666667, %v3198_v34 }
 0x11d   : > { %v2819_v37 = vpop.eup %2818  ;;  %v2378_v17 = vadd.f32 -0.6666667, %v690_v2  ;;  %v785_v15 = vadd.f32 1e-15, %v753_v24  ;;  %v2492_v19 = vunpack.c.h.bf16 %v3230_v63  ;;  %v2556_v10 = vunpack.c.h.bf16 %v3233_v55 }
 0x11e   : > { %v1902_v9 = vmul.f32 %v2819_v37, %v1742_v60  ;;  %v1137_v25 = vmul.f32 %v1073_v48, %v977_v6  ;;  %v2411_v23 = vadd.f32 -1.0, %v3198_v34  ;;  %v2346_v11 = vadd.f32 -0.33333334, %v690_v2 }
 0x11f   : > { %v946_v21 = vmul.f32 %v2378_v17, %v2378_v17  ;;  %v1360_v29 = vmul.f32 %v2491_v61, %v1168_v49  ;;  %v1808_v46 = vadd.f32 %v1776_v0, %v3240_v13  ;;  %v1105_v8 = vmul.f32 %v881_v12, %v785_v15  ;;  %v3262_v52 = vpop.f32.mrf.mxu3  ;;  %v3274_v61 = vld [vmem:[%s3006_s26 + $0x38] sm:$0xff]   ;;  %v2724_v17 = vld [vmem:[%s2996_s17 + $0x40] sm:$0xff]  }
 0x120   : > { %2439 = vmatmul.msk.f32.gmra.mxu1 %vm1927_vm9, %v1902_v9  ;;  %v2410_v22 = vadd.f32 -1.0, %v690_v2  ;;  %v755_v33 = vmul.f32 %v3198_v34, %v3198_v34  ;;  %v2347_v26 = vadd.f32 -0.33333334, %v3198_v34  ;;  %v947_v28 = vmul.f32 %v2379_v16, %v2379_v16  ;;  %v3277_v0 = vld [vmem:[%s3011_s30 + $0x38] sm:$0xff]  }
 0x121   : > { %v754_v35 = vmul.f32 %v690_v2, %v690_v2  ;;  %v3253_v38 = vadd.f32 1e-15, %v946_v21  ;;  %v1487_v40 = vadd.f32 %v1455_v43, %v1359_v7  ;;  %v2616_v32 = vunpack.c.h.bf16 %v3213_v27 }
 0x122   : > { %v1042_v39 = vmul.f32 %v2410_v22, %v2410_v22  ;;  %v1169_v30 = vmul.f32 %v1137_v25, %v881_v12  ;;  %v1043_v42 = vmul.f32 %v2411_v23, %v2411_v23  ;;  %v850_v20 = vmul.f32 %v2346_v11, %v2346_v11 }
 0x123   : > { %v2680_v44 = vunpack.c.h.bf16 %v3218_v36  ;;  %v1201_v53 = vmul.f32 %v1137_v25, %v785_v15  ;;  %v1583_v56 = vmul.f32 %v2616_v32, %v3223_v51  ;;  %2820 = vrcp.f32 %v1839_v5 }
 0x124   : > { %v1074_v54 = vadd.f32 1e-15, %v1042_v39  ;;  %v1456_v57 = vmul.f32 %v2555_v3, %v1200_v62  ;;  %v3258_v34 = vmul.f32 %v1105_v8, %v1073_v48  ;;  %v3260_v50 = vmul.f32 %v1105_v8, %v977_v6 }
 0x125   : > { %v851_v58 = vmul.f32 %v2347_v26, %v2347_v26  ;;  %v3264_v31 = vadd.f32 1e-15, %v947_v28  ;;  %v786_v27 = vadd.f32 1e-15, %v754_v35  ;;  %v1615_v36 = vadd.f32 %v1583_v56, %v1487_v40  ;;  %v3306_v35 = vld [vmem:[%s3006_s26 + $0x40] sm:$0xff]  }
 0x126   : > { %v1138_v49 = vmul.f32 %v1074_v54, %v3253_v38  ;;  %v1075_v63 = vadd.f32 1e-15, %v1043_v42  ;;  %v882_v55 = vadd.f32 1e-15, %v850_v20  ;;  %v1711_v41 = vmul.f32 %v2680_v44, %v1263_v45 }
 0x127   : > { %v2380_v51 = vadd.f32 -0.6666667, %v3215_v18  ;;  %v1840_v62 = vadd.f32 %v1808_v46, %v3242_v14  ;;  %v1777_v59 = vadd.f32 %v1201_v53, %v1169_v30  ;;  %v787_v4 = vadd.f32 1e-15, %v755_v33  ;;  %v3301_v33 = vld [vmem:[%s3001_s20 + $0x40] sm:$0xff]   ;;  %v3308_v40 = vpop.f32.mrf.mxu3 }
 0x128   : > { %v2348_v7 = vadd.f32 -0.33333334, %v3215_v18  ;;  %v1170_v43 = vmul.f32 %v1138_v49, %v882_v55  ;;  %v3270_v24 = vmul.f32 %v1138_v49, %v786_v27  ;;  %v1743_v1 = vadd.f32 %v1711_v41, %v1615_v36 }
 0x129   : > { %v2412_v2 = vadd.f32 -1.0, %v3215_v18  ;;  %v2821_v3 = vpop.eup %2820  ;;  %v1361_v45 = vmul.f32 %v2492_v19, %v1169_v30  ;;  %v1457_v6 = vmul.f32 %v2556_v10, %v1201_v53  ;;  %v883_v48 = vadd.f32 1e-15, %v851_v58 }
 0x12a   : > { %v948_v5 = vmul.f32 %v2380_v51, %v2380_v51  ;;  %v1139_v12 = vmul.f32 %v1075_v63, %v3264_v31  ;;  %v1106_v60 = vmul.f32 %v882_v55, %v786_v27  ;;  %v1903_v37 = vmul.f32 %v2821_v3, %v1743_v1 }
 0x12b   : > { %v1044_v16 = vmul.f32 %v2412_v2, %v2412_v2  ;;  %v756_v15 = vmul.f32 %v3215_v18, %v3215_v18  ;;  %v852_v9 = vmul.f32 %v2348_v7, %v2348_v7  ;;  %v1488_v25 = vadd.f32 %v1456_v57, %v1360_v29 }
 0x12c   : > { %v2619_v19 = vunpack.c.l.bf16 %v3274_v61  ;;  %v1809_v10 = vadd.f32 %v1777_v59, %v3258_v34  ;;  %v1778_v23 = vadd.f32 %v3270_v24, %v1170_v43  ;;  %2440 = vmatmul.msk.f32.gmra.mxu1 %vm1927_vm9, %v1903_v37  ;;  %v2683_v11 = vunpack.c.l.bf16 %v3277_v0 }
 0x12d   : > { %2822 = vrcp.f32 %v1840_v62  ;;  %v1107_v18 = vmul.f32 %v883_v48, %v787_v4  ;;  %v3295_v21 = vadd.f32 1e-15, %v948_v5  ;;  %v1076_v29 = vadd.f32 1e-15, %v1044_v16 }
 0x12e   : > { %v1584_v46 = vmul.f32 %v2619_v19, %v3240_v13  ;;  %v1171_v8 = vmul.f32 %v1139_v12, %v883_v48  ;;  %v3298_v22 = vmul.f32 %v1139_v12, %v787_v4  ;;  %v3303_v26 = vmul.f32 %v1106_v60, %v1074_v54 }
 0x12f   : > { %v2495_v28 = vunpack.c.l.bf16 %v2724_v17  ;;  %v788_v32 = vadd.f32 1e-15, %v756_v15  ;;  %v884_v30 = vadd.f32 1e-15, %v852_v9  ;;  %v1712_v20 = vmul.f32 %v2683_v11, %v3242_v14  ;;  %v3346_v15 = vpop.f32.mrf.mxu3  ;;  %v3352_v9 = vld [vmem:[%s3001_s20 + $0x48] sm:$0xff]  }
 0x130   : > { %v1616_v42 = vadd.f32 %v1584_v46, %v1488_v25  ;;  %v1841_v13 = vadd.f32 %v1809_v10, %v3260_v50  ;;  %v2496_v44 = vunpack.c.h.bf16 %v2724_v17  ;;  %v2560_v53 = vunpack.c.h.bf16 %v3301_v33 }
 0x131   : > { %v1810_v54 = vadd.f32 %v1778_v23, %v3303_v26  ;;  %v2559_v56 = vunpack.c.l.bf16 %v3301_v33  ;;  %v2623_v57 = vunpack.c.l.bf16 %v3306_v35  ;;  %v1140_v58 = vmul.f32 %v1076_v29, %v3295_v21 }
 0x132   : > { %v1744_v27 = vadd.f32 %v1712_v20, %v1616_v42  ;;  %v3318_v36 = vmul.f32 %v1107_v18, %v1075_v63  ;;  %v3321_v14 = vmul.f32 %v1106_v60, %v3253_v38  ;;  %v2381_v55 = vadd.f32 -0.6666667, %v3238_v47 }
 0x133   : > { %v2045_v39 = vpop.f32.mrf.mxu1  ;;  %v2823_v49 = vpop.eup %2822  ;;  %v2413_v41 = vadd.f32 -1.0, %v3238_v47  ;;  %v1779_v51 = vadd.f32 %v3298_v22, %v1171_v8  ;;  %v1362_v62 = vmul.f32 %v2495_v28, %v1170_v43  ;;  %v1108_v59 = vmul.f32 %v884_v30, %v788_v32 }
 0x134   : > { %2141 = vst [vmem:[%s3293_s8] sm:$0xff] %v2045_v39  ;;  %v1904_v4 = vmul.f32 %v2823_v49, %v1744_v27  ;;  %v1842_v7 = vadd.f32 %v1810_v54, %v3321_v14  ;;  %v1489_v1 = vadd.f32 %v1457_v6, %v1361_v45  ;;  %v2620_v2 = vunpack.c.h.bf16 %v3274_v61 }
 0x135   : > { %v2684_v63 = vunpack.c.h.bf16 %v3277_v0  ;;  %v1172_v3 = vmul.f32 %v1140_v58, %v884_v30  ;;  %v1204_v38 = vmul.f32 %v1140_v58, %v788_v32  ;;  %v2349_v48 = vadd.f32 -0.33333334, %v3238_v47 }
 0x136   : > { %2441 = vmatmul.msk.f32.gmra.mxu1 %vm1927_vm9, %v1904_v4  ;;  %2824 = vrcp.f32 %v1841_v13  ;;  %v1458_v5 = vmul.f32 %v2559_v56, %v3270_v24  ;;  %v949_v43 = vmul.f32 %v2381_v55, %v2381_v55  ;;  %v1045_v12 = vmul.f32 %v2413_v41, %v2413_v41 }
 0x137   : > { %v1585_v45 = vmul.f32 %v2620_v2, %v3258_v34  ;;  %v3334_v61 = vmul.f32 %v1107_v18, %v3264_v31  ;;  %v3336_v0 = vmul.f32 %v2496_v44, %v1171_v8  ;;  %v1811_v60 = vadd.f32 %v1779_v51, %v3318_v36  ;;  %v3349_v31 = vld [vmem:[%s2996_s17 + $0x48] sm:$0xff]  }
 0x138   : > { %v757_v37 = vmul.f32 %v3238_v47, %v3238_v47  ;;  %v3342_v24 = vmul.f32 %v1108_v59, %v1076_v29  ;;  %v1713_v17 = vmul.f32 %v2684_v63, %v3260_v50  ;;  %v2382_v34 = vadd.f32 -0.6666667, %v3262_v52  ;;  %v2769_v29 = vld [vmem:[%s3011_s30 + $0x40] sm:$0xff]  }
 0x139   : > { %v1617_v16 = vadd.f32 %v1585_v45, %v1489_v1  ;;  %2826 = vrcp.f32 %v1842_v7  ;;  %v1780_v25 = vadd.f32 %v1204_v38, %v1172_v3  ;;  %v853_v19 = vmul.f32 %v2349_v48, %v2349_v48  ;;  %v3382_v45 = vld [vmem:[%s2996_s17 + $0x50] sm:$0xff]  }
 0x13a   : > { %v2414_v47 = vadd.f32 -1.0, %v3262_v52  ;;  %v981_v10 = vadd.f32 1e-15, %v949_v43  ;;  %v1077_v23 = vadd.f32 1e-15, %v1045_v12  ;;  %v1490_v18 = vadd.f32 %v1458_v5, %v1362_v62  ;;  %v3378_v5 = vpop.f32.mrf.mxu3 }
 0x13b   : > { %v2048_v6 = vpop.f32.mrf.mxu1  ;;  %v1745_v11 = vadd.f32 %v1713_v17, %v1617_v16  ;;  %v1459_v50 = vmul.f32 %v2560_v53, %v3298_v22  ;;  %v1843_v8 = vadd.f32 %v1811_v60, %v3334_v61  ;;  %v1586_v33 = vmul.f32 %v2623_v57, %v3303_v26 }
 0x13c   : > { %2142 = vst [vmem:[%s3293_s8 + $0x8] sm:$0xff] %v2048_v6  ;;  %v2825_v46 = vpop.eup %2824  ;;  %v2350_v28 = vadd.f32 -0.33333334, %v3262_v52  ;;  %v2499_v39 = vunpack.c.l.bf16 %v3349_v31  ;;  %v2563_v32 = vunpack.c.l.bf16 %v3352_v9  ;;  %v950_v42 = vmul.f32 %v2382_v34, %v2382_v34  ;;  %v3390_v34 = vld [vmem:[%s3001_s20 + $0x50] sm:$0xff]  }
 0x13d   : > { %v1905_v30 = vmul.f32 %v2825_v46, %v1745_v11  ;;  %v3363_v20 = vmul.f32 %v1108_v59, %v3295_v21  ;;  %v1046_v13 = vmul.f32 %v2414_v47, %v2414_v47  ;;  %v1618_v44 = vadd.f32 %v1586_v33, %v1490_v18 }
 0x13e   : > { %v2687_v54 = vunpack.c.l.bf16 %v2769_v29  ;;  %v1812_v22 = vadd.f32 %v1780_v25, %v3342_v24  ;;  %v789_v53 = vadd.f32 1e-15, %v757_v37  ;;  %v885_v56 = vadd.f32 1e-15, %v853_v19 }
 0x13f   : > { %v1141_v26 = vmul.f32 %v1077_v23, %v981_v10  ;;  %2442 = vmatmul.msk.f32.gmra.mxu1 %vm1927_vm9, %v1905_v30  ;;  %v2827_v58 = vpop.eup %2826  ;;  %v2500_v27 = vunpack.c.h.bf16 %v3349_v31  ;;  %v758_v49 = vmul.f32 %v3262_v52, %v3262_v52  ;;  %v854_v55 = vmul.f32 %v2350_v28, %v2350_v28 }
 0x140   : > { %v1714_v21 = vmul.f32 %v2687_v54, %v3321_v14  ;;  %v1364_v41 = vmul.f32 %v2499_v39, %v1172_v3  ;;  %v1460_v51 = vmul.f32 %v2563_v32, %v1204_v38  ;;  %v2564_v62 = vunpack.c.h.bf16 %v3352_v9  ;;  %v2770_v32 = vld [vmem:[%s3011_s30 + $0x48] sm:$0xff]  }
 0x141   : > { %v3373_v59 = vadd.f32 1e-15, %v950_v42  ;;  %v1078_v4 = vadd.f32 1e-15, %v1046_v13  ;;  %v2383_v1 = vadd.f32 -0.6666667, %v3308_v40  ;;  %v1844_v63 = vadd.f32 %v1812_v22, %v3363_v20 }
 0x142   : > { %v1746_v7 = vadd.f32 %v1714_v21, %v1618_v44  ;;  %v2415_v2 = vadd.f32 -1.0, %v3308_v40  ;;  %v1109_v52 = vmul.f32 %v885_v56, %v789_v53  ;;  %v1173_v48 = vmul.f32 %v1141_v26, %v885_v56 }
 0x143   : > { %v2051_v57 = vpop.f32.mrf.mxu1  ;;  %v1205_v14 = vmul.f32 %v1141_v26, %v789_v53  ;;  %v790_v3 = vadd.f32 1e-15, %v758_v49  ;;  %v886_v38 = vadd.f32 1e-15, %v854_v55  ;;  %v2351_v12 = vadd.f32 -0.33333334, %v3308_v40  ;;  %v3410_v49 = vpop.f32.mrf.mxu3 }
 0x144   : > { %2143 = vst [vmem:[%s3293_s8 + $0x10] sm:$0xff] %v2051_v57  ;;  %v1906_v43 = vmul.f32 %v2827_v58, %v1746_v7  ;;  %v1491_v6 = vadd.f32 %v1459_v50, %v3336_v0  ;;  %v2624_v60 = vunpack.c.h.bf16 %v3306_v35  ;;  %v2688_v37 = vunpack.c.h.bf16 %v2769_v29 }
 0x145   : > { %2828 = vrcp.f32 %v1843_v8  ;;  %v3386_v16 = vmul.f32 %v1109_v52, %v981_v10  ;;  %v1142_v17 = vmul.f32 %v1078_v4, %v3373_v59  ;;  %v951_v31 = vmul.f32 %v2383_v1, %v2383_v1 }
 0x146   : > { %2443 = vmatmul.msk.f32.vlgmr.msra.gmra.mxu2 %vm1927_vm9, %v1906_v43  ;;  %v1047_v9 = vmul.f32 %v2415_v2, %v2415_v2  ;;  %v3393_v25 = vmul.f32 %v1109_v52, %v1077_v23  ;;  %v1781_v19 = vadd.f32 %v1205_v14, %v1173_v48  ;;  %v1587_v0 = vmul.f32 %v2624_v60, %v3318_v36 }
 0x147   : > { %v1715_v35 = vmul.f32 %v2688_v37, %v3334_v61  ;;  %v1110_v10 = vmul.f32 %v886_v38, %v790_v3  ;;  %v2503_v11 = vunpack.c.l.bf16 %v3382_v45  ;;  %v759_v18 = vmul.f32 %v3308_v40, %v3308_v40  ;;  %v2755_v61 = vld [vmem:[%s3006_s26 + $0x48] sm:$0xff]  }
 0x148   : > { %v855_v29 = vmul.f32 %v2351_v12, %v2351_v12  ;;  %v1365_v46 = vmul.f32 %v2500_v27, %v1173_v48  ;;  %v1461_v50 = vmul.f32 %v2564_v62, %v1205_v14  ;;  %v2567_v23 = vunpack.c.l.bf16 %v3390_v34 }
 0x149   : > { %v1619_v8 = vadd.f32 %v1587_v0, %v1491_v6  ;;  %v1174_v33 = vmul.f32 %v1142_v17, %v886_v38  ;;  %v1206_v36 = vmul.f32 %v1142_v17, %v790_v3  ;;  %v983_v28 = vadd.f32 1e-15, %v951_v31 }
 0x14a   : > { %v1079_v39 = vadd.f32 1e-15, %v1047_v9  ;;  %v1813_v42 = vadd.f32 %v1781_v19, %v3393_v25  ;;  %v2384_v44 = vadd.f32 -0.6666667, %v3346_v15  ;;  %v2416_v40 = vadd.f32 -1.0, %v3346_v15  ;;  %v3432_v19 = vld [vmem:[%s2996_s17 + $0x58] sm:$0xff]  }
 0x14b   : > { %v2054_v47 = vpop.f32.mrf.mxu1  ;;  %v2829_v30 = vpop.eup %2828  ;;  %v1747_v13 = vadd.f32 %v1715_v35, %v1619_v8  ;;  %v3407_v54 = vmul.f32 %v1110_v10, %v1078_v4  ;;  %v791_v22 = vadd.f32 1e-15, %v759_v18  ;;  %v887_v53 = vadd.f32 1e-15, %v855_v29 }
 0x14c   : > { %2144 = vst [vmem:[%s3293_s8 + $0x18] sm:$0xff] %v2054_v47  ;;  %v2352_v56 = vadd.f32 -0.33333334, %v3346_v15  ;;  %v1492_v57 = vadd.f32 %v1460_v51, %v1364_v41  ;;  %v2627_v58 = vunpack.c.l.bf16 %v2755_v61  ;;  %v2691_v27 = vunpack.c.l.bf16 %v2770_v32 }
 0x14d   : > { %v1907_v26 = vmul.f32 %v2829_v30, %v1747_v13  ;;  %v1782_v55 = vadd.f32 %v1206_v36, %v1174_v33  ;;  %v1143_v21 = vmul.f32 %v1079_v39, %v983_v28  ;;  %v760_v62 = vmul.f32 %v3346_v15, %v3346_v15 }
 0x14e   : > { %2830 = vrcp.f32 %v1844_v63  ;;  %v952_v4 = vmul.f32 %v2384_v44, %v2384_v44  ;;  %v1048_v7 = vmul.f32 %v2416_v40, %v2416_v40  ;;  %v1588_v1 = vmul.f32 %v2627_v58, %v3342_v24 }
 0x14f   : > { %2444 = vmatmul.msk.f32.gmra.mxu2 %vm1927_vm9, %v1907_v26  ;;  %v1716_v2 = vmul.f32 %v2691_v27, %v3363_v20  ;;  %v1845_v51 = vadd.f32 %v1813_v42, %v3386_v16  ;;  %v3419_v52 = vmul.f32 %v1110_v10, %v3373_v59  ;;  %v2504_v48 = vunpack.c.h.bf16 %v3382_v45  ;;  %v2756_v27 = vld [vmem:[%s3006_s26 + $0x50] sm:$0xff]  }
 0x150   : > { %v856_v14 = vmul.f32 %v2352_v56, %v2352_v56  ;;  %v3422_v15 = vmul.f32 %v2503_v11, %v1174_v33  ;;  %v1462_v63 = vmul.f32 %v2567_v23, %v1206_v36  ;;  %v2568_v3 = vunpack.c.h.bf16 %v3390_v34  ;;  %v3438_v23 = vld [vmem:[%s3001_s20 + $0x58] sm:$0xff]  }
 0x151   : > { %v1620_v38 = vadd.f32 %v1588_v1, %v1492_v57  ;;  %v1814_v24 = vadd.f32 %v1782_v55, %v3407_v54  ;;  %v1111_v20 = vmul.f32 %v887_v53, %v791_v22  ;;  %v1175_v43 = vmul.f32 %v1143_v21, %v887_v53  ;;  %v2771_v55 = vld [vmem:[%s3011_s30 + $0x50] sm:$0xff]  }
 0x152   : > { %v1207_v12 = vmul.f32 %v1143_v21, %v791_v22  ;;  %v792_v6 = vadd.f32 1e-15, %v760_v62  ;;  %v984_v60 = vadd.f32 1e-15, %v952_v4  ;;  %v1080_v59 = vadd.f32 1e-15, %v1048_v7 }
 0x153   : > { %v2057_v41 = vpop.f32.mrf.mxu1  ;;  %v1748_v37 = vadd.f32 %v1716_v2, %v1620_v38  ;;  %v3427_v17 = vmul.f32 %v1111_v20, %v983_v28  ;;  %v888_v31 = vadd.f32 1e-15, %v856_v14  ;;  %v2385_v9 = vadd.f32 -0.6666667, %v3378_v5 }
 0x154   : > { %2145 = vst [vmem:[%s3293_s8 + $0x20] sm:$0xff] %v2057_v41  ;;  %v2831_v45 = vpop.eup %2830  ;;  %v2417_v34 = vadd.f32 -1.0, %v3378_v5  ;;  %v1493_v35 = vadd.f32 %v1461_v50, %v1365_v46  ;;  %v2628_v47 = vunpack.c.h.bf16 %v2755_v61  ;;  %v2692_v10 = vunpack.c.h.bf16 %v2770_v32 }
 0x155   : > { %v1908_v0 = vmul.f32 %v2831_v45, %v1748_v37  ;;  %v1846_v11 = vadd.f32 %v1814_v24, %v3419_v52  ;;  %v3435_v18 = vmul.f32 %v1111_v20, %v1079_v39  ;;  %v1783_v29 = vadd.f32 %v1207_v12, %v1175_v43  ;;  %v3444_v50 = vpop.f32.mrf.mxu3 }
 0x156   : > { %2832 = vrcp.f32 %v1845_v51  ;;  %v1144_v8 = vmul.f32 %v1080_v59, %v984_v60  ;;  %v2353_v33 = vadd.f32 -0.33333334, %v3378_v5  ;;  %v1589_v36 = vmul.f32 %v2628_v47, %v3393_v25 }
 0x157   : > { %2445 = vmatmul.msk.f32.gmra.mxu2 %vm1927_vm9, %v1908_v0  ;;  %v1717_v46 = vmul.f32 %v2692_v10, %v3386_v16  ;;  %v1112_v28 = vmul.f32 %v888_v31, %v792_v6  ;;  %v2507_v39 = vunpack.c.l.bf16 %v3432_v19  ;;  %v953_v61 = vmul.f32 %v2385_v9, %v2385_v9 }
 0x158   : > { %v1049_v32 = vmul.f32 %v2417_v34, %v2417_v34  ;;  %v2571_v30 = vunpack.c.l.bf16 %v3438_v23  ;;  %v1621_v42 = vadd.f32 %v1589_v36, %v1493_v35  ;;  %v2386_v13 = vadd.f32 -0.6666667, %v3410_v49 }
 0x159   : > { %v2418_v44 = vadd.f32 -1.0, %v3410_v49  ;;  %v1367_v40 = vmul.f32 %v2504_v48, %v1175_v43  ;;  %v1463_v22 = vmul.f32 %v2568_v3, %v1207_v12  ;;  %v1815_v16 = vadd.f32 %v1783_v29, %v3435_v18 }
 0x15a   : > { %v761_v53 = vmul.f32 %v3378_v5, %v3378_v5  ;;  %v1176_v56 = vmul.f32 %v1144_v8, %v888_v31  ;;  %v1208_v26 = vmul.f32 %v1144_v8, %v792_v6  ;;  %v857_v57 = vmul.f32 %v2353_v33, %v2353_v33 }
 0x15b   : > { %v2060_v25 = vpop.f32.mrf.mxu1  ;;  %v1749_v58 = vadd.f32 %v1717_v46, %v1621_v42  ;;  %v3456_v62 = vmul.f32 %v1112_v28, %v1080_v59  ;;  %v3458_v4 = vmul.f32 %v1112_v28, %v984_v60  ;;  %v985_v7 = vadd.f32 1e-15, %v953_v61 }
 0x15c   : > { %2146 = vst [vmem:[%s3293_s8 + $0x28] sm:$0xff] %v2060_v25  ;;  %v2833_v21 = vpop.eup %2832  ;;  %v1081_v1 = vadd.f32 1e-15, %v1049_v32  ;;  %v2354_v41 = vadd.f32 -0.33333334, %v3410_v49  ;;  %v954_v51 = vmul.f32 %v2386_v13, %v2386_v13  ;;  %v1050_v48 = vmul.f32 %v2418_v44, %v2418_v44 }
 0x15d   : > { %v1909_v2 = vmul.f32 %v2833_v21, %v1749_v58  ;;  %v1494_v5 = vadd.f32 %v1462_v63, %v3422_v15  ;;  %v2631_v14 = vunpack.c.l.bf16 %v2756_v27  ;;  %v2695_v3 = vunpack.c.l.bf16 %v2771_v55  ;;  %v3471_v31 = vpop.f32.mrf.mxu3  ;;  %v3494_v58 = vld [vmem:[%s3001_s20 + $0x60] sm:$0xff]  }
 0x15e   : > { %2834 = vrcp.f32 %v1846_v11  ;;  %v1847_v38 = vadd.f32 %v1815_v16, %v3427_v17  ;;  %v1784_v24 = vadd.f32 %v1208_v26, %v1176_v56  ;;  %v793_v20 = vadd.f32 1e-15, %v761_v53 }
 0x15f   : > { %v889_v43 = vadd.f32 1e-15, %v857_v57  ;;  %2446 = vmatmul.msk.f32.gmra.mxu2 %vm1927_vm9, %v1909_v2  ;;  %v1145_v12 = vmul.f32 %v1081_v1, %v985_v7  ;;  %v762_v6 = vmul.f32 %v3410_v49, %v3410_v49  ;;  %v1590_v60 = vmul.f32 %v2631_v14, %v3407_v54  ;;  %v2757_v2 = vld [vmem:[%s3006_s26 + $0x58] sm:$0xff]  }
 0x160   : > { %v1718_v59 = vmul.f32 %v2695_v3, %v3419_v52  ;;  %v2508_v15 = vunpack.c.h.bf16 %v3432_v19  ;;  %v2572_v63 = vunpack.c.h.bf16 %v3438_v23  ;;  %v858_v37 = vmul.f32 %v2354_v41, %v2354_v41  ;;  %v2772_v14 = vld [vmem:[%s3011_s30 + $0x58] sm:$0xff]  }
 0x161   : > { %v2387_v45 = vadd.f32 -0.6666667, %v3444_v50  ;;  %v3473_v9 = vadd.f32 1e-15, %v954_v51  ;;  %v1082_v34 = vadd.f32 1e-15, %v1050_v48  ;;  %v1622_v0 = vadd.f32 %v1590_v60, %v1494_v5 }
 0x162   : > { %v2419_v35 = vadd.f32 -1.0, %v3444_v50  ;;  %v1368_v49 = vmul.f32 %v2507_v39, %v1176_v56  ;;  %v1816_v54 = vadd.f32 %v1784_v24, %v3456_v62  ;;  %v1113_v47 = vmul.f32 %v889_v43, %v793_v20  ;;  %v3489_v56 = vld [vmem:[%s2996_s17 + $0x60] sm:$0xff]  }
 0x163   : > { %v2355_v52 = vadd.f32 -0.33333334, %v3444_v50  ;;  %v1177_v10 = vmul.f32 %v1145_v12, %v889_v43  ;;  %v1209_v11 = vmul.f32 %v1145_v12, %v793_v20  ;;  %v794_v29 = vadd.f32 1e-15, %v762_v6 }
 0x164   : > { %v2835_v19 = vpop.eup %2834  ;;  %v1750_v8 = vadd.f32 %v1718_v59, %v1622_v0  ;;  %v955_v33 = vmul.f32 %v2387_v45, %v2387_v45  ;;  %v1051_v36 = vmul.f32 %v2419_v35, %v2419_v35  ;;  %v1495_v46 = vadd.f32 %v1463_v22, %v1367_v40 }
 0x165   : > { %v2632_v28 = vunpack.c.h.bf16 %v2756_v27  ;;  %v890_v32 = vadd.f32 1e-15, %v858_v37  ;;  %v1146_v39 = vmul.f32 %v1082_v34, %v3473_v9  ;;  %v2696_v13 = vunpack.c.h.bf16 %v2771_v55 }
 0x166   : > { %v2063_v61 = vpop.f32.mrf.mxu1  ;;  %v1910_v42 = vmul.f32 %v2835_v19, %v1750_v8  ;;  %v763_v44 = vmul.f32 %v3444_v50, %v3444_v50  ;;  %v859_v25 = vmul.f32 %v2355_v52, %v2355_v52  ;;  %2836 = vrcp.f32 %v1847_v38 }
 0x167   : > { %2147 = vst [vmem:[%s3293_s8 + $0x30] sm:$0xff] %v2063_v61  ;;  %v1591_v16 = vmul.f32 %v2632_v28, %v3435_v18  ;;  %v1464_v40 = vmul.f32 %v2571_v30, %v1208_v26  ;;  %v1848_v22 = vadd.f32 %v1816_v54, %v3458_v4  ;;  %v3486_v53 = vmul.f32 %v1113_v47, %v1081_v1 }
 0x168   : > { %2447 = vmatmul.msk.f32.gmra.mxu2 %vm1927_vm9, %v1910_v42  ;;  %v1719_v57 = vmul.f32 %v2696_v13, %v3427_v17  ;;  %v1785_v50 = vadd.f32 %v1209_v11, %v1177_v10  ;;  %v3496_v18 = vadd.f32 1e-15, %v955_v33  ;;  %v1083_v27 = vadd.f32 1e-15, %v1051_v36  ;;  %v3503_v17 = vpop.f32.mrf.mxu3 }
 0x169   : > { %v1623_v55 = vadd.f32 %v1591_v16, %v1495_v46  ;;  %v3498_v21 = vmul.f32 %v1113_v47, %v985_v7  ;;  %v1114_v30 = vmul.f32 %v890_v32, %v794_v29  ;;  %v1178_v26 = vmul.f32 %v1146_v39, %v890_v32 }
 0x16a   : > { %v1210_v1 = vmul.f32 %v1146_v39, %v794_v29  ;;  %v2511_v41 = vunpack.c.l.bf16 %v3489_v56  ;;  %v795_v51 = vadd.f32 1e-15, %v763_v44  ;;  %v891_v48 = vadd.f32 1e-15, %v859_v25 }
 0x16b   : > { %v1751_v5 = vadd.f32 %v1719_v57, %v1623_v55  ;;  %v1369_v3 = vmul.f32 %v2508_v15, %v1177_v10  ;;  %v2575_v38 = vunpack.c.l.bf16 %v3494_v58  ;;  %v2388_v24 = vadd.f32 -0.6666667, %v3471_v31 }
 0x16c   : > { %v2420_v7 = vadd.f32 -1.0, %v3471_v31  ;;  %v2837_v20 = vpop.eup %2836  ;;  %v1817_v43 = vadd.f32 %v1785_v50, %v3486_v53  ;;  %v1147_v12 = vmul.f32 %v1083_v27, %v3496_v18  ;;  %v1496_v6 = vadd.f32 %v1464_v40, %v1368_v49 }
 0x16d   : > { %v2635_v60 = vunpack.c.l.bf16 %v2757_v2  ;;  %v3510_v59 = vmul.f32 %v1114_v30, %v1082_v34  ;;  %v1786_v37 = vadd.f32 %v1210_v1, %v1178_v26  ;;  %v1911_v45 = vmul.f32 %v2837_v20, %v1751_v5 }
 0x16e   : > { %v2699_v0 = vunpack.c.l.bf16 %v2772_v14  ;;  %v1115_v15 = vmul.f32 %v891_v48, %v795_v51  ;;  %v2356_v35 = vadd.f32 -0.33333334, %v3471_v31  ;;  %2838 = vrcp.f32 %v1848_v22 }
 0x16f   : > { %v1592_v54 = vmul.f32 %v2635_v60, %v3456_v62  ;;  %v956_v52 = vmul.f32 %v2388_v24, %v2388_v24  ;;  %v1052_v19 = vmul.f32 %v2420_v7, %v2420_v7  ;;  %v1465_v34 = vmul.f32 %v2572_v63, %v1209_v11 }
 0x170   : > { %v2066_v47 = vpop.f32.mrf.mxu1  ;;  %2448 = vmatmul.msk.f32.gmra.mxu2 %vm1927_vm9, %v1911_v45  ;;  %v1720_v10 = vmul.f32 %v2699_v0, %v3458_v4  ;;  %v1179_v49 = vmul.f32 %v1147_v12, %v891_v48  ;;  %v1211_v29 = vmul.f32 %v1147_v12, %v795_v51  ;;  %v1849_v33 = vadd.f32 %v1817_v43, %v3498_v21  ;;  %v2773_v45 = vld [vmem:[%s3011_s30 + $0x60] sm:$0xff]  }
 0x171   : > { %2148 = vst [vmem:[%s3293_s8 + $0x38] sm:$0xff] %v2066_v47  ;;  %v1624_v8 = vadd.f32 %v1592_v54, %v1496_v6  ;;  %v3521_v36 = vmul.f32 %v1114_v30, %v3473_v9  ;;  %v1370_v62 = vmul.f32 %v2511_v41, %v1178_v26  ;;  %v2512_v46 = vunpack.c.h.bf16 %v3489_v56  ;;  %v726_v16 = vpop.f32.mrf.mxu3 }
 0x172   : > { %v1466_v28 = vmul.f32 %v2575_v38, %v1210_v1  ;;  %v764_v61 = vmul.f32 %v3471_v31, %v3471_v31  ;;  %v860_v4 = vmul.f32 %v2356_v35, %v2356_v35  ;;  %v1818_v23 = vadd.f32 %v1786_v37, %v3510_v59  ;;  %v3541_v1 = vld [vmem:[%s3001_s20 + $0x68] sm:$0xff]   ;;  %v2758_v37 = vld [vmem:[%s3006_s26 + $0x60] sm:$0xff]  }
 0x173   : > { %v1752_v32 = vadd.f32 %v1720_v10, %v1624_v8  ;;  %v3527_v63 = vmul.f32 %v1115_v15, %v1083_v27  ;;  %v3529_v11 = vadd.f32 1e-15, %v956_v52  ;;  %v1084_v39 = vadd.f32 1e-15, %v1052_v19  ;;  %v3535_v27 = vld [vmem:[%s2996_s17 + $0x68] sm:$0xff]  }
 0x174   : > { %v2839_v42 = vpop.eup %2838  ;;  %v1787_v9 = vadd.f32 %v1211_v29, %v1179_v49  ;;  %v2389_v13 = vadd.f32 -0.6666667, %v3503_v17  ;;  %v1497_v44 = vadd.f32 %v1465_v34, %v1369_v3  ;;  %v2636_v25 = vunpack.c.h.bf16 %v2757_v2 }
 0x175   : > { %v2576_v31 = vunpack.c.h.bf16 %v3494_v58  ;;  %v1912_v40 = vmul.f32 %v2839_v42, %v1752_v32  ;;  %v2421_v22 = vadd.f32 -1.0, %v3503_v17  ;;  %v2700_v56 = vunpack.c.h.bf16 %v2772_v14 }
 0x176   : > { %v796_v57 = vadd.f32 1e-15, %v764_v61  ;;  %v892_v50 = vadd.f32 1e-15, %v860_v4  ;;  %v1593_v55 = vmul.f32 %v2636_v25, %v3486_v53  ;;  %2840 = vrcp.f32 %v1849_v33 }
 0x177   : > { %v1850_v30 = vadd.f32 %v1818_v23, %v3521_v36  ;;  %v1148_v26 = vmul.f32 %v1084_v39, %v3529_v11  ;;  %v2357_v58 = vadd.f32 -0.33333334, %v3503_v17  ;;  %v1721_v2 = vmul.f32 %v2700_v56, %v3498_v21 }
 0x178   : > { %2449 = vmatmul.msk.f32.gmra.mxu2 %vm1927_vm9, %v1912_v40  ;;  %v3547_v41 = vmul.f32 %v1115_v15, %v3496_v18  ;;  %v1819_v51 = vadd.f32 %v1787_v9, %v3527_v63  ;;  %v957_v53 = vmul.f32 %v2389_v13, %v2389_v13  ;;  %v1625_v48 = vadd.f32 %v1593_v55, %v1497_v44 }
 0x179   : > { %v2515_v5 = vunpack.c.l.bf16 %v3535_v27  ;;  %v1053_v14 = vmul.f32 %v2421_v22, %v2421_v22  ;;  %v2390_v3 = vadd.f32 -0.6666667, %v726_v16  ;;  %v2422_v38 = vadd.f32 -1.0, %v726_v16 }
 0x17a   : > { %v1371_v7 = vmul.f32 %v2512_v46, %v1179_v49  ;;  %v1116_v20 = vmul.f32 %v892_v50, %v796_v57  ;;  %v2579_v43 = vunpack.c.l.bf16 %v3541_v1  ;;  %v1753_v21 = vadd.f32 %v1721_v2, %v1625_v48  ;;  %v729_v46 = vpop.f32.mrf.mxu3 }
 0x17b   : > { %v2069_v24 = vpop.f32.mrf.mxu1  ;;  %v1180_v18 = vmul.f32 %v1148_v26, %v892_v50  ;;  %v1212_v12 = vmul.f32 %v1148_v26, %v796_v57  ;;  %v765_v6 = vmul.f32 %v3503_v17, %v3503_v17  ;;  %v861_v60 = vmul.f32 %v2357_v58, %v2357_v58 }
 0x17c   : > { %2149 = vst [vmem:[%s3293_s8 + $0x40] sm:$0xff] %v2069_v24  ;;  %v2841_v0 = vpop.eup %2840  ;;  %v1467_v15 = vmul.f32 %v2576_v31, %v1211_v29  ;;  %v1851_v35 = vadd.f32 %v1819_v51, %v3547_v41  ;;  %v3558_v54 = vadd.f32 1e-15, %v957_v53  ;;  %v2358_v47 = vadd.f32 -0.33333334, %v726_v16 }
 0x17d   : > { %v1085_v52 = vadd.f32 1e-15, %v1053_v14  ;;  %v1913_v19 = vmul.f32 %v2841_v0, %v1753_v21  ;;  %v958_v10 = vmul.f32 %v2390_v3, %v2390_v3  ;;  %v1054_v34 = vmul.f32 %v2422_v38, %v2422_v38  ;;  %v3577_v3 = vld [vmem:[%s2996_s17 + $0x70] sm:$0xff]  }
 0x17e   : > { %v1498_v49 = vadd.f32 %v1466_v28, %v1370_v62  ;;  %v2639_v8 = vunpack.c.l.bf16 %v2758_v37  ;;  %v2703_v33 = vunpack.c.l.bf16 %v2773_v45  ;;  %2842 = vrcp.f32 %v1850_v30 }
 0x17f   : > { %v3560_v17 = vmul.f32 %v1116_v20, %v1084_v39  ;;  %v1788_v61 = vadd.f32 %v1212_v12, %v1180_v18  ;;  %v797_v4 = vadd.f32 1e-15, %v765_v6  ;;  %v893_v32 = vadd.f32 1e-15, %v861_v60 }
 0x180   : > { %2450 = vmatmul.msk.f32.gmra.mxu2 %vm1927_vm9, %v1913_v19  ;;  %v766_v29 = vmul.f32 %v726_v16, %v726_v16  ;;  %v862_v23 = vmul.f32 %v2358_v47, %v2358_v47  ;;  %v1594_v42 = vmul.f32 %v2639_v8, %v3510_v59  ;;  %v1722_v9 = vmul.f32 %v2703_v33, %v3521_v36  ;;  %v3593_v19 = vld [vmem:[%s3006_s26 + $0x68] sm:$0xff]  }
 0x181   : > { %v3566_v62 = vmul.f32 %v1116_v20, %v3529_v11  ;;  %v2516_v28 = vunpack.c.h.bf16 %v3535_v27  ;;  %v3569_v13 = vadd.f32 1e-15, %v958_v10  ;;  %v1086_v39 = vadd.f32 1e-15, %v1054_v34  ;;  %v3597_v33 = vld [vmem:[%s3011_s30 + $0x68] sm:$0xff]  }
 0x182   : > { %v1372_v44 = vmul.f32 %v2515_v5, %v1180_v18  ;;  %v1149_v25 = vmul.f32 %v1085_v52, %v3558_v54  ;;  %v2580_v31 = vunpack.c.h.bf16 %v3541_v1  ;;  %v1626_v16 = vadd.f32 %v1594_v42, %v1498_v49  ;;  %v3582_v18 = vld [vmem:[%s3001_s20 + $0x70] sm:$0xff]  }
 0x183   : > { %v1468_v22 = vmul.f32 %v2579_v43, %v1212_v12  ;;  %v1820_v59 = vadd.f32 %v1788_v61, %v3560_v17  ;;  %v2391_v56 = vadd.f32 -0.6666667, %v729_v46  ;;  %v2423_v36 = vadd.f32 -1.0, %v729_v46 }
 0x184   : > { %v2072_v40 = vpop.f32.mrf.mxu1  ;;  %v2843_v11 = vpop.eup %2842  ;;  %v1117_v57 = vmul.f32 %v893_v32, %v797_v4  ;;  %v798_v50 = vadd.f32 1e-15, %v766_v29  ;;  %v894_v55 = vadd.f32 1e-15, %v862_v23  ;;  %v1754_v30 = vadd.f32 %v1722_v9, %v1626_v16 }
 0x185   : > { %2150 = vst [vmem:[%s3293_s8 + $0x48] sm:$0xff] %v2072_v40  ;;  %v1150_v26 = vmul.f32 %v1086_v39, %v3569_v13  ;;  %v2359_v58 = vadd.f32 -0.33333334, %v729_v46  ;;  %v1499_v2 = vadd.f32 %v1467_v15, %v1371_v7  ;;  %v2640_v51 = vunpack.c.h.bf16 %v2758_v37  ;;  %v732_v6 = vpop.f32.mrf.mxu3 }
 0x186   : > { %v1181_v53 = vmul.f32 %v1149_v25, %v893_v32  ;;  %v1213_v48 = vmul.f32 %v1149_v25, %v797_v4  ;;  %v1914_v5 = vmul.f32 %v2843_v11, %v1754_v30  ;;  %v2704_v14 = vunpack.c.h.bf16 %v2773_v45 }
 0x187   : > { %v959_v38 = vmul.f32 %v2391_v56, %v2391_v56  ;;  %v1055_v24 = vmul.f32 %v2423_v36, %v2423_v36  ;;  %v1595_v20 = vmul.f32 %v2640_v51, %v3527_v63  ;;  %2844 = vrcp.f32 %v1851_v35 }
 0x188   : > { %v1852_v43 = vadd.f32 %v1820_v59, %v3566_v62  ;;  %v1118_v21 = vmul.f32 %v894_v55, %v798_v50  ;;  %2451 = vmatmul.msk.f32.gmra.mxu2 %vm1927_vm9, %v1914_v5  ;;  %v767_v7 = vmul.f32 %v729_v46, %v729_v46  ;;  %v1723_v12 = vmul.f32 %v2704_v14, %v3547_v41 }
 0x189   : > { %v1182_v60 = vmul.f32 %v1150_v26, %v894_v55  ;;  %v1214_v37 = vmul.f32 %v1150_v26, %v798_v50  ;;  %v863_v45 = vmul.f32 %v2359_v58, %v2359_v58  ;;  %v1627_v0 = vadd.f32 %v1595_v20, %v1499_v2 }
 0x18a   : > { %v3586_v63 = vmul.f32 %v1117_v57, %v1085_v52  ;;  %v3589_v15 = vmul.f32 %v1117_v57, %v3558_v54  ;;  %v1789_v35 = vadd.f32 %v1213_v48, %v1181_v53  ;;  %v2519_v47 = vunpack.c.l.bf16 %v3577_v3 }
 0x18b   : > { %v2583_v10 = vunpack.c.l.bf16 %v3582_v18  ;;  %v991_v41 = vadd.f32 1e-15, %v959_v38  ;;  %v1087_v34 = vadd.f32 1e-15, %v1055_v24  ;;  %v1755_v49 = vadd.f32 %v1723_v12, %v1627_v0 }
 0x18c   : > { %v3599_v46 = vmul.f32 %v1118_v21, %v1086_v39  ;;  %v799_v52 = vadd.f32 1e-15, %v767_v7  ;;  %v2392_v61 = vadd.f32 -0.6666667, %v732_v6  ;;  %v2424_v4 = vadd.f32 -1.0, %v732_v6 }
 0x18d   : > { %v2075_v8 = vpop.f32.mrf.mxu1  ;;  %v2845_v54 = vpop.eup %2844  ;;  %v1790_v32 = vadd.f32 %v1214_v37, %v1182_v60  ;;  %v895_v29 = vadd.f32 1e-15, %v863_v45  ;;  %v1500_v23 = vadd.f32 %v1468_v22, %v1372_v44  ;;  %v2643_v42 = vunpack.c.l.bf16 %v3593_v19  ;;  %v2775_v45 = vld [vmem:[%s3011_s30 + $0x70] sm:$0xff]  }
 0x18e   : > { %2151 = vst [vmem:[%s3293_s8 + $0x50] sm:$0xff] %v2075_v8  ;;  %v1373_v9 = vmul.f32 %v2516_v28, %v1181_v53  ;;  %v1821_v25 = vadd.f32 %v1789_v35, %v3586_v63  ;;  %v1915_v16 = vmul.f32 %v2845_v54, %v1755_v49  ;;  %v2707_v40 = vunpack.c.l.bf16 %v3597_v33 }
 0x18f   : > { %v1151_v39 = vmul.f32 %v1087_v34, %v991_v41  ;;  %v2360_v59 = vadd.f32 -0.33333334, %v732_v6  ;;  %v1596_v56 = vmul.f32 %v2643_v42, %v3560_v17  ;;  %2846 = vrcp.f32 %v1852_v43  ;;  %v735_v30 = vpop.f32.mrf.mxu3  ;;  %v2760_v43 = vld [vmem:[%s3006_s26 + $0x70] sm:$0xff]   ;;  %v2731_v42 = vld [vmem:[%s2996_s17 + $0x78] sm:$0xff]  }
 0x190   : > { %v1469_v36 = vmul.f32 %v2580_v31, %v1213_v48  ;;  %2452 = vmatmul.msk.f32.gmra.mxu2 %vm1927_vm9, %v1915_v16  ;;  %v960_v44 = vmul.f32 %v2392_v61, %v2392_v61  ;;  %v1056_v22 = vmul.f32 %v2424_v4, %v2424_v4  ;;  %v1724_v27 = vmul.f32 %v2707_v40, %v3566_v62 }
 0x191   : > { %v3613_v28 = vmul.f32 %v1118_v21, %v3569_v13  ;;  %v1822_v11 = vadd.f32 %v1790_v32, %v3599_v46  ;;  %v1119_v57 = vmul.f32 %v895_v29, %v799_v52  ;;  %v1628_v50 = vadd.f32 %v1596_v56, %v1500_v23 }
 0x192   : > { %v1853_v17 = vadd.f32 %v1821_v25, %v3589_v15  ;;  %v1374_v55 = vmul.f32 %v2519_v47, %v1182_v60  ;;  %v2520_v1 = vunpack.c.h.bf16 %v3577_v3  ;;  %v768_v31 = vmul.f32 %v732_v6, %v732_v6 }
 0x193   : > { %v1183_v26 = vmul.f32 %v1151_v39, %v895_v29  ;;  %v1215_v58 = vmul.f32 %v1151_v39, %v799_v52  ;;  %v864_v2 = vmul.f32 %v2360_v59, %v2360_v59  ;;  %v1756_v62 = vadd.f32 %v1724_v27, %v1628_v50  ;;  %v2746_v39 = vld [vmem:[%s3001_s20 + $0x78] sm:$0xff]  }
 0x194   : > { %v1470_v13 = vmul.f32 %v2583_v10, %v1214_v37  ;;  %v2584_v53 = vunpack.c.h.bf16 %v3582_v18  ;;  %v3619_v48 = vadd.f32 1e-15, %v960_v44  ;;  %v1088_v5 = vadd.f32 1e-15, %v1056_v22 }
 0x195   : > { %v2078_v51 = vpop.f32.mrf.mxu1  ;;  %v2847_v14 = vpop.eup %2846  ;;  %v1854_v38 = vadd.f32 %v1822_v11, %v3613_v28  ;;  %v1247_v3 = vmul.f32 %v1119_v57, %v1087_v34  ;;  %v2393_v24 = vadd.f32 -0.6666667, %v735_v30  ;;  %v2425_v20 = vadd.f32 -1.0, %v735_v30 }
 0x196   : > { %2152 = vst [vmem:[%s3293_s8 + $0x58] sm:$0xff] %v2078_v51  ;;  %v800_v21 = vadd.f32 1e-15, %v768_v31  ;;  %v1916_v7 = vmul.f32 %v2847_v14, %v1756_v62  ;;  %v1501_v12 = vadd.f32 %v1469_v36, %v1373_v9  ;;  %v2644_v6 = vunpack.c.h.bf16 %v3593_v19  ;;  %v2761_v51 = vld [vmem:[%s3006_s26 + $0x78] sm:$0xff]  }
 0x197   : > { %v1791_v60 = vadd.f32 %v1215_v58, %v1183_v26  ;;  %v896_v37 = vadd.f32 1e-15, %v864_v2  ;;  %v2708_v18 = vunpack.c.h.bf16 %v3597_v33  ;;  %2848 = vrcp.f32 %v1853_v17 }
 0x198   : > { %v1279_v0 = vmul.f32 %v1119_v57, %v991_v41  ;;  %v1152_v35 = vmul.f32 %v1088_v5, %v3619_v48  ;;  %2453 = vmatmul.msk.f32.gmra.mxu2 %vm1927_vm9, %v1916_v7  ;;  %v1597_v47 = vmul.f32 %v2644_v6, %v3586_v63  ;;  %v2647_v10 = vunpack.c.l.bf16 %v2760_v43 }
 0x199   : > { %v2361_v34 = vadd.f32 -0.33333334, %v735_v30  ;;  %v961_v49 = vmul.f32 %v2393_v24, %v2393_v24  ;;  %v1057_v8 = vmul.f32 %v2425_v20, %v2425_v20  ;;  %v1725_v19 = vmul.f32 %v2708_v18, %v3589_v15 }
 0x19a   : > { %v1629_v52 = vadd.f32 %v1597_v47, %v1501_v12  ;;  %v1502_v61 = vadd.f32 %v1470_v13, %v1374_v55  ;;  %v1598_v33 = vmul.f32 %v2647_v10, %v3599_v46  ;;  %v2711_v4 = vunpack.c.l.bf16 %v2775_v45  ;;  %v2776_v12 = vld [vmem:[%s3011_s30 + $0x78] sm:$0xff]  }
 0x19b   : > { %v1375_v41 = vmul.f32 %v2520_v1, %v1183_v26  ;;  %v1471_v54 = vmul.f32 %v2584_v53, %v1215_v58  ;;  %v1823_v32 = vadd.f32 %v1791_v60, %v1247_v3  ;;  %v1120_v29 = vmul.f32 %v896_v37, %v800_v21 }
 0x19c   : > { %v1184_v23 = vmul.f32 %v1152_v35, %v896_v37  ;;  %v1216_v63 = vmul.f32 %v1152_v35, %v800_v21  ;;  %v769_v9 = vmul.f32 %v735_v30, %v735_v30  ;;  %v1757_v25 = vadd.f32 %v1725_v19, %v1629_v52 }
 0x19d   : > { %v2081_v16 = vpop.f32.mrf.mxu1  ;;  %v2849_v40 = vpop.eup %2848  ;;  %v865_v15 = vmul.f32 %v2361_v34, %v2361_v34  ;;  %v993_v59 = vadd.f32 1e-15, %v961_v49  ;;  %v1089_v56 = vadd.f32 1e-15, %v1057_v8  ;;  %2850 = vrcp.f32 %v1854_v38 }
 0x19e   : > { %2153 = vst [vmem:[%s3293_s8 + $0x60] sm:$0xff] %v2081_v16  ;;  %v1917_v46 = vmul.f32 %v2849_v40, %v1757_v25  ;;  %v1630_v36 = vadd.f32 %v1598_v33, %v1502_v61  ;;  %v1726_v44 = vmul.f32 %v2711_v4, %v3613_v28  ;;  %v2648_v22 = vunpack.c.h.bf16 %v2760_v43 }
 0x19f   : > { %v1248_v27 = vmul.f32 %v1120_v29, %v1088_v5  ;;  %v2523_v11 = vunpack.c.l.bf16 %v2731_v42  ;;  %v2587_v57 = vunpack.c.l.bf16 %v2746_v39  ;;  %v1792_v50 = vadd.f32 %v1216_v63, %v1184_v23 }
 0x1a0   : > { %2454 = vmatmul.msk.f32.gmra.mxu2 %vm1927_vm9, %v1917_v46  ;;  %v1855_v17 = vadd.f32 %v1823_v32, %v1279_v0  ;;  %v801_v55 = vadd.f32 1e-15, %v769_v9  ;;  %v897_v1 = vadd.f32 1e-15, %v865_v15  ;;  %v1153_v31 = vmul.f32 %v1089_v56, %v993_v59 }
 0x1a1   : > { %v1758_v30 = vadd.f32 %v1726_v44, %v1630_v36  ;;  %v1503_v26 = vadd.f32 %v1471_v54, %v1375_v41  ;;  %v1599_v58 = vmul.f32 %v2648_v22, %v1247_v3  ;;  %v2712_v2 = vunpack.c.h.bf16 %v2775_v45 }
 0x1a2   : > { %v1280_v28 = vmul.f32 %v1120_v29, %v3619_v48  ;;  %v1376_v13 = vmul.f32 %v2523_v11, %v1184_v23  ;;  %v1472_v53 = vmul.f32 %v2587_v57, %v1216_v63  ;;  %v1824_v5 = vadd.f32 %v1792_v50, %v1248_v27 }
 0x1a3   : > { %v2851_v62 = vpop.eup %2850  ;;  %v1121_v14 = vmul.f32 %v897_v1, %v801_v55  ;;  %v1185_v38 = vmul.f32 %v1153_v31, %v897_v1  ;;  %v1217_v24 = vmul.f32 %v1153_v31, %v801_v55  ;;  %2852 = vrcp.f32 %v1855_v17 }
 0x1a4   : > { %v1918_v20 = vmul.f32 %v2851_v62, %v1758_v30  ;;  %v1631_v43 = vadd.f32 %v1599_v58, %v1503_v26  ;;  %v1727_v21 = vmul.f32 %v2712_v2, %v1279_v0  ;;  %v2651_v7 = vunpack.c.l.bf16 %v2761_v51 }
 0x1a5   : > { %v2524_v3 = vunpack.c.h.bf16 %v2731_v42  ;;  %v1856_v6 = vadd.f32 %v1824_v5, %v1280_v28  ;;  %v1249_v60 = vmul.f32 %v1121_v14, %v1089_v56  ;;  %v2588_v37 = vunpack.c.h.bf16 %v2746_v39 }
 0x1a6   : > { %v1793_v48 = vadd.f32 %v1217_v24, %v1185_v38  ;;  %v1759_v45 = vadd.f32 %v1727_v21, %v1631_v43  ;;  %v1504_v35 = vadd.f32 %v1472_v53, %v1376_v13  ;;  %v1600_v47 = vmul.f32 %v2651_v7, %v1248_v27 }
 0x1a7   : > { %v2715_v10 = vunpack.c.l.bf16 %v2776_v12  ;;  %v2652_v49 = vunpack.c.h.bf16 %v2761_v51  ;;  %v1281_v8 = vmul.f32 %v1121_v14, %v993_v59  ;;  %v1377_v0 = vmul.f32 %v2524_v3, %v1185_v38 }
 0x1a8   : > { %2455 = vmatmul.msk.f32.gmra.mxu2 %vm1927_vm9, %v1918_v20  ;;  %v1825_v19 = vadd.f32 %v1793_v48, %v1249_v60  ;;  %2854 = vrcp.f32 %v1856_v6  ;;  %v1473_v52 = vmul.f32 %v2588_v37, %v1217_v24  ;;  %v1632_v33 = vadd.f32 %v1600_v47, %v1504_v35 }
 0x1a9   : > { %v2084_v18 = vpop.f32.mrf.mxu1  ;;  %v2853_v34 = vpop.eup %2852  ;;  %v1728_v4 = vmul.f32 %v2715_v10, %v1280_v28  ;;  %v1601_v54 = vmul.f32 %v2652_v49, %v1249_v60  ;;  %v2716_v63 = vunpack.c.h.bf16 %v2776_v12 }
 0x1aa   : > { %2154 = vst [vmem:[%s3293_s8 + $0x68] sm:$0xff] %v2084_v18  ;;  %v1919_v61 = vmul.f32 %v2853_v34, %v1759_v45  ;;  %v1857_v41 = vadd.f32 %v1825_v19, %v1281_v8  ;;  %v1505_v23 = vadd.f32 %v1473_v52, %v1377_v0 }
 0x1ab   : > { %v1760_v29 = vadd.f32 %v1728_v4, %v1632_v33  ;;  %v1729_v16 = vmul.f32 %v2716_v63, %v1281_v8 }
 0x1ac   : > { %2856 = vrcp.f32 %v1857_v41  ;;  %v1633_v25 = vadd.f32 %v1601_v54, %v1505_v23 }
 0x1ae   : > { %v2855_v42 = vpop.eup %2854  ;;  %v1761_v40 = vadd.f32 %v1729_v16, %v1633_v25 }
 0x1af   : > { %v1920_v9 = vmul.f32 %v2855_v42, %v1760_v29 }
 0x1b0   : > { %2456 = vmatmul.msk.f32.gmra.mxu2 %vm1927_vm9, %v1919_v61 }
 0x1b2   : > { %v2857_v39 = vpop.eup %2856 }
 0x1b3   : > { %v2087_v32 = vpop.f32.mrf.mxu1  ;;  %v1921_v59 = vmul.f32 %v2857_v39, %v1761_v40 }
 0x1b4   : > { %2155 = vst [vmem:[%s3293_s8 + $0x70] sm:$0xff] %v2087_v32 }
 0x1b8   : > { %2457 = vmatmul.msk.f32.gmra.mxu2 %vm1927_vm9, %v1920_v9 }
 0x1bc   : > { %v2090_v15 = vpop.f32.mrf.mxu1 }
 0x1bd   : > { %2156 = vst [vmem:[%s3293_s8 + $0x78] sm:$0xff] %v2090_v15 }
 0x1c0   : > { %2458 = vmatmul.msk.f32.gmra.mxu2 %vm1927_vm9, %v1921_v59 }
 0x1c9   : > { %v2093_v56 = vpop.f32.mrf.mxu2 }
 0x1ca   : > { %2157 = vst [vmem:[%s3293_s8 + $0x80] sm:$0xff] %v2093_v56 }
 0x1d2   : > { %v2096_v46 = vpop.f32.mrf.mxu2 }
 0x1d3   : > { %2158 = vst [vmem:[%s3293_s8 + $0x88] sm:$0xff] %v2096_v46 }
 0x1da   : > { %v2099_v36 = vpop.f32.mrf.mxu2 }
 0x1db   : > { %2159 = vst [vmem:[%s3293_s8 + $0x90] sm:$0xff] %v2099_v36 }
 0x1e2   : > { %v2102_v44 = vpop.f32.mrf.mxu2 }
 0x1e3   : > { %2160 = vst [vmem:[%s3293_s8 + $0x98] sm:$0xff] %v2102_v44 }
 0x1eb   : > { %v2105_v22 = vpop.f32.mrf.mxu2 }
 0x1ec   : > { %2161 = vst [vmem:[%s3293_s8 + $0xa0] sm:$0xff] %v2105_v22 }
 0x1f3   : > { %v2108_v27 = vpop.f32.mrf.mxu2 }
 0x1f4   : > { %2162 = vst [vmem:[%s3293_s8 + $0xa8] sm:$0xff] %v2108_v27 }
 0x1fb   : > { %v2111_v11 = vpop.f32.mrf.mxu2 }
 0x1fc   : > { %2163 = vst [vmem:[%s3293_s8 + $0xb0] sm:$0xff] %v2111_v11 }
 0x203   : > { %v2114_v57 = vpop.f32.mrf.mxu2 }
 0x204   : > { %2164 = vst [vmem:[%s3293_s8 + $0xb8] sm:$0xff] %v2114_v57 }
 0x20b   : > { %v2117_v50 = vpop.f32.mrf.mxu2 }
 0x20c   : > { %2165 = vst [vmem:[%s3293_s8 + $0xc0] sm:$0xff] %v2117_v50 }
 0x213   : > { %v2120_v17 = vpop.f32.mrf.mxu2 }
 0x214   : > { %2166 = vst [vmem:[%s3293_s8 + $0xc8] sm:$0xff] %v2120_v17 }
 0x21b   : > { %v2123_v55 = vpop.f32.mrf.mxu2 }
 0x21c   : > { %2167 = vst [vmem:[%s3293_s8 + $0xd0] sm:$0xff] %v2123_v55 }
 0x223   : > { %v2126_v1 = vpop.f32.mrf.mxu2 }
 0x224   : > { %2168 = vst [vmem:[%s3293_s8 + $0xd8] sm:$0xff] %v2126_v1 }
 0x22b   : > { %v2129_v31 = vpop.f32.mrf.mxu2 }
 0x22c   : > { %2169 = vst [vmem:[%s3293_s8 + $0xe0] sm:$0xff] %v2129_v31 }
 0x233   : > { %v2132_v30 = vpop.f32.mrf.mxu2 }
 0x234   : > { %2170 = vst [vmem:[%s3293_s8 + $0xe8] sm:$0xff] %v2132_v30 }
 0x23b   : > { %v2135_v26 = vpop.f32.mrf.mxu2 }
 0x23c   : > { %2171 = vst [vmem:[%s3293_s8 + $0xf0] sm:$0xff] %v2135_v26 }
 0x243   : > { %v2138_v58 = vpop.f32.mrf.mxu2 }
 0x244   : > { %2172 = vst [vmem:[%s3293_s8 + $0xf8] sm:$0xff] %v2138_v58 }
 0x245 PF: > { %s16_s21 = sadd.s32 1, %s2864_s21  }
 0x246   : > { %p13_p4 = scmp.ge.s32.totalorder %s16_s21, 4  }
 0x248   :  { %15 = sbr.rel (!%p13_p4) target bundleno = 1 (0x1), region = 86 }

</bundles_post_ra>
